<compile_context>
chip_gen: v5e
topology: v5e:2x2
jax: 0.10.0
libtpu: 0.0.40
codegen_flags: <defaults>
</compile_context>

<pallas_src>
import functools

import jax
import jax.numpy as jnp
from jax import lax
from jax.experimental import pallas as pl
from jax.experimental.pallas import tpu as pltpu


def _vq_kernel(z_ref, wsq_ref, w_ref, zq_ref, idx_ref, cnt_ref, *, n_valid):
    # z_ref:   [tn, D]    tile of flattened inputs
    # wsq_ref: [1, K_pad] precomputed ||w_k||^2 (padded entries are +huge)
    # w_ref:   [K_pad, D] codebook (padded rows are zero)
    i = pl.program_id(0)

    z = z_ref[...].astype(jnp.float32)          # [tn, D]
    w = w_ref[...].astype(jnp.float32)          # [Kp, D]
    w_sq = wsq_ref[...].astype(jnp.float32)     # [1, Kp]

    # argmin_k (||z||^2 + ||w_k||^2 - 2 z.w_k) == argmin_k (||w_k||^2 - 2 z.w_k)
    # z @ w^T without an explicit transpose: contract dim 1 of z with dim 1 of w.
    zw = lax.dot_general(z, w, (((1,), (1,)), ((), ())),
                         preferred_element_type=jnp.float32)   # [tn, Kp]
    score = w_sq - 2.0 * zw                                    # [tn, Kp]

    idx = jnp.argmin(score, axis=1).astype(jnp.int32)          # [tn]

    tn, kp = score.shape
    cols = lax.broadcasted_iota(jnp.int32, (tn, kp), 1)
    enc = (idx[:, None] == cols).astype(jnp.float32)           # [tn, Kp] one-hot

    # codebook gather as one-hot @ weight (exact, runs on the MXU)
    zq = jnp.dot(enc, w, preferred_element_type=jnp.float32)   # [tn, D]

    # per-tile code histogram; mask rows that are padding (global row >= n_valid)
    rows = lax.broadcasted_iota(jnp.int32, (tn, 1), 0) + i * tn
    valid = (rows < n_valid).astype(jnp.float32)               # [tn, 1]
    cnt = jnp.sum(enc * valid, axis=0, keepdims=True)          # [1, Kp]

    zq_ref[...] = zq.astype(zq_ref.dtype)
    idx_ref[...] = idx[None, :]                                # lane-dense [1, tn]
    cnt_ref[...] = cnt


def vq_pallas(z_flat, weight, *, tn=512, vmem_limit_bytes=48 * 1024 * 1024):
    """z_flat: [N, D], weight: [K, D].

    Returns (z_q_flat [N, D], indices [N] int32, counts [K] float32)."""
    N, D = z_flat.shape
    K, _ = weight.shape

    n_pad = ((N + tn - 1) // tn) * tn
    k_pad = ((K + 127) // 128) * 128
    grid = (n_pad // tn,)

    zp = jnp.pad(z_flat, ((0, n_pad - N), (0, 0)))
    wp = jnp.pad(weight, ((0, k_pad - K), (0, 0)))
    w_sq = jnp.sum(weight.astype(jnp.float32) ** 2, axis=1)
    # padded codes get a huge score so argmin never picks them
    w_sq = jnp.pad(w_sq, (0, k_pad - K), constant_values=jnp.float32(1e30))[None, :]

    kernel = functools.partial(_vq_kernel, n_valid=N)

    zq, idx2d, cnts = pl.pallas_call(
        kernel,
        out_shape=(
            jax.ShapeDtypeStruct((n_pad, D), z_flat.dtype),
            jax.ShapeDtypeStruct((grid[0], tn), jnp.int32),
            jax.ShapeDtypeStruct((grid[0], k_pad), jnp.float32),
        ),
        grid_spec=pltpu.PrefetchScalarGridSpec(
            num_scalar_prefetch=0,
            grid=grid,
            in_specs=[
                pl.BlockSpec((tn, D), lambda i: (i, 0)),
                pl.BlockSpec((1, k_pad), lambda i: (0, 0)),   # constant -> resident
                pl.BlockSpec((k_pad, D), lambda i: (0, 0)),   # constant -> resident
            ],
            out_specs=[
                pl.BlockSpec((tn, D), lambda i: (i, 0)),
                pl.BlockSpec((1, tn), lambda i: (i, 0)),
                pl.BlockSpec((1, k_pad), lambda i: (i, 0)),
            ],
        ),
        compiler_params=pltpu.CompilerParams(
            dimension_semantics=("parallel",),
            vmem_limit_bytes=vmem_limit_bytes),
    )(zp, w_sq, wp)

    counts = jnp.sum(cnts, axis=0)[:K]
    return zq[:N], idx2d.reshape(-1)[:N], counts


def ema_vector_quantizer_forward(z_nchw, weight, beta):
    """Forward pass of EMAVectorQuantizer (eval mode).

    z_nchw: [B, C, H, W] with C == codebook_dim; weight: [num_tokens, codebook_dim].
    Returns (z_q_nchw, loss, (perplexity, encodings, encoding_indices))."""
    B, C, H, W = z_nchw.shape
    K = weight.shape[0]

    # b c h w -> b h w c
    z = jnp.transpose(z_nchw, (0, 2, 3, 1))
    z_flat = z.reshape(-1, C)
    N = z_flat.shape[0]

    zq_flat, encoding_indices, counts = vq_pallas(z_flat, weight)
    z_q = zq_flat.reshape(z.shape)

    # perplexity from the in-kernel histogram (== mean of one-hot encodings)
    avg_probs = counts / N
    perplexity = jnp.exp(-jnp.sum(avg_probs * jnp.log(avg_probs + 1e-10)))

    # dense one-hot encodings (module API parity) rebuilt outside the hot path
    encodings = jax.nn.one_hot(encoding_indices, K, dtype=z.dtype)

    # commitment loss: beta * mse(z_q.detach(), z)
    loss = beta * jnp.mean((jax.lax.stop_gradient(z_q) - z) ** 2)

    # straight-through estimator
    z_q = z + jax.lax.stop_gradient(z_q - z)

    # b h w c -> b c h w
    z_q = jnp.transpose(z_q, (0, 3, 1, 2))
    return z_q, loss, (perplexity, encodings, encoding_indices)


if __name__ == "__main__":
    key = jax.random.PRNGKey(0)
    k_z, k_w = jax.random.split(key)

    # small shapes: n_embed (num_tokens) = 64, embedding_dim (codebook_dim) = 16
    B, C, H, W = 2, 16, 16, 16
    n_embed = 64
    beta = 0.25

    z = jax.random.normal(k_z, (B, C, H, W), dtype=jnp.float32)
    weight = jax.random.normal(k_w, (n_embed, C), dtype=jnp.float32)

    z_q, loss, (perplexity, encodings, idx) = ema_vector_quantizer_forward(
        z, weight, beta)
    jax.block_until_ready((z_q, loss, perplexity, encodings, idx))

    # plain-JAX reference (matches the PyTorch formula)
    z_bhwc = jnp.transpose(z, (0, 2, 3, 1)).reshape(-1, C)
    d_ref = (jnp.sum(z_bhwc**2, 1, keepdims=True) + jnp.sum(weight**2, 1)
             - 2.0 * z_bhwc @ weight.T)
    idx_ref = jnp.argmin(d_ref, axis=1)
    assert jnp.all(idx == idx_ref), "argmin mismatch"

    zq_ref = weight[idx_ref].reshape(B, H, W, C).transpose(0, 3, 1, 2)
    assert jnp.allclose(z_q, zq_ref, atol=1e-5), "z_q mismatch"

    enc_ref = jax.nn.one_hot(idx_ref, n_embed, dtype=jnp.float32)
    avg_ref = jnp.mean(enc_ref, axis=0)
    perp_ref = jnp.exp(-jnp.sum(avg_ref * jnp.log(avg_ref + 1e-10)))
    assert jnp.allclose(perplexity, perp_ref, rtol=1e-5), "perplexity mismatch"
    assert jnp.allclose(jnp.sum(encodings, axis=0),
                        jnp.sum(enc_ref, axis=0)), "encodings mismatch"

    print("KERNEL_OK")
</pallas_src>

<mosaic_0001>
module attributes {stable_mosaic.version = 11 : i64} {
  func.func @_vq_kernel(%arg0: i32, %arg1: memref<512x16xf32, #tpu.memory_space<vmem>>, %arg2: memref<1x128xf32, #tpu.memory_space<vmem>>, %arg3: memref<128x16xf32, #tpu.memory_space<vmem>>, %arg4: memref<512x16xf32, #tpu.memory_space<vmem>>, %arg5: memref<1x512xi32, #tpu.memory_space<vmem>>, %arg6: memref<1x128xf32, #tpu.memory_space<vmem>>) attributes {dimension_semantics = [#tpu.dimension_semantics<parallel>], iteration_bounds = array<i64: 1>, scalar_prefetch = 0 : i64, scratch_operands = 0 : i64, tpu.core_type = #tpu.core_type<tc>, window_params = [{transform_indices = @transform_0, window_bounds = array<i64: 512, 16>}, {pipeline_mode = #tpu.pipeline_mode<synchronous>, transform_indices = @transform_1, window_bounds = array<i64: 1, 128>}, {pipeline_mode = #tpu.pipeline_mode<synchronous>, transform_indices = @transform_2, window_bounds = array<i64: 128, 16>}, {transform_indices = @transform_3, window_bounds = array<i64: 512, 16>}, {transform_indices = @transform_4, window_bounds = array<i64: 1, 512>}, {transform_indices = @transform_5, window_bounds = array<i64: 1, 128>}]} {
    %c0 = arith.constant 0 : index
    %c0_0 = arith.constant 0 : index
    %0 = vector.load %arg1[%c0, %c0_0] : memref<512x16xf32, #tpu.memory_space<vmem>>, vector<512x16xf32>
    %c0_1 = arith.constant 0 : index
    %c0_2 = arith.constant 0 : index
    %1 = vector.load %arg3[%c0_1, %c0_2] : memref<128x16xf32, #tpu.memory_space<vmem>>, vector<128x16xf32>
    %c0_3 = arith.constant 0 : index
    %c0_4 = arith.constant 0 : index
    %2 = vector.load %arg2[%c0_3, %c0_4] : memref<1x128xf32, #tpu.memory_space<vmem>>, vector<1x128xf32>
    %cst = arith.constant dense<0.000000e+00> : vector<512x128xf32>
    %3 = tpu.matmul %0, %1, %cst {dimension_numbers = #tpu.dot_dimension_numbers<[1], [1], [0], [0], [0, 0, 1, 0], [], []>} : vector<512x16xf32>, vector<128x16xf32>, vector<512x128xf32> -> vector<512x128xf32>
    %cst_5 = arith.constant 2.000000e+00 : f32
    %4 = vector.broadcast %cst_5 : f32 to vector<512x128xf32>
    %5 = arith.mulf %4, %3 : vector<512x128xf32>
    %6 = vector.broadcast %2 : vector<1x128xf32> to vector<512x128xf32>
    %7 = arith.subf %6, %5 : vector<512x128xf32>
    %8 = tpu.reduce_index %7 {axis = 1 : i32, kind = #tpu.reduction_kind<arg_min>} : vector<512x128xf32> -> vector<512xi32>
    %9 = tpu.iota {dimensions = array<i32: 1>} : vector<512x128xi32>
    %10 = vector.shape_cast %8 : vector<512xi32> to vector<512x1xi32>
    %11 = vector.broadcast %10 : vector<512x1xi32> to vector<512x128xi32>
    %12 = arith.cmpi eq, %11, %9 : vector<512x128xi32>
    %13 = arith.extui %12 : vector<512x128xi1> to vector<512x128xi32>
    %14 = arith.sitofp %13 : vector<512x128xi32> to vector<512x128xf32>
    %cst_6 = arith.constant dense<0.000000e+00> : vector<512x16xf32>
    %15 = tpu.matmul %14, %1, %cst_6 {dimension_numbers = #tpu.dot_dimension_numbers<[1], [0], [0], [1], [0, 0, 1, 1], [], []>} : vector<512x128xf32>, vector<128x16xf32>, vector<512x16xf32> -> vector<512x16xf32>
    %16 = tpu.iota {dimensions = array<i32: 0>} : vector<512x1xi32>
    %c512_i32 = arith.constant 512 : i32
    %17 = arith.muli %arg0, %c512_i32 : i32
    %18 = vector.broadcast %17 : i32 to vector<512x1xi32>
    %19 = arith.addi %16, %18 : vector<512x1xi32>
    %c512_i32_7 = arith.constant 512 : i32
    %20 = vector.broadcast %c512_i32_7 : i32 to vector<512x1xi32>
    %21 = arith.cmpi slt, %19, %20 : vector<512x1xi32>
    %22 = arith.extui %21 : vector<512x1xi1> to vector<512x1xi32>
    %23 = arith.sitofp %22 : vector<512x1xi32> to vector<512x1xf32>
    %24 = vector.broadcast %23 : vector<512x1xf32> to vector<512x128xf32>
    %25 = arith.mulf %14, %24 : vector<512x128xf32>
    %cst_8 = arith.constant dense<0.000000e+00> : vector<128xf32>
    %26 = vector.multi_reduction <add>, %25, %cst_8 [0] : vector<512x128xf32> to vector<128xf32>
    %27 = vector.shape_cast %26 : vector<128xf32> to vector<1x128xf32>
    %c0_9 = arith.constant 0 : index
    %c0_10 = arith.constant 0 : index
    %28 = vector.load %arg4[%c0_9, %c0_10] : memref<512x16xf32, #tpu.memory_space<vmem>>, vector<512x16xf32>
    tpu.vector_store %arg4[%c0_9, %c0_10], %15 {strides = array<i32>} : memref<512x16xf32, #tpu.memory_space<vmem>>, vector<512x16xf32>,
    %29 = vector.shape_cast %8 : vector<512xi32> to vector<1x512xi32>
    %c0_11 = arith.constant 0 : index
    %c0_12 = arith.constant 0 : index
    %30 = vector.load %arg5[%c0_11, %c0_12] : memref<1x512xi32, #tpu.memory_space<vmem>>, vector<1x512xi32>
    tpu.vector_store %arg5[%c0_11, %c0_12], %29 {strides = array<i32>} : memref<1x512xi32, #tpu.memory_space<vmem>>, vector<1x512xi32>,
    %c0_13 = arith.constant 0 : index
    %c0_14 = arith.constant 0 : index
    %31 = vector.load %arg6[%c0_13, %c0_14] : memref<1x128xf32, #tpu.memory_space<vmem>>, vector<1x128xf32>
    tpu.vector_store %arg6[%c0_13, %c0_14], %27 {strides = array<i32>} : memref<1x128xf32, #tpu.memory_space<vmem>>, vector<1x128xf32>,
    return
  }
  func.func @transform_0(%arg0: i32) -> (i32, i32) {
    %c0_i32 = arith.constant 0 : i32
    %c0_i32_0 = arith.constant 0 : i32
    return %arg0, %c0_i32 : i32, i32
  }
  func.func @transform_1(%arg0: i32) -> (i32, i32) {
    %c0_i32 = arith.constant 0 : i32
    %c0_i32_0 = arith.constant 0 : i32
    %c0_i32_1 = arith.constant 0 : i32
    return %c0_i32, %c0_i32_0 : i32, i32
  }
  func.func @transform_2(%arg0: i32) -> (i32, i32) {
    %c0_i32 = arith.constant 0 : i32
    %c0_i32_0 = arith.constant 0 : i32
    %c0_i32_1 = arith.constant 0 : i32
    return %c0_i32, %c0_i32_0 : i32, i32
  }
  func.func @transform_3(%arg0: i32) -> (i32, i32) {
    %c0_i32 = arith.constant 0 : i32
    %c0_i32_0 = arith.constant 0 : i32
    return %arg0, %c0_i32 : i32, i32
  }
  func.func @transform_4(%arg0: i32) -> (i32, i32) {
    %c0_i32 = arith.constant 0 : i32
    %c0_i32_0 = arith.constant 0 : i32
    return %arg0, %c0_i32 : i32, i32
  }
  func.func @transform_5(%arg0: i32) -> (i32, i32) {
    %c0_i32 = arith.constant 0 : i32
    %c0_i32_0 = arith.constant 0 : i32
    return %arg0, %c0_i32 : i32, i32
  }
}

</mosaic_0001>

<bundles_post_ra>
// kernel: tpu_custom_call.1
= control target key start
LH: loop header
LB: loop body
LE: loop exit
PB: predicated region body
PF: predicated region fallthrough
CT: control target
= control target key end

     0   :  { %11 = vsyncpa [#allocation3], 0  ;;  %vm100_vm0 = vcmask 130048   ;;  %s5850_s0 = inlined_call_operand.vmem [shape: f32[512,16], index: 0, kind: input, shape index: {}]   ;;  %s5851_s1 = inlined_call_operand.vmem [shape: f32[1,128], index: 1, kind: input, shape index: {}]   ;;  %s5852_s2 = inlined_call_operand.vmem [shape: f32[128,16], index: 2, kind: input, shape index: {}]   ;;  %s5853_s3 = inlined_call_operand.vmem [shape: f32[512,16], index: 3, kind: output, shape index: {0}]   ;;  %s5854_s4 = inlined_call_operand.hbm [shape: s32[1,512], index: 4, kind: output, shape index: {1}]   ;;  %s5855_s5 = inlined_call_operand.hbm [shape: f32[1,128], index: 5, kind: output, shape index: {2}]  }
   0x1   :  { %v3597_v0 = vld [vmem:[%s5852_s2 + $0x78] sm:$0xff]  ;;  %v3606_v1 = vld [vmem:[%s5852_s2 + $0x70] sm:$0xff] }
   0x2   :  { %3224 = vmatpush.xpose.msk.msra.mxu0 %vm100_vm0, %v3597_v0  ;;  %3432 = vmatpush.xpose.msk.msra.mxu2 %vm100_vm0, %v3597_v0 }
   0x3   :  { %3433 = vmatpush.xpose.msk.msra.mxu3 %vm100_vm0, %v3597_v0  ;;  %3464 = vmatpush.msra.mxu1 %v3597_v0 }
   0x4   :  { %12 = vsyncpa [#allocation5], 0  ;;  %v3617_v2 = vld [vmem:[%s5852_s2 + $0x68] sm:$0xff]  ;;  %v3627_v3 = vld [vmem:[%s5852_s2 + $0x60] sm:$0xff]  ;;  %s3562_s10 = smov [#allocation4]   ;;  %s3208_s14 = sshll.u32 %s5855_s5, 4  ;;  %s3209_s14 = int_to_ptr.hbm [resolvable:$true] %s3208_s14 }
   0x5   :  { %3466 = vmatpush.msra.mxu1 %v3606_v1  ;;  %v3635_v4 = vld [vmem:[%s5852_s2 + $0x58] sm:$0xff]  ;;  %v3645_v5 = vld [vmem:[%s5852_s2 + $0x50] sm:$0xff]  ;;  %v3653_v6 = vld [vmem:[%s5852_s2 + $0x48] sm:$0xff]  ;;  %s3206_s11 = sshll.u32 %s3562_s10, 4  ;;  %s3207_s11 = int_to_ptr.vmem [resolvable:$true] %s3206_s11 }
   0x6   :  { %3225 = vmatpush.xpose.msk.msra.mxu0 %vm100_vm0, %v3606_v1  ;;  %3434 = vmatpush.xpose.msk.msra.mxu2 %vm100_vm0, %v3606_v1  ;;  %v3663_v7 = vld [vmem:[%s5852_s2 + $0x40] sm:$0xff]  ;;  %v3671_v8 = vld [vmem:[%s5852_s2 + $0x38] sm:$0xff]  ;;  %v3681_v9 = vld [vmem:[%s5852_s2 + $0x30] sm:$0xff] }
   0x7   :  { %3435 = vmatpush.xpose.msk.msra.mxu3 %vm100_vm0, %v3606_v1  ;;  %3468 = vmatpush.msra.mxu1 %v3617_v2  ;;  %v3689_v10 = vld [vmem:[%s5852_s2 + $0x28] sm:$0xff]  ;;  %v3699_v11 = vld [vmem:[%s5852_s2 + $0x20] sm:$0xff]  ;;  %v3707_v12 = vld [vmem:[%s5852_s2 + $0x18] sm:$0xff] }
   0x8   :  { %v3717_v13 = vld [vmem:[%s5852_s2 + $0x10] sm:$0xff]  ;;  %v3725_v14 = vld [vmem:[%s5852_s2 + $0x8] sm:$0xff]  ;;  %v3735_v15 = vld [vmem:[%s5852_s2] sm:$0xff]  ;;  %s3197_s2 = sshll.u32 %s5854_s4, 4  ;;  %s3198_s2 = int_to_ptr.hbm [resolvable:$true] %s3197_s2 }
   0x9   :  { %3470 = vmatpush.msra.mxu1 %v3627_v3  ;;  %v19_v16 = vld [vmem:[%s5850_s0] sm:$0xff]  ;;  %v20_v17 = vld [vmem:[%s5850_s0 + $0x8] sm:$0xff]  ;;  %v21_v18 = vld [vmem:[%s5850_s0 + $0x10] sm:$0xff] }
   0xa   :  { %3226 = vmatpush.xpose.msk.msra.mxu0 %vm100_vm0, %v3617_v2  ;;  %3436 = vmatpush.xpose.msk.msra.mxu2 %vm100_vm0, %v3617_v2  ;;  %v22_v19 = vld [vmem:[%s5850_s0 + $0x18] sm:$0xff]  ;;  %v48_v20 = vld [vmem:[%s5850_s0 + $0xe8] sm:$0xff]  ;;  %v23_v21 = vld [vmem:[%s5850_s0 + $0x20] sm:$0xff] }
   0xb   :  { %3437 = vmatpush.xpose.msk.msra.mxu3 %vm100_vm0, %v3617_v2  ;;  %3472 = vmatpush.msra.mxu1 %v3635_v4  ;;  %v49_v22 = vld [vmem:[%s5850_s0 + $0xf0] sm:$0xff]  ;;  %v24_v23 = vld [vmem:[%s5850_s0 + $0x28] sm:$0xff]  ;;  %v50_v24 = vld [vmem:[%s5850_s0 + $0xf8] sm:$0xff] }
   0xc   :  { %v25_v25 = vld [vmem:[%s5850_s0 + $0x30] sm:$0xff]  ;;  %v51_v26 = vld [vmem:[%s5850_s0 + $0x100] sm:$0xff]  ;;  %v26_v27 = vld [vmem:[%s5850_s0 + $0x38] sm:$0xff] }
   0xd   :  { %3474 = vmatpush.msra.mxu1 %v3645_v5  ;;  %v52_v28 = vld [vmem:[%s5850_s0 + $0x108] sm:$0xff]  ;;  %v27_v29 = vld [vmem:[%s5850_s0 + $0x40] sm:$0xff]  ;;  %v53_v30 = vld [vmem:[%s5850_s0 + $0x110] sm:$0xff] }
   0xe   :  { %3227 = vmatpush.xpose.msk.msra.mxu0 %vm100_vm0, %v3627_v3  ;;  %3438 = vmatpush.xpose.msk.msra.mxu2 %vm100_vm0, %v3627_v3  ;;  %v28_v31 = vld [vmem:[%s5850_s0 + $0x48] sm:$0xff]  ;;  %v54_v32 = vld [vmem:[%s5850_s0 + $0x118] sm:$0xff]  ;;  %v29_v33 = vld [vmem:[%s5850_s0 + $0x50] sm:$0xff] }
   0xf   :  { %3439 = vmatpush.xpose.msk.msra.mxu3 %vm100_vm0, %v3627_v3  ;;  %3476 = vmatpush.msra.mxu1 %v3653_v6  ;;  %v55_v34 = vld [vmem:[%s5850_s0 + $0x120] sm:$0xff]  ;;  %v30_v35 = vld [vmem:[%s5850_s0 + $0x58] sm:$0xff]  ;;  %v56_v36 = vld [vmem:[%s5850_s0 + $0x128] sm:$0xff] }
  0x10   :  { %v31_v37 = vld [vmem:[%s5850_s0 + $0x60] sm:$0xff]  ;;  %v57_v38 = vld [vmem:[%s5850_s0 + $0x130] sm:$0xff]  ;;  %v32_v39 = vld [vmem:[%s5850_s0 + $0x68] sm:$0xff] }
  0x11   :  { %3478 = vmatpush.msra.mxu1 %v3663_v7  ;;  %v58_v40 = vld [vmem:[%s5850_s0 + $0x138] sm:$0xff]  ;;  %v33_v41 = vld [vmem:[%s5850_s0 + $0x70] sm:$0xff]  ;;  %v59_v42 = vld [vmem:[%s5850_s0 + $0x140] sm:$0xff] }
  0x12   :  { %3228 = vmatpush.xpose.msk.msra.mxu0 %vm100_vm0, %v3635_v4  ;;  %3440 = vmatpush.xpose.msk.msra.mxu2 %vm100_vm0, %v3635_v4  ;;  %v34_v43 = vld [vmem:[%s5850_s0 + $0x78] sm:$0xff]  ;;  %v60_v44 = vld [vmem:[%s5850_s0 + $0x148] sm:$0xff]  ;;  %v3937_v45 = vld [vmem:[%s5851_s1] ss:$0 sm:$0xff] }
  0x13   :  { %3441 = vmatpush.xpose.msk.msra.mxu3 %vm100_vm0, %v3635_v4  ;;  %3480 = vmatpush.msra.mxu1 %v3671_v8  ;;  %v35_v47 = vld [vmem:[%s5850_s0 + $0x80] sm:$0xff]  ;;  %v61_v50 = vld [vmem:[%s5850_s0 + $0x150] sm:$0xff]  ;;  %v36_v52 = vld [vmem:[%s5850_s0 + $0x88] sm:$0xff] }
  0x14   :  { %v62_v55 = vld [vmem:[%s5850_s0 + $0x158] sm:$0xff]  ;;  %v37_v57 = vld [vmem:[%s5850_s0 + $0x90] sm:$0xff]  ;;  %v63_v60 = vld [vmem:[%s5850_s0 + $0x160] sm:$0xff] }
  0x15   :  { %3482 = vmatpush.msra.mxu1 %v3681_v9  ;;  %v38_v62 = vld [vmem:[%s5850_s0 + $0x98] sm:$0xff] }
  0x16   :  { %3229 = vmatpush.xpose.msk.msra.mxu0 %vm100_vm0, %v3645_v5  ;;  %3442 = vmatpush.xpose.msk.msra.mxu2 %vm100_vm0, %v3645_v5 }
  0x17   :  { %3443 = vmatpush.xpose.msk.msra.mxu3 %vm100_vm0, %v3645_v5  ;;  %3484 = vmatpush.msra.mxu1 %v3689_v10 }
  0x19   :  { %3486 = vmatpush.msra.mxu1 %v3699_v11 }
  0x1a   :  { %3230 = vmatpush.xpose.msk.msra.mxu0 %vm100_vm0, %v3653_v6  ;;  %3444 = vmatpush.xpose.msk.msra.mxu2 %vm100_vm0, %v3653_v6 }
  0x1b   :  { %3445 = vmatpush.xpose.msk.msra.mxu3 %vm100_vm0, %v3653_v6  ;;  %3488 = vmatpush.msra.mxu1 %v3707_v12 }
  0x1d   :  { %3490 = vmatpush.msra.mxu1 %v3717_v13 }
  0x1e   :  { %3231 = vmatpush.xpose.msk.msra.mxu0 %vm100_vm0, %v3663_v7  ;;  %3446 = vmatpush.xpose.msk.msra.mxu2 %vm100_vm0, %v3663_v7 }
  0x1f   :  { %3447 = vmatpush.xpose.msk.msra.mxu3 %vm100_vm0, %v3663_v7  ;;  %3492 = vmatpush.msra.mxu1 %v3725_v14 }
  0x21   :  { %3494 = vmatpush.msra.mxu1 %v3735_v15 }
  0x22   :  { %3232 = vmatpush.xpose.msk.msra.mxu0 %vm100_vm0, %v3671_v8  ;;  %3448 = vmatpush.xpose.msk.msra.mxu2 %vm100_vm0, %v3671_v8 }
  0x23   :  { %3449 = vmatpush.xpose.msk.msra.mxu3 %vm100_vm0, %v3671_v8 }
  0x26   :  { %3233 = vmatpush.xpose.msk.msra.mxu0 %vm100_vm0, %v3681_v9  ;;  %3450 = vmatpush.xpose.msk.msra.mxu2 %vm100_vm0, %v3681_v9 }
  0x27   :  { %3451 = vmatpush.xpose.msk.msra.mxu3 %vm100_vm0, %v3681_v9 }
  0x2a   :  { %3234 = vmatpush.xpose.msk.msra.mxu0 %vm100_vm0, %v3689_v10  ;;  %3452 = vmatpush.xpose.msk.msra.mxu2 %vm100_vm0, %v3689_v10 }
  0x2b   :  { %3453 = vmatpush.xpose.msk.msra.mxu3 %vm100_vm0, %v3689_v10 }
  0x2e   :  { %3235 = vmatpush.xpose.msk.msra.mxu0 %vm100_vm0, %v3699_v11  ;;  %3454 = vmatpush.xpose.msk.msra.mxu2 %vm100_vm0, %v3699_v11 }
  0x2f   :  { %3455 = vmatpush.xpose.msk.msra.mxu3 %vm100_vm0, %v3699_v11 }
  0x32   :  { %3236 = vmatpush.xpose.msk.msra.mxu0 %vm100_vm0, %v3707_v12  ;;  %3456 = vmatpush.xpose.msk.msra.mxu2 %vm100_vm0, %v3707_v12 }
  0x33   :  { %3457 = vmatpush.xpose.msk.msra.mxu3 %vm100_vm0, %v3707_v12 }
  0x36   :  { %3237 = vmatpush.xpose.msk.msra.mxu0 %vm100_vm0, %v3717_v13  ;;  %3458 = vmatpush.xpose.msk.msra.mxu2 %vm100_vm0, %v3717_v13 }
  0x37   :  { %3459 = vmatpush.xpose.msk.msra.mxu3 %vm100_vm0, %v3717_v13 }
  0x3a   :  { %3238 = vmatpush.xpose.msk.msra.mxu0 %vm100_vm0, %v3725_v14  ;;  %3460 = vmatpush.xpose.msk.msra.mxu2 %vm100_vm0, %v3725_v14 }
  0x3b   :  { %3461 = vmatpush.xpose.msk.msra.mxu3 %vm100_vm0, %v3725_v14 }
  0x3e   :  { %3239 = vmatpush.xpose.msk.msra.mxu0 %vm100_vm0, %v3735_v15  ;;  %3462 = vmatpush.xpose.msk.msra.mxu2 %vm100_vm0, %v3735_v15 }
  0x3f   :  { %3463 = vmatpush.xpose.msk.msra.mxu3 %vm100_vm0, %v3735_v15 }
  0x41   :  { %3240 = vmatmul.msk.f32.vlgmr.msra.gmra.mxu0 %vm100_vm0, %v19_v16  ;;  %3269 = vmatmul.msk.f32.vlgmr.msra.gmra.mxu2 %vm100_vm0, %v48_v20  ;;  %v67_v16 = vld [vmem:[%s5850_s0 + $0x180] sm:$0xff] }
  0x42   :  { %1003 = vmatpush.msrb.mxu0 %v3597_v0 }
  0x43   :  { %3465 = vmatpush.msrb.mxu3 %v3597_v0 }
  0x44   :  { %1004 = vmatpush.msrb.mxu0 %v3606_v1 }
  0x45   :  { %3467 = vmatpush.msrb.mxu3 %v3606_v1  ;;  %v64_v1 = vld [vmem:[%s5850_s0 + $0x168] sm:$0xff] }
  0x46   :  { %1005 = vmatpush.msrb.mxu0 %v3617_v2 }
  0x47   :  { %3469 = vmatpush.msrb.mxu3 %v3617_v2 }
  0x48   :  { %1006 = vmatpush.msrb.mxu0 %v3627_v3 }
  0x49   :  { %3471 = vmatpush.msrb.mxu3 %v3627_v3  ;;  %3241 = vmatmul.msk.f32.gmra.mxu0 %vm100_vm0, %v20_v17  ;;  %v39_v3 = vld [vmem:[%s5850_s0 + $0xa0] sm:$0xff] }
  0x4a   :  { %1007 = vmatpush.msrb.mxu0 %v3635_v4  ;;  %3270 = vmatmul.msk.f32.gmra.mxu2 %vm100_vm0, %v49_v22 }
  0x4b   :  { %3473 = vmatpush.msrb.mxu3 %v3635_v4 }
  0x4c   :  { %1008 = vmatpush.msrb.mxu0 %v3645_v5 }
  0x4d   :  { %3475 = vmatpush.msrb.mxu3 %v3645_v5 }
  0x4e   :  { %1009 = vmatpush.msrb.mxu0 %v3653_v6 }
  0x4f   :  { %3477 = vmatpush.msrb.mxu3 %v3653_v6  ;;  %v65_v6 = vld [vmem:[%s5850_s0 + $0x170] sm:$0xff] }
  0x50   :  { %1010 = vmatpush.msrb.mxu0 %v3663_v7 }
  0x51   :  { %3479 = vmatpush.msrb.mxu3 %v3663_v7  ;;  %3242 = vmatmul.msk.f32.gmra.mxu0 %vm100_vm0, %v21_v18  ;;  %v42_v18 = vld [vmem:[%s5850_s0 + $0xb8] sm:$0xff] }
  0x52   :  { %1011 = vmatpush.msrb.mxu0 %v3671_v8  ;;  %3271 = vmatmul.msk.f32.gmra.mxu2 %vm100_vm0, %v50_v24 }
  0x53   :  { %3481 = vmatpush.msrb.mxu3 %v3671_v8  ;;  %v40_v8 = vld [vmem:[%s5850_s0 + $0xa8] sm:$0xff] }
  0x54   :  { %1012 = vmatpush.msrb.mxu0 %v3681_v9 }
  0x55   :  { %3483 = vmatpush.msrb.mxu3 %v3681_v9 }
  0x56   :  { %1013 = vmatpush.msrb.mxu0 %v3689_v10 }
  0x57   :  { %3485 = vmatpush.msrb.mxu3 %v3689_v10 }
  0x58   :  { %1014 = vmatpush.msrb.mxu0 %v3699_v11 }
  0x59   :  { %3487 = vmatpush.msrb.mxu3 %v3699_v11  ;;  %3243 = vmatmul.msk.f32.gmra.mxu0 %vm100_vm0, %v22_v19  ;;  %v66_v11 = vld [vmem:[%s5850_s0 + $0x178] sm:$0xff] }
  0x5a   :  { %1015 = vmatpush.msrb.mxu0 %v3707_v12  ;;  %3272 = vmatmul.msk.f32.gmra.mxu2 %vm100_vm0, %v51_v26  ;;  %v69_v26 = vld [vmem:[%s5850_s0 + $0x190] sm:$0xff] }
  0x5b   :  { %3489 = vmatpush.msrb.mxu3 %v3707_v12 }
  0x5c   :  { %1016 = vmatpush.msrb.mxu0 %v3717_v13 }
  0x5d   :  { %3491 = vmatpush.msrb.mxu3 %v3717_v13  ;;  %v41_v13 = vld [vmem:[%s5850_s0 + $0xb0] sm:$0xff] }
  0x5e   :  { %1017 = vmatpush.msrb.mxu0 %v3725_v14 }
  0x5f   :  { %3493 = vmatpush.msrb.mxu3 %v3725_v14 }
  0x60   :  { %1018 = vmatpush.msrb.mxu0 %v3735_v15 }
  0x61   :  { %3495 = vmatpush.msrb.mxu3 %v3735_v15  ;;  %3244 = vmatmul.msk.f32.gmra.mxu0 %vm100_vm0, %v23_v21  ;;  %v68_v21 = vld [vmem:[%s5850_s0 + $0x188] sm:$0xff] }
  0x62   :  { %3273 = vmatmul.msk.f32.gmra.mxu2 %vm100_vm0, %v52_v28  ;;  %v44_v28 = vld [vmem:[%s5850_s0 + $0xc8] sm:$0xff] }
  0x69   :  { %3245 = vmatmul.msk.f32.gmra.mxu0 %vm100_vm0, %v24_v23  ;;  %v43_v23 = vld [vmem:[%s5850_s0 + $0xc0] sm:$0xff] }
  0x6a   :  { %3274 = vmatmul.msk.f32.gmra.mxu2 %vm100_vm0, %v53_v30  ;;  %v70_v30 = vld [vmem:[%s5850_s0 + $0x198] sm:$0xff] }
  0x71   :  { %3246 = vmatmul.msk.f32.gmra.mxu0 %vm100_vm0, %v25_v25 }
  0x72   :  { %3275 = vmatmul.msk.f32.gmra.mxu2 %vm100_vm0, %v54_v32 }
  0x79   :  { %3247 = vmatmul.msk.f32.gmra.mxu0 %vm100_vm0, %v26_v27 }
  0x7a   :  { %3276 = vmatmul.msk.f32.gmra.mxu2 %vm100_vm0, %v55_v34 }
  0x81   :  { %3248 = vmatmul.msk.f32.gmra.mxu0 %vm100_vm0, %v27_v29 }
  0x82   :  { %3277 = vmatmul.msk.f32.gmra.mxu2 %vm100_vm0, %v56_v36 }
  0x89   :  { %3249 = vmatmul.msk.f32.gmra.mxu0 %vm100_vm0, %v28_v31 }
  0x8a   :  { %3278 = vmatmul.msk.f32.gmra.mxu2 %vm100_vm0, %v57_v38  ;;  %v46_v38 = vld [vmem:[%s5850_s0 + $0xd8] sm:$0xff] }
  0x91   :  { %3250 = vmatmul.msk.f32.gmra.mxu0 %vm100_vm0, %v29_v33  ;;  %v45_v33 = vld [vmem:[%s5850_s0 + $0xd0] sm:$0xff] }
  0x92   :  { %3279 = vmatmul.msk.f32.gmra.mxu2 %vm100_vm0, %v58_v40 }
  0x99   :  { %3251 = vmatmul.msk.f32.gmra.mxu0 %vm100_vm0, %v30_v35  ;;  %v71_v35 = vld [vmem:[%s5850_s0 + $0x1a0] sm:$0xff] }
  0x9a   :  { %3280 = vmatmul.msk.f32.gmra.mxu2 %vm100_vm0, %v59_v42  ;;  %v47_v42 = vld [vmem:[%s5850_s0 + $0xe0] sm:$0xff] }
  0xa1   :  { %3252 = vmatmul.msk.f32.gmra.mxu0 %vm100_vm0, %v31_v37 }
  0xa2   :  { %3281 = vmatmul.msk.f32.gmra.mxu2 %vm100_vm0, %v60_v44 }
  0xa9   :  { %3253 = vmatmul.msk.f32.gmra.mxu0 %vm100_vm0, %v32_v39 }
  0xaa   :  { %3282 = vmatmul.msk.f32.gmra.mxu2 %vm100_vm0, %v61_v50 }
  0xb1   :  { %3254 = vmatmul.msk.f32.gmra.mxu0 %vm100_vm0, %v33_v41 }
  0xb2   :  { %3283 = vmatmul.msk.f32.gmra.mxu2 %vm100_vm0, %v62_v55 }
  0xb9   :  { %3255 = vmatmul.msk.f32.gmra.mxu0 %vm100_vm0, %v34_v43 }
  0xba   :  { %3284 = vmatmul.msk.f32.gmra.mxu2 %vm100_vm0, %v63_v60 }
  0xbe   :  { %v358_v46 = vpop.f32.mrf.mxu0 }
  0xbf   :  { %v550_v48 = vmul.f32 2.0, %v358_v46  ;;  %v72_v46 = vld [vmem:[%s5850_s0 + $0x1a8] sm:$0xff] }
  0xc1   :  { %3256 = vmatmul.msk.f32.gmra.mxu0 %vm100_vm0, %v35_v47  ;;  %v617_v49 = vsub.f32 %v3937_v45, %v550_v48 }
  0xc2   :  { %3285 = vmatmul.msk.f32.gmra.mxu2 %vm100_vm0, %v64_v1 }
  0xc3   :  { %681 = vmin.index.xlane.f32.xlu0 %v617_v49 }
  0xc4   :  { %v4051_v47 = vpop.f32.mrf.mxu2 }
  0xc6   :  { %v361_v51 = vpop.f32.mrf.mxu0 }
  0xc7   :  { %v551_v53 = vmul.f32 2.0, %v361_v51 }
  0xc9   :  { %3257 = vmatmul.msk.f32.gmra.mxu0 %vm100_vm0, %v36_v52  ;;  %v618_v54 = vsub.f32 %v3937_v45, %v551_v53  ;;  %v73_v53 = vld [vmem:[%s5850_s0 + $0x1b0] sm:$0xff] }
  0xca   :  { %3286 = vmatmul.msk.f32.gmra.mxu2 %vm100_vm0, %v65_v6 }
  0xcb   :  { %683 = vmin.index.xlane.f32.xlu0 %v618_v54 }
  0xcd   :  { %v4058_v54 = vpop.f32.mrf.mxu2 }
  0xce   :  { %v364_v56 = vpop.f32.mrf.mxu0 }
  0xcf   :  { %v552_v58 = vmul.f32 2.0, %v364_v56  ;;  %v809_v56 = vlaneseq }
  0xd1   :  { %3258 = vmatmul.msk.f32.gmra.mxu0 %vm100_vm0, %v37_v57  ;;  %v619_v59 = vsub.f32 %v3937_v45, %v552_v58  ;;  %v4063_v57 = vand.u32 127, %v809_v56 }
  0xd2   :  { %3287 = vmatmul.msk.f32.gmra.mxu2 %vm100_vm0, %v66_v11  ;;  %v79_v11 = vld [vmem:[%s5850_s0 + $0x1e0] sm:$0xff] }
  0xd3   :  { %685 = vmin.index.xlane.f32.xlu1 %v619_v59  ;;  %3300 = vmatmul.msk.f32.vlgmr.msra.gmra.mxu3 %vm100_vm0, %v79_v11 }
  0xd6   :  { %v367_v61 = vpop.f32.mrf.mxu0 }
  0xd7   :  { %v553_v63 = vmul.f32 2.0, %v367_v61 }
  0xd9   :  { %3259 = vmatmul.msk.f32.gmra.mxu0 %vm100_vm0, %v38_v62  ;;  %v620_v0 = vsub.f32 %v3937_v45, %v553_v63 }
  0xda   :  { %3288 = vmatmul.msk.f32.gmra.mxu2 %vm100_vm0, %v67_v16 }
  0xdb   :  { %687 = vmin.index.xlane.f32.xlu1 %v620_v0 }
  0xde   :  { %v370_v2 = vpop.f32.mrf.mxu0 }
  0xdf   :  { %v554_v4 = vmul.f32 2.0, %v370_v2 }
  0xe1   :  { %3260 = vmatmul.msk.f32.gmra.mxu0 %vm100_vm0, %v39_v3  ;;  %v621_v5 = vsub.f32 %v3937_v45, %v554_v4  ;;  %v3559_v3 = vmov 1.0  }
  0xe2   :  { %3289 = vmatmul.msk.f32.gmra.mxu2 %vm100_vm0, %v68_v21 }
  0xe3   :  { %689 = vmin.index.xlane.f32.xlu2 %v621_v5 }
  0xe6   :  { %v373_v7 = vpop.f32.mrf.mxu0 }
  0xe7   :  { %v555_v9 = vmul.f32 2.0, %v373_v7 }
  0xe9   :  { %3261 = vmatmul.msk.f32.gmra.mxu0 %vm100_vm0, %v40_v8  ;;  %v622_v10 = vsub.f32 %v3937_v45, %v555_v9 }
  0xea   :  { %3290 = vmatmul.msk.f32.gmra.mxu2 %vm100_vm0, %v69_v26 }
  0xeb   :  { %691 = vmin.index.xlane.f32.xlu2 %v622_v10  ;;  %v74_v10 = vld [vmem:[%s5850_s0 + $0x1b8] sm:$0xff] }
  0xee   :  { %v376_v12 = vpop.f32.mrf.mxu0 }
  0xef   :  { %v556_v14 = vmul.f32 2.0, %v376_v12  ;;  %v4077_v12 = vpop.f32.mrf.mxu2 }
  0xf1   :  { %3262 = vmatmul.msk.f32.gmra.mxu0 %vm100_vm0, %v41_v13  ;;  %v623_v15 = vsub.f32 %v3937_v45, %v556_v14  ;;  %v3560_v13 = vmov 0.0  }
  0xf2   :  { %3291 = vmatmul.msk.f32.gmra.mxu2 %vm100_vm0, %v70_v30 }
  0xf3   :  { %693 = vmin.index.xlane.f32.xlu0 %v623_v15 }
  0xf6   :  { %v379_v17 = vpop.f32.mrf.mxu0 }
  0xf7   :  { %v557_v19 = vmul.f32 2.0, %v379_v17 }
  0xf9   :  { %3263 = vmatmul.msk.f32.gmra.mxu0 %vm100_vm0, %v42_v18  ;;  %v624_v20 = vsub.f32 %v3937_v45, %v557_v19 }
  0xfa   :  { %3292 = vmatmul.msk.f32.gmra.mxu2 %vm100_vm0, %v71_v35  ;;  %v75_v35 = vld [vmem:[%s5850_s0 + $0x1c0] sm:$0xff] }
  0xfb   :  { %695 = vmin.index.xlane.f32.xlu1 %v624_v20 }
  0xfe   :  { %v382_v22 = vpop.f32.mrf.mxu0 }
  0xff   :  { %v558_v24 = vmul.f32 2.0, %v382_v22 }
 0x101   :  { %3264 = vmatmul.msk.f32.gmra.mxu0 %vm100_vm0, %v43_v23  ;;  %v625_v25 = vsub.f32 %v3937_v45, %v558_v24 }
 0x102   :  { %3293 = vmatmul.msk.f32.gmra.mxu2 %vm100_vm0, %v72_v46 }
 0x103   :  { %697 = vmin.index.xlane.f32.xlu2 %v625_v25 }
 0x106   :  { %v385_v27 = vpop.f32.mrf.mxu0 }
 0x107   :  { %v559_v29 = vmul.f32 2.0, %v385_v27 }
 0x109   :  { %3265 = vmatmul.msk.f32.gmra.mxu0 %vm100_vm0, %v44_v28  ;;  %v626_v31 = vsub.f32 %v3937_v45, %v559_v29 }
 0x10a   :  { %3294 = vmatmul.msk.f32.gmra.mxu2 %vm100_vm0, %v73_v53 }
 0x10b   :  { %699 = vmin.index.xlane.f32.xlu0 %v626_v31 }
 0x10e   :  { %v388_v32 = vpop.f32.mrf.mxu0 }
 0x10f   :  { %v560_v34 = vmul.f32 2.0, %v388_v32 }
 0x111   :  { %3266 = vmatmul.msk.f32.gmra.mxu0 %vm100_vm0, %v45_v33  ;;  %v627_v36 = vsub.f32 %v3937_v45, %v560_v34 }
 0x112   :  { %3295 = vmatmul.msk.f32.gmra.mxu2 %vm100_vm0, %v74_v10 }
 0x113   :  { %701 = vmin.index.xlane.f32.xlu1 %v627_v36  ;;  %v80_v36 = vld [vmem:[%s5850_s0 + $0x1e8] sm:$0xff] }
 0x114   :  { %3301 = vmatmul.msk.f32.gmra.mxu3 %vm100_vm0, %v80_v36 }
 0x116   :  { %v391_v37 = vpop.f32.mrf.mxu0 }
 0x117   :  { %v561_v39 = vmul.f32 2.0, %v391_v37  ;;  %v4101_v37 = vpop.f32.mrf.mxu2 }
 0x119   :  { %3267 = vmatmul.msk.f32.gmra.mxu0 %vm100_vm0, %v46_v38  ;;  %v628_v40 = vsub.f32 %v3937_v45, %v561_v39 }
 0x11a   :  { %3296 = vmatmul.msk.f32.gmra.mxu2 %vm100_vm0, %v75_v35 }
 0x11b   :  { %703 = vmin.index.xlane.f32.xlu2 %v628_v40 }
 0x11e   :  { %v394_v41 = vpop.f32.mrf.mxu0 }
 0x11f   :  { %v562_v43 = vmul.f32 2.0, %v394_v41 }
 0x121   :  { %3268 = vmatmul.msk.f32.gmra.mxu0 %vm100_vm0, %v47_v42  ;;  %v629_v44 = vsub.f32 %v3937_v45, %v562_v43 }
 0x123   :  { %705 = vmin.index.xlane.f32.xlu0 %v629_v44 }
 0x126   :  { %v397_v48 = vpop.f32.mrf.mxu0 }
 0x127   :  { %v563_v49 = vmul.f32 2.0, %v397_v48 }
 0x129   :  { %v630_v50 = vsub.f32 %v3937_v45, %v563_v49 }
 0x12b   :  { %707 = vmin.index.xlane.f32.xlu1 %v630_v50 }
 0x12e   :  { %v400_v51 = vpop.f32.mrf.mxu0 }
 0x12f   :  { %v564_v52 = vmul.f32 2.0, %v400_v51 }
 0x131   :  { %v631_v55 = vsub.f32 %v3937_v45, %v564_v52 }
 0x133   :  { %709 = vmin.index.xlane.f32.xlu2 %v631_v55 }
 0x136   :  { %v682_v58 = vpop.xlane.xlu0 %681  ;;  %v403_v59 = vpop.f32.mrf.mxu0 }
 0x137   :  { %v1732_v60 = vperm.slane %v682_v58, 0  ;;  %v1733_v61 = vperm.slane %v682_v58, 1  ;;  %v1734_v62 = vperm.slane %v682_v58, 2  ;;  %v1735_v63 = vperm.slane %v682_v58, 3 }
 0x138   :  { %v1736_v0 = vperm.slane %v682_v58, 4  ;;  %v565_v1 = vmul.f32 2.0, %v403_v59  ;;  %vm811_vm1 = vcmp.eq.s32.totalorder %v682_v58, %v4063_v57  ;;  %v1737_v2 = vperm.slane %v682_v58, 5 }
 0x139   :  { %2244 = vst [vmem:[#allocation1] ss:$9 sm:$0xff] %v1732_v60  ;;  %3368 = vmatmul.msk.f32.vlgmr.msrb.gmra.mxu0 %vm811_vm1, %v3559_v3  ;;  %v1738_v4 = vperm.slane %v682_v58, 6  ;;  %v1739_v6 = vperm.slane %v682_v58, 7  ;;  %v3304_v14 = vsel %vm811_vm1, 1.0, %v3560_v13 }
 0x13a   :  { %2246 = vst [vmem:[#allocation1 + $0x1] ss:$9 sm:$0xff] %v1733_v61  ;;  %v632_v5 = vsub.f32 %v3937_v45, %v565_v1 }
 0x13b   :  { %2248 = vst [vmem:[#allocation1 + $0x2] ss:$9 sm:$0xff] %v1734_v62  ;;  %v81_v62 = vld [vmem:[%s5850_s0 + $0x1f0] sm:$0xff] }
 0x13c   :  { %2250 = vst [vmem:[#allocation1 + $0x3] ss:$9 sm:$0xff] %v1735_v63  ;;  %711 = vmin.index.xlane.f32.xlu0 %v632_v5  ;;  %3302 = vmatmul.msk.f32.gmra.mxu3 %vm100_vm0, %v81_v62  ;;  %v4123_v63 = vpop.f32.mrf.mxu2 }
 0x13d   :  { %2252 = vst [vmem:[#allocation1 + $0x4] ss:$9 sm:$0xff] %v1736_v0 }
 0x13e   :  { %2254 = vst [vmem:[#allocation1 + $0x5] ss:$9 sm:$0xff] %v1737_v2  ;;  %v684_v7 = vpop.xlane.xlu0 %683  ;;  %v406_v8 = vpop.f32.mrf.mxu0 }
 0x13f   :  { %2256 = vst [vmem:[#allocation1 + $0x6] ss:$9 sm:$0xff] %v1738_v4  ;;  %v566_v9 = vmul.f32 2.0, %v406_v8  ;;  %vm812_vm2 = vcmp.eq.s32.totalorder %v684_v7, %v4063_v57  ;;  %v1740_v18 = vperm.slane %v684_v7, 0  ;;  %v1741_v19 = vperm.slane %v684_v7, 1 }
 0x140   :  { %2258 = vst [vmem:[#allocation1 + $0x7] ss:$9 sm:$0xff] %v1739_v6  ;;  %v3305_v15 = vsel %vm812_vm2, 1.0, %v3560_v13  ;;  %v1742_v20 = vperm.slane %v684_v7, 2  ;;  %v1743_v24 = vperm.slane %v684_v7, 3  ;;  %v1744_v25 = vperm.slane %v684_v7, 4 }
 0x141   :  { %3369 = vmatmul.msk.f32.gmra.mxu0 %vm812_vm2, %v3559_v3  ;;  %v1599_v16 = vadd.f32 %v3305_v15, %v3304_v14  ;;  %v633_v17 = vsub.f32 %v3937_v45, %v566_v9  ;;  %v1745_v26 = vperm.slane %v684_v7, 5  ;;  %v1746_v28 = vperm.slane %v684_v7, 6 }
 0x142   :  { %v1747_v30 = vperm.slane %v684_v7, 7 }
 0x143   :  { %713 = vmin.index.xlane.f32.xlu1 %v633_v17 }
 0x144   :  { %v4136_v11 = vpop.f32.mrf.mxu2 }
 0x146   :  { %v686_v21 = vpop.xlane.xlu1 %685  ;;  %v409_v22 = vpop.f32.mrf.mxu0 }
 0x147   :  { %v4087_v23 = vld [vmem:[#allocation1] sm:$0xff]  ;;  %v567_v27 = vmul.f32 2.0, %v409_v22  ;;  %vm813_vm3 = vcmp.eq.s32.totalorder %v686_v21, %v4063_v57  ;;  %v1748_v40 = vperm.slane %v686_v21, 0  ;;  %v1749_v43 = vperm.slane %v686_v21, 1 }
 0x148   :  { %2260 = vst [vmem:[#allocation1] ss:$9 sm:$0xff] %v1740_v18  ;;  %v3306_v29 = vsel %vm813_vm3, 1.0, %v3560_v13  ;;  %3370 = vmatmul.msk.f32.vlgmr.msra.gmra.mxu1 %vm813_vm3, %v3559_v3  ;;  %v1750_v44 = vperm.slane %v686_v21, 2  ;;  %v1751_v48 = vperm.slane %v686_v21, 3  ;;  %v1752_v49 = vperm.slane %v686_v21, 4 }
 0x149   :  { %2261 = vst [vmem:[#allocation1 + $0x1] ss:$9 sm:$0xff] %v1741_v19  ;;  %v1600_v31 = vadd.f32 %v3306_v29, %v1599_v16  ;;  %v634_v32 = vsub.f32 %v3937_v45, %v567_v27  ;;  %v1753_v51 = vperm.slane %v686_v21, 5  ;;  %v1754_v52 = vperm.slane %v686_v21, 6  ;;  %v82_v19 = vld [vmem:[%s5850_s0 + $0x1f8] sm:$0xff] }
 0x14a   :  { %2262 = vst [vmem:[#allocation1 + $0x2] ss:$9 sm:$0xff] %v1742_v20  ;;  %v1755_v55 = vperm.slane %v686_v21, 7  ;;  %3303 = vmatmul.msk.f32.gmra.mxu3 %vm100_vm0, %v82_v19 }
 0x14b   :  { %2263 = vst [vmem:[#allocation1 + $0x3] ss:$9 sm:$0xff] %v1743_v24  ;;  %715 = vmin.index.xlane.f32.xlu2 %v634_v32 }
 0x14c   :  { %2264 = vst [vmem:[#allocation1 + $0x4] ss:$9 sm:$0xff] %v1744_v25  ;;  %v4150_v22 = vpop.f32.mrf.mxu2 }
 0x14d   :  { %2265 = vst [vmem:[#allocation1 + $0x5] ss:$9 sm:$0xff] %v1745_v26 }
 0x14e   :  { %2266 = vst [vmem:[#allocation1 + $0x6] ss:$9 sm:$0xff] %v1746_v28  ;;  %v4093_v33 = vpop.xlane.xlu1 %687  ;;  %v412_v34 = vpop.f32.mrf.mxu0 }
 0x14f   :  { %2267 = vst [vmem:[#allocation1 + $0x7] ss:$9 sm:$0xff] %v1747_v30  ;;  %v568_v38 = vmul.f32 2.0, %v412_v34  ;;  %vm814_vm4 = vcmp.eq.s32.totalorder %v4093_v33, %v4063_v57  ;;  %v1756_v0 = vperm.slane %v4093_v33, 0  ;;  %v1757_v1 = vperm.slane %v4093_v33, 1 }
 0x150   :  { %v3307_v39 = vsel %vm814_vm4, 1.0, %v3560_v13  ;;  %3371 = vmatmul.msk.f32.gmra.mxu1 %vm814_vm4, %v3559_v3  ;;  %v1758_v2 = vperm.slane %v4093_v33, 2  ;;  %v1759_v5 = vperm.slane %v4093_v33, 3  ;;  %v1760_v6 = vperm.slane %v4093_v33, 4 }
 0x151   :  { %v1601_v41 = vadd.f32 %v3307_v39, %v1600_v31  ;;  %v635_v42 = vsub.f32 %v3937_v45, %v568_v38  ;;  %v1761_v8 = vperm.slane %v4093_v33, 5  ;;  %v1762_v9 = vperm.slane %v4093_v33, 6 }
 0x152   :  { %v1763_v14 = vperm.slane %v4093_v33, 7 }
 0x153   :  { %717 = vmin.index.xlane.f32.xlu0 %v635_v42 }
 0x154   :  { %v4167_v38 = vpop.f32.mrf.mxu2 }
 0x156   :  { %v4110_v46 = vld [vmem:[#allocation1] sm:$0xff]  ;;  %v4112_v50 = vpop.xlane.xlu2 %689  ;;  %v415_v53 = vpop.f32.mrf.mxu0 }
 0x157   :  { %2269 = vst [vmem:[#allocation1] ss:$9 sm:$0xff] %v1748_v40  ;;  %v569_v58 = vmul.f32 2.0, %v415_v53  ;;  %vm815_vm5 = vcmp.eq.s32.totalorder %v4112_v50, %v4063_v57  ;;  %v1764_v20 = vperm.slane %v4112_v50, 0  ;;  %v1765_v21 = vperm.slane %v4112_v50, 1 }
 0x158   :  { %2270 = vst [vmem:[#allocation1 + $0x1] ss:$9 sm:$0xff] %v1749_v43  ;;  %v3308_v59 = vsel %vm815_vm5, 1.0, %v3560_v13  ;;  %3372 = vmatmul.msk.f32.gmra.mxu1 %vm815_vm5, %v3559_v3  ;;  %v1766_v24 = vperm.slane %v4112_v50, 2  ;;  %v1767_v26 = vperm.slane %v4112_v50, 3  ;;  %v1768_v27 = vperm.slane %v4112_v50, 4 }
 0x159   :  { %2271 = vst [vmem:[#allocation1 + $0x2] ss:$9 sm:$0xff] %v1750_v44  ;;  %v1602_v60 = vadd.f32 %v3308_v59, %v1601_v41  ;;  %v636_v61 = vsub.f32 %v3937_v45, %v569_v58  ;;  %v1769_v29 = vperm.slane %v4112_v50, 5  ;;  %v1770_v30 = vperm.slane %v4112_v50, 6 }
 0x15a   :  { %2272 = vst [vmem:[#allocation1 + $0x3] ss:$9 sm:$0xff] %v1751_v48  ;;  %v1771_v32 = vperm.slane %v4112_v50, 7 }
 0x15b   :  { %2273 = vst [vmem:[#allocation1 + $0x4] ss:$9 sm:$0xff] %v1752_v49  ;;  %719 = vmin.index.xlane.f32.xlu1 %v636_v61  ;;  %v581_v61 = vmul.f32 2.0, %v4077_v12 }
 0x15c   :  { %2274 = vst [vmem:[#allocation1 + $0x5] ss:$9 sm:$0xff] %v1753_v51 }
 0x15d   :  { %2275 = vst [vmem:[#allocation1 + $0x6] ss:$9 sm:$0xff] %v1754_v52  ;;  %v4180_v52 = vpop.f32.mrf.mxu2 }
 0x15e   :  { %2276 = vst [vmem:[#allocation1 + $0x7] ss:$9 sm:$0xff] %v1755_v55  ;;  %v4132_v7 = vpop.xlane.xlu2 %691  ;;  %v418_v10 = vpop.f32.mrf.mxu0 }
 0x15f   :  { %v570_v15 = vmul.f32 2.0, %v418_v10  ;;  %vm816_vm6 = vcmp.eq.s32.totalorder %v4132_v7, %v4063_v57  ;;  %v1772_v39 = vperm.slane %v4132_v7, 0  ;;  %v1773_v40 = vperm.slane %v4132_v7, 1 }
 0x160   :  { %v3309_v16 = vsel %vm816_vm6, 1.0, %v3560_v13  ;;  %3373 = vmatmul.msk.f32.gmra.mxu1 %vm816_vm6, %v3559_v3  ;;  %v1774_v41 = vperm.slane %v4132_v7, 2  ;;  %v1775_v43 = vperm.slane %v4132_v7, 3  ;;  %v1776_v44 = vperm.slane %v4132_v7, 4 }
 0x161   :  { %v1603_v17 = vadd.f32 %v3309_v16, %v1602_v60  ;;  %v637_v18 = vsub.f32 %v3937_v45, %v570_v15  ;;  %v1777_v49 = vperm.slane %v4132_v7, 5  ;;  %v1778_v50 = vperm.slane %v4132_v7, 6 }
 0x162   :  { %v1779_v53 = vperm.slane %v4132_v7, 7 }
 0x163   :  { %721 = vmin.index.xlane.f32.xlu2 %v637_v18 }
 0x165   :  { %v4128_v4 = vld [vmem:[#allocation1] sm:$0xff] }
 0x166   :  { %2278 = vst [vmem:[#allocation1] ss:$9 sm:$0xff] %v1756_v0  ;;  %v4157_v28 = vpop.xlane.xlu0 %693  ;;  %v421_v31 = vpop.f32.mrf.mxu0 }
 0x167   :  { %2279 = vst [vmem:[#allocation1 + $0x1] ss:$9 sm:$0xff] %v1757_v1  ;;  %v571_v33 = vmul.f32 2.0, %v421_v31  ;;  %vm817_vm7 = vcmp.eq.s32.totalorder %v4157_v28, %v4063_v57  ;;  %v1780_v62 = vperm.slane %v4157_v28, 0  ;;  %v1781_v0 = vperm.slane %v4157_v28, 1  ;;  %v4191_v1 = vpop.f32.mrf.mxu2 }
 0x168   :  { %2280 = vst [vmem:[#allocation1 + $0x2] ss:$9 sm:$0xff] %v1758_v2  ;;  %v3310_v34 = vsel %vm817_vm7, 1.0, %v3560_v13  ;;  %3374 = vmatmul.msk.f32.gmra.mxu1 %vm817_vm7, %v3559_v3  ;;  %v1782_v2 = vperm.slane %v4157_v28, 2  ;;  %v1783_v7 = vperm.slane %v4157_v28, 3  ;;  %v1785_v12 = vperm.slane %v4157_v28, 5 }
 0x169   :  { %2281 = vst [vmem:[#allocation1 + $0x3] ss:$9 sm:$0xff] %v1759_v5  ;;  %v1604_v35 = vadd.f32 %v3310_v34, %v1603_v17  ;;  %v638_v36 = vsub.f32 %v3937_v45, %v571_v33  ;;  %v648_v5 = vsub.f32 %v3937_v45, %v581_v61  ;;  %v1786_v10 = vperm.slane %v4157_v28, 6 }
 0x16a   :  { %2282 = vst [vmem:[#allocation1 + $0x4] ss:$9 sm:$0xff] %v1760_v6  ;;  %v1787_v15 = vperm.slane %v4157_v28, 7 }
 0x16b   :  { %2283 = vst [vmem:[#allocation1 + $0x5] ss:$9 sm:$0xff] %v1761_v8  ;;  %723 = vmin.index.xlane.f32.xlu0 %v638_v36  ;;  %v1784_v8 = vperm.slane %v4157_v28, 4 }
 0x16c   :  { %2284 = vst [vmem:[#allocation1 + $0x6] ss:$9 sm:$0xff] %v1762_v9 }
 0x16d   :  { %2285 = vst [vmem:[#allocation1 + $0x7] ss:$9 sm:$0xff] %v1763_v14 }
 0x16e   :  { %v4176_v48 = vpop.xlane.xlu1 %695  ;;  %v424_v51 = vpop.f32.mrf.mxu0 }
 0x16f   :  { %v572_v55 = vmul.f32 2.0, %v424_v51  ;;  %vm818_vm8 = vcmp.eq.s32.totalorder %v4176_v48, %v4063_v57  ;;  %v1792_v31 = vperm.slane %v4176_v48, 4  ;;  %v1794_v33 = vperm.slane %v4176_v48, 6 }
 0x170   :  { %v3311_v58 = vsel %vm818_vm8, 1.0, %v3560_v13  ;;  %3375 = vmatmul.msk.f32.gmra.mxu1 %vm818_vm8, %v3559_v3  ;;  %v1795_v36 = vperm.slane %v4176_v48, 7 }
 0x171   :  { %v1605_v59 = vadd.f32 %v3311_v58, %v1604_v35  ;;  %v639_v60 = vsub.f32 %v3937_v45, %v572_v55 }
 0x173   :  { %725 = vmin.index.xlane.f32.xlu1 %v639_v60 }
 0x174   :  { %v4153_v25 = vld [vmem:[#allocation1] sm:$0xff] }
 0x175   :  { %2287 = vst [vmem:[#allocation1] ss:$9 sm:$0xff] %v1764_v20  ;;  %v4209_v20 = vpop.f32.mrf.mxu2 }
 0x176   :  { %2288 = vst [vmem:[#allocation1 + $0x1] ss:$9 sm:$0xff] %v1765_v21  ;;  %v4199_v9 = vpop.xlane.xlu2 %697  ;;  %v427_v14 = vpop.f32.mrf.mxu0  ;;  %v579_v21 = vmul.f32 2.0, %v4051_v47  ;;  %v1793_v47 = vperm.slane %v4176_v48, 5 }
 0x177   :  { %2289 = vst [vmem:[#allocation1 + $0x2] ss:$9 sm:$0xff] %v1766_v24  ;;  %v573_v16 = vmul.f32 2.0, %v427_v14  ;;  %vm819_vm9 = vcmp.eq.s32.totalorder %v4199_v9, %v4063_v57  ;;  %v1788_v24 = vperm.slane %v4176_v48, 0  ;;  %v1798_v51 = vperm.slane %v4199_v9, 2 }
 0x178   :  { %2290 = vst [vmem:[#allocation1 + $0x3] ss:$9 sm:$0xff] %v1767_v26  ;;  %v3312_v17 = vsel %vm819_vm9, 1.0, %v3560_v13  ;;  %3376 = vmatmul.msk.f32.gmra.mxu1 %vm819_vm9, %v3559_v3  ;;  %v1789_v26 = vperm.slane %v4176_v48, 1  ;;  %v646_v28 = vsub.f32 %v3937_v45, %v579_v21  ;;  %v1799_v58 = vperm.slane %v4199_v9, 3 }
 0x179   :  { %2291 = vst [vmem:[#allocation1 + $0x4] ss:$9 sm:$0xff] %v1768_v27  ;;  %v1606_v18 = vadd.f32 %v3312_v17, %v1605_v59  ;;  %v640_v19 = vsub.f32 %v3937_v45, %v573_v16  ;;  %v1790_v27 = vperm.slane %v4176_v48, 2  ;;  %v1800_v59 = vperm.slane %v4199_v9, 4 }
 0x17a   :  { %2292 = vst [vmem:[#allocation1 + $0x5] ss:$9 sm:$0xff] %v1769_v29  ;;  %v1802_v61 = vperm.slane %v4199_v9, 6 }
 0x17b   :  { %2293 = vst [vmem:[#allocation1 + $0x6] ss:$9 sm:$0xff] %v1770_v30  ;;  %743 = vmin.index.xlane.f32.xlu1 %v648_v5  ;;  %727 = vmin.index.xlane.f32.xlu2 %v640_v19  ;;  %v1791_v30 = vperm.slane %v4176_v48, 3  ;;  %v1796_v48 = vperm.slane %v4199_v9, 0 }
 0x17c   :  { %2294 = vst [vmem:[#allocation1 + $0x7] ss:$9 sm:$0xff] %v1771_v32 }
 0x17d   :  { %v4224_v35 = vpop.f32.mrf.mxu2 }
 0x17e   :  { %v4220_v32 = vpop.xlane.xlu0 %699  ;;  %v430_v34 = vpop.f32.mrf.mxu0 }
 0x17f   :  { %vm820_vm10 = vcmp.eq.s32.totalorder %v4220_v32, %v4063_v57  ;;  %v1805_v14 = vperm.slane %v4220_v32, 1  ;;  %v1808_v19 = vperm.slane %v4220_v32, 4 }
 0x180   :  { %3377 = vmatmul.msk.f32.gmra.mxu1 %vm820_vm10, %v3559_v3 }
 0x183   :  { %v4172_v42 = vld [vmem:[#allocation1] sm:$0xff]  ;;  %739 = vmin.index.xlane.f32.xlu2 %v646_v28  ;;  %v1811_v28 = vperm.slane %v4220_v32, 7 }
 0x184   :  { %2296 = vst [vmem:[#allocation1] ss:$9 sm:$0xff] %v1772_v39  ;;  %v574_v39 = vmul.f32 2.0, %v430_v34  ;;  %v582_v34 = vmul.f32 2.0, %v4101_v37 }
 0x185   :  { %2297 = vst [vmem:[#allocation1 + $0x1] ss:$9 sm:$0xff] %v1773_v40  ;;  %v3313_v40 = vsel %vm820_vm10, 1.0, %v3560_v13 }
 0x186   :  { %2298 = vst [vmem:[#allocation1 + $0x2] ss:$9 sm:$0xff] %v1774_v41  ;;  %v1607_v41 = vadd.f32 %v3313_v40, %v1606_v18  ;;  %v4243_v60 = vpop.xlane.xlu1 %701  ;;  %v1807_v18 = vperm.slane %v4220_v32, 3 }
 0x187   :  { %2299 = vst [vmem:[#allocation1 + $0x3] ss:$9 sm:$0xff] %v1775_v43  ;;  %v641_v43 = vsub.f32 %v3937_v45, %v574_v39  ;;  %vm821_vm11 = vcmp.eq.s32.totalorder %v4243_v60, %v4063_v57  ;;  %v1814_v40 = vperm.slane %v4243_v60, 2  ;;  %v1817_v37 = vperm.slane %v4243_v60, 5 }
 0x188   :  { %2300 = vst [vmem:[#allocation1 + $0x4] ss:$9 sm:$0xff] %v1776_v44  ;;  %v580_v44 = vmul.f32 2.0, %v4058_v54  ;;  %v1801_v54 = vperm.slane %v4199_v9, 5  ;;  %v3314_v5 = vsel %vm821_vm11, 1.0, %v3560_v13  ;;  %3378 = vmatmul.msk.f32.gmra.mxu1 %vm821_vm11, %v3559_v3 }
 0x189   :  { %2301 = vst [vmem:[#allocation1 + $0x5] ss:$9 sm:$0xff] %v1777_v49  ;;  %729 = vmin.index.xlane.f32.xlu0 %v641_v43  ;;  %v1797_v49 = vperm.slane %v4199_v9, 1 }
 0x18a   :  { %2302 = vst [vmem:[#allocation1 + $0x6] ss:$9 sm:$0xff] %v1778_v50  ;;  %v4235_v50 = vpop.f32.mrf.mxu2 }
 0x18b   :  { %2303 = vst [vmem:[#allocation1 + $0x7] ss:$9 sm:$0xff] %v1779_v53  ;;  %v647_v53 = vsub.f32 %v3937_v45, %v580_v44  ;;  %v1815_v44 = vperm.slane %v4243_v60, 3 }
 0x18e   :  { %v4264_v21 = vpop.xlane.xlu2 %703 }
 0x18f   :  { %vm822_vm12 = vcmp.eq.s32.totalorder %v4264_v21, %v4063_v57 }
 0x190   :  { %3379 = vmatmul.msk.f32.gmra.mxu1 %vm822_vm12, %v3559_v3 }
 0x191   :  { %741 = vmin.index.xlane.f32.xlu0 %v647_v53  ;;  %v1818_v53 = vperm.slane %v4243_v60, 6 }
 0x192   :  { %v4195_v6 = vld [vmem:[#allocation1] sm:$0xff] }
 0x193   :  { %2305 = vst [vmem:[#allocation1] ss:$9 sm:$0xff] %v1780_v62  ;;  %v433_v62 = vpop.f32.mrf.mxu0 }
 0x194   :  { %2306 = vst [vmem:[#allocation1 + $0x1] ss:$9 sm:$0xff] %v1781_v0  ;;  %v1803_v0 = vperm.slane %v4199_v9, 7  ;;  %v584_v9 = vmul.f32 2.0, %v4136_v11  ;;  %v1809_v11 = vperm.slane %v4220_v32, 5 }
 0x195   :  { %2307 = vst [vmem:[#allocation1 + $0x2] ss:$9 sm:$0xff] %v1782_v2  ;;  %v575_v2 = vmul.f32 2.0, %v433_v62 }
 0x196   :  { %2308 = vst [vmem:[#allocation1 + $0x3] ss:$9 sm:$0xff] %v1783_v7  ;;  %v1608_v7 = vadd.f32 %v3314_v5, %v1607_v41  ;;  %v651_v16 = vsub.f32 %v3937_v45, %v584_v9  ;;  %v649_v41 = vsub.f32 %v3937_v45, %v582_v34  ;;  %v1820_v5 = vperm.slane %v4264_v21, 0 }
 0x197   :  { %2309 = vst [vmem:[#allocation1 + $0x4] ss:$9 sm:$0xff] %v1784_v8  ;;  %v642_v8 = vsub.f32 %v3937_v45, %v575_v2  ;;  %v583_v2 = vmul.f32 2.0, %v4123_v63  ;;  %v1825_v63 = vperm.slane %v4264_v21, 5 }
 0x198   :  { %2310 = vst [vmem:[#allocation1 + $0x5] ss:$9 sm:$0xff] %v1785_v12  ;;  %v4253_v12 = vpop.f32.mrf.mxu2 }
 0x199   :  { %2311 = vst [vmem:[#allocation1 + $0x6] ss:$9 sm:$0xff] %v1786_v10  ;;  %731 = vmin.index.xlane.f32.xlu1 %v642_v8  ;;  %v1804_v10 = vperm.slane %v4220_v32, 0  ;;  %v1822_v8 = vperm.slane %v4264_v21, 2  ;;  %v650_v9 = vsub.f32 %v3937_v45, %v583_v2 }
 0x19a   :  { %2312 = vst [vmem:[#allocation1 + $0x7] ss:$9 sm:$0xff] %v1787_v15  ;;  %v1806_v15 = vperm.slane %v4220_v32, 2 }
 0x1a1   :  { %v4216_v29 = vld [vmem:[#allocation1] sm:$0xff]  ;;  %749 = vmin.index.xlane.f32.xlu1 %v651_v16  ;;  %v1824_v16 = vperm.slane %v4264_v21, 4 }
 0x1a2   :  { %2314 = vst [vmem:[#allocation1] ss:$9 sm:$0xff] %v1788_v24  ;;  %v1810_v24 = vperm.slane %v4220_v32, 6  ;;  %v1812_v32 = vperm.slane %v4243_v60, 0 }
 0x1a3   :  { %2315 = vst [vmem:[#allocation1 + $0x1] ss:$9 sm:$0xff] %v1789_v26  ;;  %v436_v26 = vpop.f32.mrf.mxu0 }
 0x1a4   :  { %2316 = vst [vmem:[#allocation1 + $0x2] ss:$9 sm:$0xff] %v1790_v27  ;;  %v4268_v27 = vpop.f32.mrf.mxu2 }
 0x1a5   :  { %2317 = vst [vmem:[#allocation1 + $0x3] ss:$9 sm:$0xff] %v1791_v30  ;;  %v576_v30 = vmul.f32 2.0, %v436_v26  ;;  %v1827_v26 = vperm.slane %v4264_v21, 7 }
 0x1a6   :  { %2318 = vst [vmem:[#allocation1 + $0x4] ss:$9 sm:$0xff] %v1792_v31  ;;  %v3315_v31 = vsel %vm822_vm12, 1.0, %v3560_v13 }
 0x1a7   :  { %2319 = vst [vmem:[#allocation1 + $0x5] ss:$9 sm:$0xff] %v1793_v47  ;;  %v1609_v47 = vadd.f32 %v3315_v31, %v1608_v7  ;;  %v1821_v7 = vperm.slane %v4264_v21, 1 }
 0x1a8   :  { %2320 = vst [vmem:[#allocation1 + $0x6] ss:$9 sm:$0xff] %v1794_v33  ;;  %v643_v33 = vsub.f32 %v3937_v45, %v576_v30 }
 0x1a9   :  { %2321 = vst [vmem:[#allocation1 + $0x7] ss:$9 sm:$0xff] %v1795_v36  ;;  %v1813_v36 = vperm.slane %v4243_v60, 1 }
 0x1aa   :  { %733 = vmin.index.xlane.f32.xlu2 %v643_v33  ;;  %v587_v33 = vmul.f32 2.0, %v4180_v52  ;;  %v4338_v52 = vpop.xlane.xlu2 %709 }
 0x1ab   :  { %vm825_vm15 = vcmp.eq.s32.totalorder %v4338_v52, %v4063_v57 }
 0x1ac   :  { %v4279_v39 = vpop.f32.mrf.mxu2 }
 0x1b0   :  { %v4239_v55 = vld [vmem:[#allocation1] sm:$0xff] }
 0x1b1   :  { %2323 = vst [vmem:[#allocation1] ss:$9 sm:$0xff] %v1796_v48  ;;  %v1816_v48 = vperm.slane %v4243_v60, 4 }
 0x1b2   :  { %2324 = vst [vmem:[#allocation1 + $0x1] ss:$9 sm:$0xff] %v1797_v49  ;;  %v4287_v49 = vpop.xlane.xlu0 %705  ;;  %745 = vmin.index.xlane.f32.xlu2 %v649_v41  ;;  %v654_v41 = vsub.f32 %v3937_v45, %v587_v33  ;;  %v592_v33 = vmul.f32 2.0, %v4253_v12 }
 0x1b3   :  { %2325 = vst [vmem:[#allocation1 + $0x2] ss:$9 sm:$0xff] %v1798_v51  ;;  %v585_v51 = vmul.f32 2.0, %v4150_v22  ;;  %vm823_vm13 = vcmp.eq.s32.totalorder %v4287_v49, %v4063_v57  ;;  %v1828_v34 = vperm.slane %v4287_v49, 0 }
 0x1b4   :  { %2326 = vst [vmem:[#allocation1 + $0x3] ss:$9 sm:$0xff] %v1799_v58  ;;  %v439_v58 = vpop.f32.mrf.mxu0  ;;  %3380 = vmatmul.msk.f32.gmra.mxu1 %vm823_vm13, %v3559_v3 }
 0x1b5   :  { %2327 = vst [vmem:[#allocation1 + $0x4] ss:$9 sm:$0xff] %v1800_v59  ;;  %v1819_v59 = vperm.slane %v4243_v60, 7  ;;  %v4299_v60 = vpop.f32.mrf.mxu2 }
 0x1b6   :  { %2328 = vst [vmem:[#allocation1 + $0x5] ss:$9 sm:$0xff] %v1801_v54  ;;  %v577_v54 = vmul.f32 2.0, %v439_v58  ;;  %v1834_v58 = vperm.slane %v4287_v49, 6 }
 0x1b7   :  { %2329 = vst [vmem:[#allocation1 + $0x6] ss:$9 sm:$0xff] %v1802_v61  ;;  %v3316_v61 = vsel %vm823_vm13, 1.0, %v3560_v13 }
 0x1b8   :  { %2330 = vst [vmem:[#allocation1 + $0x7] ss:$9 sm:$0xff] %v1803_v0  ;;  %v1610_v62 = vadd.f32 %v3316_v61, %v1609_v47  ;;  %v644_v22 = vsub.f32 %v3937_v45, %v577_v54  ;;  %v652_v0 = vsub.f32 %v3937_v45, %v585_v51  ;;  %v1832_v51 = vperm.slane %v4287_v49, 4 }
 0x1b9   :  { %v3318_v54 = vsel %vm825_vm15, 1.0, %v3560_v13 }
 0x1ba   :  { %735 = vmin.index.xlane.f32.xlu0 %v644_v22  ;;  %751 = vmin.index.xlane.f32.xlu2 %v652_v0  ;;  %v590_v22 = vmul.f32 2.0, %v4224_v35 }
 0x1bf   :  { %v4260_v17 = vld [vmem:[#allocation1] sm:$0xff] }
 0x1c0   :  { %2332 = vst [vmem:[#allocation1] ss:$9 sm:$0xff] %v1804_v10  ;;  %v588_v10 = vmul.f32 2.0, %v4191_v1  ;;  %v4316_v1 = vpop.f32.mrf.mxu2 }
 0x1c1   :  { %2333 = vst [vmem:[#allocation1 + $0x1] ss:$9 sm:$0xff] %v1805_v14 }
 0x1c2   :  { %2334 = vst [vmem:[#allocation1 + $0x2] ss:$9 sm:$0xff] %v1806_v15  ;;  %v1823_v15 = vperm.slane %v4264_v21, 3  ;;  %747 = vmin.index.xlane.f32.xlu0 %v650_v9  ;;  %v655_v30 = vsub.f32 %v3937_v45, %v588_v10  ;;  %v591_v10 = vmul.f32 2.0, %v4235_v50 }
 0x1c3   :  { %2335 = vst [vmem:[#allocation1 + $0x3] ss:$9 sm:$0xff] %v1807_v18  ;;  %v4311_v18 = vpop.xlane.xlu1 %707 }
 0x1c4   :  { %2336 = vst [vmem:[#allocation1 + $0x4] ss:$9 sm:$0xff] %v1808_v19  ;;  %v586_v19 = vmul.f32 2.0, %v4167_v38  ;;  %vm824_vm14 = vcmp.eq.s32.totalorder %v4311_v18, %v4063_v57  ;;  %757 = vmin.index.xlane.f32.xlu2 %v655_v30  ;;  %v1836_v0 = vperm.slane %v4311_v18, 0  ;;  %v1837_v2 = vperm.slane %v4311_v18, 1 }
 0x1c5   :  { %2337 = vst [vmem:[#allocation1 + $0x5] ss:$9 sm:$0xff] %v1809_v11  ;;  %v1826_v11 = vperm.slane %v4264_v21, 6  ;;  %v3317_v31 = vsel %vm824_vm14, 1.0, %v3560_v13  ;;  %3381 = vmatmul.msk.f32.gmra.mxu1 %vm824_vm14, %v3559_v3  ;;  %v1839_v9 = vperm.slane %v4311_v18, 3  ;;  %v1841_v35 = vperm.slane %v4311_v18, 5 }
 0x1c6   :  { %2338 = vst [vmem:[#allocation1 + $0x6] ss:$9 sm:$0xff] %v1810_v24  ;;  %v442_v24 = vpop.f32.mrf.mxu0  ;;  %v1611_v38 = vadd.f32 %v3317_v31, %v1610_v62  ;;  %v653_v21 = vsub.f32 %v3937_v45, %v586_v19  ;;  %v1845_v30 = vperm.slane %v4338_v52, 1 }
 0x1c7   :  { %2339 = vst [vmem:[#allocation1 + $0x7] ss:$9 sm:$0xff] %v1811_v28  ;;  %v578_v28 = vmul.f32 2.0, %v442_v24 }
 0x1c8   :  { %v1612_v61 = vadd.f32 %v3318_v54, %v1611_v38  ;;  %v1846_v38 = vperm.slane %v4338_v52, 2 }
 0x1c9   :  { %v645_v47 = vsub.f32 %v3937_v45, %v578_v28  ;;  %v1835_v45 = vperm.slane %v4287_v49, 7 }
 0x1ca   :  { %753 = vmin.index.xlane.f32.xlu0 %v653_v21  ;;  %v1847_v21 = vperm.slane %v4338_v52, 3 }
 0x1cb   :  { %737 = vmin.index.xlane.f32.xlu1 %v645_v47 }
 0x1cd   :  { %3382 = vmatmul.msk.f32.gmra.mxu1 %vm825_vm15, %v3559_v3 }
 0x1ce   :  { %v4283_v43 = vld [vmem:[#allocation1] sm:$0xff]  ;;  %v1020_v28 = vpop.f32.mrf.mxu0 }
 0x1cf   :  { %2341 = vst [vmem:[#allocation1] ss:$9 sm:$0xff] %v1812_v32  ;;  %v1829_v32 = vperm.slane %v4287_v49, 1 }
 0x1d0   :  { %2342 = vst [vmem:[#allocation1 + $0x1] ss:$9 sm:$0xff] %v1813_v36  ;;  %v4329_v36 = vpop.f32.mrf.mxu2 }
 0x1d1   :  { %2343 = vst [vmem:[#allocation1 + $0x2] ss:$9 sm:$0xff] %v1814_v40  ;;  %v1830_v40 = vperm.slane %v4287_v49, 2 }
 0x1d2   :  { %2344 = vst [vmem:[#allocation1 + $0x3] ss:$9 sm:$0xff] %v1815_v44  ;;  %v589_v44 = vmul.f32 2.0, %v4209_v20  ;;  %v4348_v20 = vld [vmem:[%s5851_s1] ss:$0 sm:$0xff] }
 0x1d3   :  { %2345 = vst [vmem:[#allocation1 + $0x4] ss:$9 sm:$0xff] %v1816_v48  ;;  %755 = vmin.index.xlane.f32.xlu1 %v654_v41  ;;  %v658_v24 = vsub.f32 %v4348_v20, %v591_v10  ;;  %v594_v41 = vmul.f32 2.0, %v4279_v39  ;;  %v597_v10 = vmul.f32 2.0, %v4329_v36 }
 0x1d4   :  { %2346 = vst [vmem:[#allocation1 + $0x5] ss:$9 sm:$0xff] %v1817_v37  ;;  %v1831_v37 = vperm.slane %v4287_v49, 3 }
 0x1d5   :  { %2347 = vst [vmem:[#allocation1 + $0x6] ss:$9 sm:$0xff] %v1818_v53  ;;  %v1833_v53 = vperm.slane %v4287_v49, 5  ;;  %v76_v49 = vld [vmem:[%s5850_s0 + $0x1c8] sm:$0xff]  ;;  %763 = vmin.index.xlane.f32.xlu2 %v658_v24  ;;  %v664_v36 = vsub.f32 %v4348_v20, %v597_v10 }
 0x1d6   :  { %2348 = vst [vmem:[#allocation1 + $0x7] ss:$9 sm:$0xff] %v1819_v59  ;;  %v656_v59 = vsub.f32 %v4348_v20, %v589_v44  ;;  %3297 = vmatmul.msk.f32.gmra.mxu2 %vm100_vm0, %v76_v49  ;;  %v1849_v44 = vperm.slane %v4338_v52, 5 }
 0x1d7   :  { %1668 = vst.msk [vmem:[%s5853_s3] sm:$0xff] %vm100_vm0, %v1020_v28 }
 0x1d8   :  { %759 = vmin.index.xlane.f32.xlu0 %v656_v59  ;;  %v4357_v62 = vpop.f32.mrf.mxu2  ;;  %v1023_v59 = vpop.f32.mrf.mxu0 }
 0x1d9   :  { %1669 = vst.msk [vmem:[%s5853_s3 + $0x8] sm:$0xff] %vm100_vm0, %v1023_v59 }
 0x1dd   :  { %v4307_v14 = vld [vmem:[#allocation1] sm:$0xff] }
 0x1de   :  { %2350 = vst [vmem:[#allocation1] ss:$9 sm:$0xff] %v1820_v5  ;;  %v1838_v5 = vperm.slane %v4311_v18, 2 }
 0x1df   :  { %2351 = vst [vmem:[#allocation1 + $0x1] ss:$9 sm:$0xff] %v1821_v7  ;;  %v657_v7 = vsub.f32 %v4348_v20, %v590_v22 }
 0x1e0   :  { %2352 = vst [vmem:[#allocation1 + $0x2] ss:$9 sm:$0xff] %v1822_v8  ;;  %v4373_v19 = vpop.f32.mrf.mxu2 }
 0x1e1   :  { %2353 = vst [vmem:[#allocation1 + $0x3] ss:$9 sm:$0xff] %v1823_v15  ;;  %v1840_v15 = vperm.slane %v4311_v18, 4  ;;  %761 = vmin.index.xlane.f32.xlu1 %v657_v7  ;;  %v595_v7 = vmul.f32 2.0, %v4299_v60 }
 0x1e2   :  { %2354 = vst [vmem:[#allocation1 + $0x4] ss:$9 sm:$0xff] %v1824_v16  ;;  %v4369_v16 = vpop.xlane.xlu0 %711 }
 0x1e3   :  { %2355 = vst [vmem:[#allocation1 + $0x5] ss:$9 sm:$0xff] %v1825_v63  ;;  %v1842_v63 = vperm.slane %v4311_v18, 6  ;;  %vm826_vm1 = vcmp.eq.s32.totalorder %v4369_v16, %v4063_v57  ;;  %v1852_v54 = vperm.slane %v4369_v16, 0  ;;  %v1853_v49 = vperm.slane %v4369_v16, 1 }
 0x1e4   :  { %2356 = vst [vmem:[#allocation1 + $0x6] ss:$9 sm:$0xff] %v1826_v11  ;;  %v1843_v11 = vperm.slane %v4311_v18, 7  ;;  %v3319_v50 = vsel %vm826_vm1, 1.0, %v3560_v13  ;;  %3383 = vmatmul.msk.f32.gmra.mxu1 %vm826_vm1, %v3559_v3  ;;  %v1844_v18 = vperm.slane %v4338_v52, 0 }
 0x1e5   :  { %2357 = vst [vmem:[#allocation1 + $0x7] ss:$9 sm:$0xff] %v1827_v26  ;;  %v1613_v26 = vadd.f32 %v3319_v50, %v1612_v61  ;;  %v1854_v61 = vperm.slane %v4369_v16, 2  ;;  %v662_v50 = vsub.f32 %v4348_v20, %v595_v7 }
 0x1e8   :  { %v4387_v31 = vpop.f32.mrf.mxu2 }
 0x1ec   :  { %v4334_v48 = vld [vmem:[#allocation1] sm:$0xff] }
 0x1ed   :  { %2359 = vst [vmem:[#allocation1] ss:$9 sm:$0xff] %v1828_v34  ;;  %v1848_v34 = vperm.slane %v4338_v52, 4 }
 0x1ee   :  { %2360 = vst [vmem:[#allocation1 + $0x1] ss:$9 sm:$0xff] %v1829_v32  ;;  %v4395_v32 = vpop.xlane.xlu1 %713 }
 0x1ef   :  { %2361 = vst [vmem:[#allocation1 + $0x2] ss:$9 sm:$0xff] %v1830_v40  ;;  %v593_v40 = vmul.f32 2.0, %v4268_v27  ;;  %vm827_vm2 = vcmp.eq.s32.totalorder %v4395_v32, %v4063_v57  ;;  %v659_v27 = vsub.f32 %v4348_v20, %v592_v33  ;;  %v1860_v28 = vperm.slane %v4395_v32, 0 }
 0x1f0   :  { %2362 = vst [vmem:[#allocation1 + $0x3] ss:$9 sm:$0xff] %v1831_v37  ;;  %v1850_v37 = vperm.slane %v4338_v52, 6  ;;  %v3320_v12 = vsel %vm827_vm2, 1.0, %v3560_v13  ;;  %3384 = vmatmul.msk.f32.gmra.mxu1 %vm827_vm2, %v3559_v3  ;;  %v1863_v33 = vperm.slane %v4395_v32, 3 }
 0x1f1   :  { %2363 = vst [vmem:[#allocation1 + $0x4] ss:$9 sm:$0xff] %v1832_v51  ;;  %v1851_v51 = vperm.slane %v4338_v52, 7  ;;  %v1614_v39 = vadd.f32 %v3320_v12, %v1613_v26  ;;  %765 = vmin.index.xlane.f32.xlu0 %v659_v27  ;;  %v77_v52 = vld [vmem:[%s5850_s0 + $0x1d0] sm:$0xff]  ;;  %v1026_v26 = vpop.f32.mrf.mxu1  ;;  %v1866_v12 = vperm.slane %v4395_v32, 6  ;;  %v1867_v27 = vperm.slane %v4395_v32, 7 }
 0x1f2   :  { %2364 = vst [vmem:[#allocation1 + $0x5] ss:$9 sm:$0xff] %v1833_v53  ;;  %v661_v53 = vsub.f32 %v4348_v20, %v594_v41  ;;  %3298 = vmatmul.msk.f32.gmra.mxu2 %vm100_vm0, %v77_v52  ;;  %v598_v41 = vmul.f32 2.0, %v4357_v62 }
 0x1f3   :  { %2365 = vst [vmem:[#allocation1 + $0x6] ss:$9 sm:$0xff] %v1834_v58  ;;  %v660_v58 = vsub.f32 %v4348_v20, %v593_v40  ;;  %v4456_v40 = vpop.xlane.xlu0 %717 }
 0x1f4   :  { %2366 = vst [vmem:[#allocation1 + $0x7] ss:$9 sm:$0xff] %v1835_v45  ;;  %769 = vmin.index.xlane.f32.xlu2 %v661_v53  ;;  %v4412_v45 = vpop.f32.mrf.mxu2  ;;  %vm829_vm4 = vcmp.eq.s32.totalorder %v4456_v40, %v4063_v57 }
 0x1f5   :  { %767 = vmin.index.xlane.f32.xlu1 %v660_v58  ;;  %1670 = vst.msk [vmem:[%s5853_s3 + $0x10] sm:$0xff] %vm100_vm0, %v1026_v26  ;;  %v601_v7 = vmul.f32 2.0, %v4412_v45  ;;  %v1877_v26 = vperm.slane %v4456_v40, 1 }
 0x1f9   :  { %771 = vmin.index.xlane.f32.xlu0 %v662_v50  ;;  %v1029_v58 = vpop.f32.mrf.mxu1 }
 0x1fa   :  { %1671 = vst.msk [vmem:[%s5853_s3 + $0x18] sm:$0xff] %vm100_vm0, %v1029_v58 }
 0x1fb   :  { %v4364_v8 = vld [vmem:[#allocation1] sm:$0xff] }
 0x1fc   :  { %2368 = vst [vmem:[#allocation1] ss:$9 sm:$0xff] %v1836_v0  ;;  %v1855_v0 = vperm.slane %v4369_v16, 3  ;;  %775 = vmin.index.xlane.f32.xlu2 %v664_v36  ;;  %v668_v36 = vsub.f32 %v4348_v20, %v601_v7 }
 0x1fd   :  { %2369 = vst [vmem:[#allocation1 + $0x1] ss:$9 sm:$0xff] %v1837_v2  ;;  %v1856_v2 = vperm.slane %v4369_v16, 4 }
 0x1fe   :  { %2370 = vst [vmem:[#allocation1 + $0x2] ss:$9 sm:$0xff] %v1838_v5  ;;  %v4426_v5 = vpop.xlane.xlu2 %715 }
 0x1ff   :  { %2371 = vst [vmem:[#allocation1 + $0x3] ss:$9 sm:$0xff] %v1839_v9  ;;  %v596_v9 = vmul.f32 2.0, %v4316_v1  ;;  %vm828_vm3 = vcmp.eq.s32.totalorder %v4426_v5, %v4063_v57  ;;  %v1868_v52 = vperm.slane %v4426_v5, 0  ;;  %v1869_v59 = vperm.slane %v4426_v5, 1 }
 0x200   :  { %2372 = vst [vmem:[#allocation1 + $0x4] ss:$9 sm:$0xff] %v1840_v15  ;;  %v1857_v15 = vperm.slane %v4369_v16, 5  ;;  %v3321_v60 = vsel %vm828_vm3, 1.0, %v3560_v13  ;;  %3385 = vmatmul.msk.f32.gmra.mxu1 %vm828_vm3, %v3559_v3 }
 0x201   :  { %2373 = vst [vmem:[#allocation1 + $0x5] ss:$9 sm:$0xff] %v1841_v35  ;;  %v1858_v35 = vperm.slane %v4369_v16, 6  ;;  %v1615_v1 = vadd.f32 %v3321_v60, %v1614_v39  ;;  %v663_v24 = vsub.f32 %v4348_v20, %v596_v9  ;;  %v3322_v39 = vsel %vm829_vm4, 1.0, %v3560_v13 }
 0x202   :  { %2374 = vst [vmem:[#allocation1 + $0x6] ss:$9 sm:$0xff] %v1842_v63  ;;  %v1859_v63 = vperm.slane %v4369_v16, 7  ;;  %v78_v16 = vld [vmem:[%s5850_s0 + $0x1d8] sm:$0xff] }
 0x203   :  { %2375 = vst [vmem:[#allocation1 + $0x7] ss:$9 sm:$0xff] %v1843_v11  ;;  %v514_v11 = vpop.f32.mrf.mxu2  ;;  %773 = vmin.index.xlane.f32.xlu1 %v663_v24  ;;  %3299 = vmatmul.msk.f32.gmra.mxu2 %vm100_vm0, %v78_v16  ;;  %v1616_v62 = vadd.f32 %v3322_v39, %v1615_v1  ;;  %v1032_v24 = vpop.f32.mrf.mxu1  ;;  %v1876_v16 = vperm.slane %v4456_v40, 0 }
 0x204   :  { %v602_v9 = vmul.f32 2.0, %v514_v11  ;;  %1672 = vst.msk [vmem:[%s5853_s3 + $0x20] sm:$0xff] %vm100_vm0, %v1032_v24 }
 0x206   :  { %v669_v50 = vsub.f32 %v4348_v20, %v602_v9  ;;  %v4529_v9 = vpop.xlane.xlu0 %723 }
 0x207   :  { %vm832_vm7 = vcmp.eq.s32.totalorder %v4529_v9, %v4063_v57 }
 0x208   :  { %3386 = vmatmul.msk.f32.gmra.mxu1 %vm829_vm4, %v3559_v3 }
 0x20a   :  { %v4390_v47 = vld [vmem:[#allocation1] sm:$0xff] }
 0x20b   :  { %2377 = vst [vmem:[#allocation1] ss:$9 sm:$0xff] %v1844_v18  ;;  %v1861_v18 = vperm.slane %v4395_v32, 1 }
 0x20c   :  { %2378 = vst [vmem:[#allocation1 + $0x1] ss:$9 sm:$0xff] %v1845_v30  ;;  %v1862_v30 = vperm.slane %v4395_v32, 2 }
 0x20d   :  { %2379 = vst [vmem:[#allocation1 + $0x2] ss:$9 sm:$0xff] %v1846_v38  ;;  %v517_v38 = vpop.f32.mrf.mxu2 }
 0x20e   :  { %2380 = vst [vmem:[#allocation1 + $0x3] ss:$9 sm:$0xff] %v1847_v21  ;;  %v603_v10 = vmul.f32 2.0, %v517_v38  ;;  %v1879_v38 = vperm.slane %v4456_v40, 3 }
 0x20f   :  { %2381 = vst [vmem:[#allocation1 + $0x4] ss:$9 sm:$0xff] %v1848_v34  ;;  %v1864_v34 = vperm.slane %v4395_v32, 4 }
 0x210   :  { %2382 = vst [vmem:[#allocation1 + $0x5] ss:$9 sm:$0xff] %v1849_v44  ;;  %v599_v44 = vmul.f32 2.0, %v4373_v19  ;;  %v670_v11 = vsub.f32 %v4348_v20, %v603_v10 }
 0x211   :  { %2383 = vst [vmem:[#allocation1 + $0x6] ss:$9 sm:$0xff] %v1850_v37  ;;  %v600_v37 = vmul.f32 2.0, %v4387_v31  ;;  %v665_v31 = vsub.f32 %v4348_v20, %v598_v41 }
 0x212   :  { %2384 = vst [vmem:[#allocation1 + $0x7] ss:$9 sm:$0xff] %v1851_v51  ;;  %v1865_v51 = vperm.slane %v4395_v32, 5  ;;  %v666_v53 = vsub.f32 %v4348_v20, %v599_v44  ;;  %v1881_v44 = vperm.slane %v4456_v40, 5 }
 0x213   :  { %v667_v19 = vsub.f32 %v4348_v20, %v600_v37  ;;  %777 = vmin.index.xlane.f32.xlu0 %v665_v31 }
 0x214   :  { %779 = vmin.index.xlane.f32.xlu1 %v666_v53 }
 0x215   :  { %781 = vmin.index.xlane.f32.xlu2 %v667_v19  ;;  %v520_v32 = vpop.f32.mrf.mxu2 }
 0x216   :  { %v604_v41 = vmul.f32 2.0, %v520_v32 }
 0x218   :  { %v671_v53 = vsub.f32 %v4348_v20, %v604_v41 }
 0x219   :  { %v4422_v22 = vld [vmem:[#allocation1] sm:$0xff] }
 0x21a   :  { %2386 = vst [vmem:[#allocation1] ss:$9 sm:$0xff] %v1852_v54  ;;  %v1870_v54 = vperm.slane %v4426_v5, 2 }
 0x21b   :  { %2387 = vst [vmem:[#allocation1 + $0x1] ss:$9 sm:$0xff] %v1853_v49  ;;  %783 = vmin.index.xlane.f32.xlu0 %v668_v36 }
 0x21c   :  { %2388 = vst [vmem:[#allocation1 + $0x2] ss:$9 sm:$0xff] %v1854_v61  ;;  %v1871_v61 = vperm.slane %v4426_v5, 3  ;;  %785 = vmin.index.xlane.f32.xlu1 %v669_v50 }
 0x21d   :  { %2389 = vst [vmem:[#allocation1 + $0x3] ss:$9 sm:$0xff] %v1855_v0  ;;  %v1872_v0 = vperm.slane %v4426_v5, 4  ;;  %v523_v60 = vpop.f32.mrf.mxu2  ;;  %787 = vmin.index.xlane.f32.xlu2 %v670_v11 }
 0x21e   :  { %2390 = vst [vmem:[#allocation1 + $0x4] ss:$9 sm:$0xff] %v1856_v2  ;;  %v4482_v2 = vpop.xlane.xlu1 %719  ;;  %v605_v37 = vmul.f32 2.0, %v523_v60 }
 0x21f   :  { %2391 = vst [vmem:[#allocation1 + $0x5] ss:$9 sm:$0xff] %v1857_v15  ;;  %v1873_v15 = vperm.slane %v4426_v5, 5  ;;  %vm830_vm5 = vcmp.eq.s32.totalorder %v4482_v2, %v4063_v57  ;;  %v1884_v58 = vperm.slane %v4482_v2, 0  ;;  %v1888_v7 = vperm.slane %v4482_v2, 4 }
 0x220   :  { %2392 = vst [vmem:[#allocation1 + $0x6] ss:$9 sm:$0xff] %v1858_v35  ;;  %v1874_v35 = vperm.slane %v4426_v5, 6  ;;  %v3323_v1 = vsel %vm830_vm5, 1.0, %v3560_v13  ;;  %3387 = vmatmul.msk.f32.gmra.mxu1 %vm830_vm5, %v3559_v3  ;;  %v672_v32 = vsub.f32 %v4348_v20, %v605_v37  ;;  %v1890_v60 = vperm.slane %v4482_v2, 6 }
 0x221   :  { %2393 = vst [vmem:[#allocation1 + $0x7] ss:$9 sm:$0xff] %v1859_v63  ;;  %v1875_v63 = vperm.slane %v4426_v5, 7  ;;  %v1617_v45 = vadd.f32 %v3323_v1, %v1616_v62  ;;  %v538_v5 = vpop.f32.mrf.mxu3  ;;  %v1891_v1 = vperm.slane %v4482_v2, 7 }
 0x222   :  { %v610_v10 = vmul.f32 2.0, %v538_v5 }
 0x223   :  { %789 = vmin.index.xlane.f32.xlu0 %v671_v53  ;;  %v1902_v53 = vperm.slane %v4529_v9, 2 }
 0x224   :  { %791 = vmin.index.xlane.f32.xlu1 %v672_v32  ;;  %v677_v50 = vsub.f32 %v4348_v20, %v610_v10 }
 0x226   :  { %v4552_v41 = vpop.xlane.xlu1 %725 }
 0x227   :  { %vm833_vm8 = vcmp.eq.s32.totalorder %v4552_v41, %v4063_v57 }
 0x228   :  { %v4452_v21 = vld [vmem:[#allocation1] sm:$0xff] }
 0x229   :  { %2395 = vst [vmem:[#allocation1] ss:$9 sm:$0xff] %v1860_v28  ;;  %v1878_v28 = vperm.slane %v4456_v40, 2  ;;  %v541_v39 = vpop.f32.mrf.mxu3 }
 0x22a   :  { %2396 = vst [vmem:[#allocation1 + $0x1] ss:$9 sm:$0xff] %v1861_v18  ;;  %v526_v18 = vpop.f32.mrf.mxu2 }
 0x22b   :  { %2397 = vst [vmem:[#allocation1 + $0x2] ss:$9 sm:$0xff] %v1862_v30  ;;  %801 = vmin.index.xlane.f32.xlu0 %v677_v50  ;;  %v1915_v50 = vperm.slane %v4552_v41, 7 }
 0x22c   :  { %2398 = vst [vmem:[#allocation1 + $0x3] ss:$9 sm:$0xff] %v1863_v33  ;;  %v1880_v33 = vperm.slane %v4456_v40, 4 }
 0x22d   :  { %2399 = vst [vmem:[#allocation1 + $0x4] ss:$9 sm:$0xff] %v1864_v34  ;;  %v4506_v34 = vpop.xlane.xlu2 %721 }
 0x22e   :  { %2400 = vst [vmem:[#allocation1 + $0x5] ss:$9 sm:$0xff] %v1865_v51  ;;  %v606_v51 = vmul.f32 2.0, %v526_v18  ;;  %vm831_vm6 = vcmp.eq.s32.totalorder %v4506_v34, %v4063_v57  ;;  %v1892_v24 = vperm.slane %v4506_v34, 0 }
 0x22f   :  { %2401 = vst [vmem:[#allocation1 + $0x6] ss:$9 sm:$0xff] %v1866_v12  ;;  %v1882_v12 = vperm.slane %v4456_v40, 6  ;;  %v3324_v62 = vsel %vm831_vm6, 1.0, %v3560_v13  ;;  %3388 = vmatmul.msk.f32.gmra.mxu1 %vm831_vm6, %v3559_v3 }
 0x230   :  { %2402 = vst [vmem:[#allocation1 + $0x7] ss:$9 sm:$0xff] %v1867_v27  ;;  %v1883_v27 = vperm.slane %v4456_v40, 7  ;;  %v1618_v19 = vadd.f32 %v3324_v62, %v1617_v45  ;;  %v673_v31 = vsub.f32 %v4348_v20, %v606_v51  ;;  %v1035_v40 = vpop.f32.mrf.mxu1  ;;  %v3325_v45 = vsel %vm832_vm7, 1.0, %v3560_v13 }
 0x231   :  { %1673 = vst.msk [vmem:[%s5853_s3 + $0x28] sm:$0xff] %vm100_vm0, %v1035_v40  ;;  %v1898_v51 = vperm.slane %v4506_v34, 6  ;;  %v1903_v40 = vperm.slane %v4529_v9, 3 }
 0x232   :  { %793 = vmin.index.xlane.f32.xlu2 %v673_v31  ;;  %v1619_v11 = vadd.f32 %v3325_v45, %v1618_v19  ;;  %v1901_v31 = vperm.slane %v4529_v9, 1  ;;  %v4593_v45 = vpop.xlane.xlu0 %729 }
 0x233   :  { %vm835_vm10 = vcmp.eq.s32.totalorder %v4593_v45, %v4063_v57 }
 0x237   :  { %v4478_v49 = vld [vmem:[#allocation1] sm:$0xff]  ;;  %3389 = vmatmul.msk.f32.gmra.mxu1 %vm832_vm7, %v3559_v3 }
 0x238   :  { %2404 = vst [vmem:[#allocation1] ss:$9 sm:$0xff] %v1868_v52  ;;  %v1885_v52 = vperm.slane %v4482_v2, 1 }
 0x239   :  { %2405 = vst [vmem:[#allocation1 + $0x1] ss:$9 sm:$0xff] %v1869_v59  ;;  %v1886_v59 = vperm.slane %v4482_v2, 2 }
 0x23a   :  { %2406 = vst [vmem:[#allocation1 + $0x2] ss:$9 sm:$0xff] %v1870_v54  ;;  %v544_v54 = vpop.f32.mrf.mxu3 }
 0x23b   :  { %2407 = vst [vmem:[#allocation1 + $0x3] ss:$9 sm:$0xff] %v1871_v61 }
 0x23c   :  { %2408 = vst [vmem:[#allocation1 + $0x4] ss:$9 sm:$0xff] %v1872_v0  ;;  %v1887_v0 = vperm.slane %v4482_v2, 3 }
 0x23d   :  { %2409 = vst [vmem:[#allocation1 + $0x5] ss:$9 sm:$0xff] %v1873_v15  ;;  %v1889_v15 = vperm.slane %v4482_v2, 5  ;;  %v1038_v2 = vpop.f32.mrf.mxu1 }
 0x23e   :  { %2410 = vst [vmem:[#allocation1 + $0x6] ss:$9 sm:$0xff] %v1874_v35  ;;  %v611_v35 = vmul.f32 2.0, %v541_v39 }
 0x23f   :  { %2411 = vst [vmem:[#allocation1 + $0x7] ss:$9 sm:$0xff] %v1875_v63  ;;  %v612_v63 = vmul.f32 2.0, %v544_v54  ;;  %3390 = vmatmul.msk.f32.gmra.mxu1 %vm833_vm8, %v3559_v3  ;;  %v1907_v54 = vperm.slane %v4529_v9, 7 }
 0x240   :  { %v678_v5 = vsub.f32 %v4348_v20, %v611_v35  ;;  %1674 = vst.msk [vmem:[%s5853_s3 + $0x30] sm:$0xff] %vm100_vm0, %v1038_v2  ;;  %v1910_v35 = vperm.slane %v4552_v41, 2 }
 0x241   :  { %v679_v36 = vsub.f32 %v4348_v20, %v612_v63 }
 0x242   :  { %803 = vmin.index.xlane.f32.xlu1 %v678_v5  ;;  %v3328_v5 = vsel %vm835_vm10, 1.0, %v3560_v13 }
 0x243   :  { %805 = vmin.index.xlane.f32.xlu2 %v679_v36  ;;  %v1914_v36 = vperm.slane %v4552_v41, 6 }
 0x245   :  { %v1041_v19 = vpop.f32.mrf.mxu1 }
 0x246   :  { %v4502_v30 = vld [vmem:[#allocation1] sm:$0xff]  ;;  %1675 = vst.msk [vmem:[%s5853_s3 + $0x38] sm:$0xff] %vm100_vm0, %v1041_v19 }
 0x247   :  { %2413 = vst [vmem:[#allocation1] ss:$9 sm:$0xff] %v1876_v16  ;;  %v1893_v16 = vperm.slane %v4506_v34, 1 }
 0x248   :  { %2414 = vst [vmem:[#allocation1 + $0x1] ss:$9 sm:$0xff] %v1877_v26  ;;  %v1894_v26 = vperm.slane %v4506_v34, 2 }
 0x249   :  { %2415 = vst [vmem:[#allocation1 + $0x2] ss:$9 sm:$0xff] %v1878_v28  ;;  %v547_v28 = vpop.f32.mrf.mxu3 }
 0x24a   :  { %2416 = vst [vmem:[#allocation1 + $0x3] ss:$9 sm:$0xff] %v1879_v38  ;;  %v1895_v38 = vperm.slane %v4506_v34, 3  ;;  %v613_v37 = vmul.f32 2.0, %v547_v28 }
 0x24b   :  { %2417 = vst [vmem:[#allocation1 + $0x4] ss:$9 sm:$0xff] %v1880_v33  ;;  %v1896_v33 = vperm.slane %v4506_v34, 4 }
 0x24c   :  { %2418 = vst [vmem:[#allocation1 + $0x5] ss:$9 sm:$0xff] %v1881_v44  ;;  %v1897_v44 = vperm.slane %v4506_v34, 5  ;;  %v680_v62 = vsub.f32 %v4348_v20, %v613_v37  ;;  %v1904_v20 = vperm.slane %v4529_v9, 4 }
 0x24d   :  { %2419 = vst [vmem:[#allocation1 + $0x6] ss:$9 sm:$0xff] %v1882_v12  ;;  %v1899_v12 = vperm.slane %v4506_v34, 7  ;;  %v1900_v34 = vperm.slane %v4529_v9, 0  ;;  %v1044_v10 = vpop.f32.mrf.mxu1 }
 0x24e   :  { %2420 = vst [vmem:[#allocation1 + $0x7] ss:$9 sm:$0xff] %v1883_v27  ;;  %v3326_v27 = vsel %vm833_vm8, 1.0, %v3560_v13  ;;  %807 = vmin.index.xlane.f32.xlu0 %v680_v62  ;;  %v1926_v62 = vperm.slane %v4593_v45, 2 }
 0x24f   :  { %v1620_v39 = vadd.f32 %v3326_v27, %v1619_v11  ;;  %1676 = vst.msk [vmem:[%s5853_s3 + $0x40] sm:$0xff] %vm100_vm0, %v1044_v10  ;;  %v1913_v11 = vperm.slane %v4552_v41, 5  ;;  %v1924_v27 = vperm.slane %v4593_v45, 0 }
 0x255   :  { %v4525_v61 = vld [vmem:[#allocation1] sm:$0xff] }
 0x256   :  { %2422 = vst [vmem:[#allocation1] ss:$9 sm:$0xff] %v1884_v58  ;;  %v4573_v58 = vpop.xlane.xlu2 %727 }
 0x257   :  { %2423 = vst [vmem:[#allocation1 + $0x1] ss:$9 sm:$0xff] %v1885_v52  ;;  %v1905_v52 = vperm.slane %v4529_v9, 5  ;;  %vm834_vm9 = vcmp.eq.s32.totalorder %v4573_v58, %v4063_v57  ;;  %v1916_v28 = vperm.slane %v4573_v58, 0  ;;  %v1922_v37 = vperm.slane %v4573_v58, 6 }
 0x258   :  { %2424 = vst [vmem:[#allocation1 + $0x2] ss:$9 sm:$0xff] %v1886_v59  ;;  %v1906_v59 = vperm.slane %v4529_v9, 6  ;;  %3391 = vmatmul.msk.f32.gmra.mxu1 %vm834_vm9, %v3559_v3  ;;  %v1908_v9 = vperm.slane %v4552_v41, 0 }
 0x259   :  { %2425 = vst [vmem:[#allocation1 + $0x3] ss:$9 sm:$0xff] %v1887_v0  ;;  %v3327_v0 = vsel %vm834_vm9, 1.0, %v3560_v13 }
 0x25a   :  { %2426 = vst [vmem:[#allocation1 + $0x4] ss:$9 sm:$0xff] %v1888_v7  ;;  %v1621_v7 = vadd.f32 %v3327_v0, %v1620_v39  ;;  %v1925_v39 = vperm.slane %v4593_v45, 1 }
 0x25b   :  { %2427 = vst [vmem:[#allocation1 + $0x5] ss:$9 sm:$0xff] %v1889_v15  ;;  %v1909_v15 = vperm.slane %v4552_v41, 1 }
 0x25c   :  { %2428 = vst [vmem:[#allocation1 + $0x6] ss:$9 sm:$0xff] %v1890_v60  ;;  %v1911_v60 = vperm.slane %v4552_v41, 3  ;;  %v1622_v2 = vadd.f32 %v3328_v5, %v1621_v7 }
 0x25d   :  { %2429 = vst [vmem:[#allocation1 + $0x7] ss:$9 sm:$0xff] %v1891_v1  ;;  %v1912_v1 = vperm.slane %v4552_v41, 4 }
 0x260   :  { %3392 = vmatmul.msk.f32.gmra.mxu1 %vm835_vm10, %v3559_v3 }
 0x264   :  { %v4548_v18 = vld [vmem:[#allocation1] sm:$0xff] }
 0x265   :  { %2431 = vst [vmem:[#allocation1] ss:$9 sm:$0xff] %v1892_v24  ;;  %v3561_v24 = vmov 0  }
 0x266   :  { %2432 = vst [vmem:[#allocation1 + $0x1] ss:$9 sm:$0xff] %v1893_v16  ;;  %3502 = vset.pattern.permute.xlu2 %v3561_v24  ;;  %3501 = vset.pattern.permute.xlu1 %v3561_v24  ;;  %v4602_v16 = vpop.xlane.xlu1 %743 }
 0x267   :  { %2433 = vst [vmem:[#allocation1 + $0x2] ss:$9 sm:$0xff] %v1894_v26  ;;  %2831 = vperm.xlu2 %3502, %v4110_v46   ;;  %2828 = vperm.xlu1 %3501, %v4087_v23   ;;  %v1047_v26 = vpop.f32.mrf.mxu1  ;;  %v1919_v46 = vperm.slane %v4573_v58, 3  ;;  %v1920_v23 = vperm.slane %v4573_v58, 4  ;;  %vm842_vm2 = vcmp.eq.s32.totalorder %v4602_v16, %v4063_v57 }
 0x268   :  { %2434 = vst [vmem:[#allocation1 + $0x3] ss:$9 sm:$0xff] %v1895_v38  ;;  %3503 = vset.pattern.permute.xlu0 %v3561_v24  ;;  %v1917_v38 = vperm.slane %v4573_v58, 1 }
 0x269   :  { %2435 = vst [vmem:[#allocation1 + $0x4] ss:$9 sm:$0xff] %v1896_v33  ;;  %2834 = vperm.xlu0 %3503, %v4128_v4   ;;  %v1918_v33 = vperm.slane %v4573_v58, 2  ;;  %v1921_v4 = vperm.slane %v4573_v58, 5 }
 0x26a   :  { %2436 = vst [vmem:[#allocation1 + $0x5] ss:$9 sm:$0xff] %v1897_v44 }
 0x26b   :  { %2437 = vst [vmem:[#allocation1 + $0x6] ss:$9 sm:$0xff] %v1898_v51  ;;  %v1923_v51 = vperm.slane %v4573_v58, 7 }
 0x26c   :  { %2438 = vst [vmem:[#allocation1 + $0x7] ss:$9 sm:$0xff] %v1899_v12 }
 0x26d   :  { %1677 = vst.msk [vmem:[%s5853_s3 + $0x48] sm:$0xff] %vm100_vm0, %v1047_v26 }
 0x26e   :  { %v4618_v44 = vpop.xlane.xlu1 %731 }
 0x26f   :  { %2837 = vperm.xlu2 %3502, %v4153_v25   ;;  %2840 = vperm.xlu1 %3501, %v4172_v42   ;;  %vm836_vm11 = vcmp.eq.s32.totalorder %v4618_v44, %v4063_v57  ;;  %v4630_v42 = vpop.xlane.xlu2 %739  ;;  %v1935_v7 = vperm.slane %v4618_v44, 3  ;;  %v1936_v10 = vperm.slane %v4618_v44, 4 }
 0x270   :  { %v3329_v12 = vsel %vm836_vm11, 1.0, %v3560_v13  ;;  %3393 = vmatmul.msk.f32.gmra.mxu1 %vm836_vm11, %v3559_v3  ;;  %vm840_vm15 = vcmp.eq.s32.totalorder %v4630_v42, %v4063_v57 }
 0x271   :  { %2855 = vperm.xlu0 %3503, %v4283_v43   ;;  %v1623_v25 = vadd.f32 %v3329_v12, %v1622_v2  ;;  %v1050_v43 = vpop.f32.mrf.mxu1 }
 0x272   :  { %1678 = vst.msk [vmem:[%s5853_s3 + $0x50] sm:$0xff] %vm100_vm0, %v1050_v43 }
 0x273   :  { %v4569_v32 = vld [vmem:[#allocation1] sm:$0xff] }
 0x274   :  { %2440 = vst [vmem:[#allocation1] ss:$9 sm:$0xff] %v1900_v34  ;;  %v1927_v34 = vperm.slane %v4593_v45, 3 }
 0x275   :  { %2441 = vst [vmem:[#allocation1 + $0x1] ss:$9 sm:$0xff] %v1901_v31  ;;  %v1929_v31 = vperm.slane %v4593_v45, 5 }
 0x276   :  { %2442 = vst [vmem:[#allocation1 + $0x2] ss:$9 sm:$0xff] %v1902_v53  ;;  %v1930_v53 = vperm.slane %v4593_v45, 6 }
 0x277   :  { %2443 = vst [vmem:[#allocation1 + $0x3] ss:$9 sm:$0xff] %v1903_v40  ;;  %2843 = vperm.xlu2 %3502, %v4195_v6   ;;  %2846 = vperm.xlu1 %3501, %v4216_v29   ;;  %v1928_v6 = vperm.slane %v4593_v45, 4  ;;  %v4645_v29 = vpop.xlane.xlu2 %733  ;;  %v1931_v40 = vperm.slane %v4593_v45, 7 }
 0x278   :  { %2444 = vst [vmem:[#allocation1 + $0x4] ss:$9 sm:$0xff] %v1904_v20  ;;  %vm837_vm12 = vcmp.eq.s32.totalorder %v4645_v29, %v4063_v57  ;;  %v1941_v45 = vperm.slane %v4645_v29, 1  ;;  %v1944_v5 = vperm.slane %v4645_v29, 4  ;;  %v1945_v2 = vperm.slane %v4645_v29, 5 }
 0x279   :  { %2445 = vst [vmem:[#allocation1 + $0x5] ss:$9 sm:$0xff] %v1905_v52  ;;  %v3330_v20 = vsel %vm837_vm12, 1.0, %v3560_v13  ;;  %3394 = vmatmul.msk.f32.gmra.mxu1 %vm837_vm12, %v3559_v3  ;;  %v1932_v52 = vperm.slane %v4618_v44, 0  ;;  %v1946_v24 = vperm.slane %v4645_v29, 6  ;;  %v1947_v26 = vperm.slane %v4645_v29, 7 }
 0x27a   :  { %2446 = vst [vmem:[#allocation1 + $0x6] ss:$9 sm:$0xff] %v1906_v59  ;;  %v1624_v58 = vadd.f32 %v3330_v20, %v1623_v25  ;;  %v1933_v59 = vperm.slane %v4618_v44, 1 }
 0x27b   :  { %2447 = vst [vmem:[#allocation1 + $0x7] ss:$9 sm:$0xff] %v1907_v54  ;;  %v1934_v54 = vperm.slane %v4618_v44, 2 }
 0x27f   :  { %2849 = vperm.xlu2 %3502, %v4239_v55   ;;  %2852 = vperm.xlu1 %3501, %v4260_v17   ;;  %v4656_v55 = vpop.xlane.xlu0 %741  ;;  %v1053_v17 = vpop.f32.mrf.mxu1 }
 0x280   :  { %1679 = vst.msk [vmem:[%s5853_s3 + $0x58] sm:$0xff] %vm100_vm0, %v1053_v17  ;;  %v1965_v17 = vperm.slane %v4630_v42, 1  ;;  %vm841_vm1 = vcmp.eq.s32.totalorder %v4656_v55, %v4063_v57 }
 0x282   :  { %v4589_v63 = vld [vmem:[#allocation1] sm:$0xff] }
 0x283   :  { %2449 = vst [vmem:[#allocation1] ss:$9 sm:$0xff] %v1908_v9  ;;  %v1938_v9 = vperm.slane %v4618_v44, 6 }
 0x284   :  { %2450 = vst [vmem:[#allocation1 + $0x1] ss:$9 sm:$0xff] %v1909_v15  ;;  %v1939_v15 = vperm.slane %v4618_v44, 7 }
 0x285   :  { %2451 = vst [vmem:[#allocation1 + $0x2] ss:$9 sm:$0xff] %v1910_v35 }
 0x286   :  { %2452 = vst [vmem:[#allocation1 + $0x3] ss:$9 sm:$0xff] %v1911_v60 }
 0x287   :  { %2453 = vst [vmem:[#allocation1 + $0x4] ss:$9 sm:$0xff] %v1912_v1  ;;  %2858 = vperm.xlu2 %3502, %v4307_v14   ;;  %2861 = vperm.xlu1 %3501, %v4334_v48   ;;  %v736_v14 = vpop.xlane.xlu0 %735  ;;  %v1937_v48 = vperm.slane %v4618_v44, 5  ;;  %v1056_v1 = vpop.f32.mrf.mxu1 }
 0x288   :  { %2454 = vst [vmem:[#allocation1 + $0x5] ss:$9 sm:$0xff] %v1913_v11  ;;  %vm838_vm13 = vcmp.eq.s32.totalorder %v736_v14, %v4063_v57  ;;  %v1942_v11 = vperm.slane %v4645_v29, 2  ;;  %v4694_v44 = vpop.xlane.xlu1 %749  ;;  %v1955_v12 = vperm.slane %v736_v14, 7 }
 0x289   :  { %2455 = vst [vmem:[#allocation1 + $0x6] ss:$9 sm:$0xff] %v1914_v36  ;;  %v3331_v35 = vsel %vm838_vm13, 1.0, %v3560_v13  ;;  %3395 = vmatmul.msk.f32.gmra.mxu1 %vm838_vm13, %v3559_v3  ;;  %vm845_vm9 = vcmp.eq.s32.totalorder %v4694_v44, %v4063_v57 }
 0x28a   :  { %2456 = vst [vmem:[#allocation1 + $0x7] ss:$9 sm:$0xff] %v1915_v50  ;;  %v1625_v60 = vadd.f32 %v3331_v35, %v1624_v58  ;;  %v1943_v50 = vperm.slane %v4645_v29, 3  ;;  %v1964_v58 = vperm.slane %v4630_v42, 0  ;;  %v1973_v35 = vperm.slane %v4656_v55, 1 }
 0x28b   :  { %1680 = vst.msk [vmem:[%s5853_s3 + $0x60] sm:$0xff] %vm100_vm0, %v1056_v1  ;;  %v1974_v1 = vperm.slane %v4656_v55, 2 }
 0x28f   :  { %2867 = vperm.xlu2 %3502, %v4390_v47   ;;  %v1940_v47 = vperm.slane %v4645_v29, 0 }
 0x290   :  { %v738_v25 = vpop.xlane.xlu1 %737 }
 0x291   :  { %v4614_v41 = vld [vmem:[#allocation1] sm:$0xff]  ;;  %v1956_v43 = vperm.slane %v738_v25, 0  ;;  %v1961_v29 = vperm.slane %v738_v25, 5  ;;  %vm839_vm14 = vcmp.eq.s32.totalorder %v738_v25, %v4063_v57 }
 0x292   :  { %2458 = vst [vmem:[#allocation1] ss:$9 sm:$0xff] %v1916_v28  ;;  %v1948_v28 = vperm.slane %v736_v14, 0  ;;  %3396 = vmatmul.msk.f32.gmra.mxu1 %vm839_vm14, %v3559_v3 }
 0x293   :  { %2459 = vst [vmem:[#allocation1 + $0x1] ss:$9 sm:$0xff] %v1917_v38  ;;  %v1949_v38 = vperm.slane %v736_v14, 1 }
 0x294   :  { %2460 = vst [vmem:[#allocation1 + $0x2] ss:$9 sm:$0xff] %v1918_v33  ;;  %v1950_v33 = vperm.slane %v736_v14, 2 }
 0x295   :  { %2461 = vst [vmem:[#allocation1 + $0x3] ss:$9 sm:$0xff] %v1919_v46 }
 0x296   :  { %2462 = vst [vmem:[#allocation1 + $0x4] ss:$9 sm:$0xff] %v1920_v23  ;;  %v1951_v23 = vperm.slane %v736_v14, 3 }
 0x297   :  { %2463 = vst [vmem:[#allocation1 + $0x5] ss:$9 sm:$0xff] %v1921_v4  ;;  %v1952_v4 = vperm.slane %v736_v14, 4 }
 0x298   :  { %2464 = vst [vmem:[#allocation1 + $0x6] ss:$9 sm:$0xff] %v1922_v37  ;;  %v1953_v37 = vperm.slane %v736_v14, 5 }
 0x299   :  { %2465 = vst [vmem:[#allocation1 + $0x7] ss:$9 sm:$0xff] %v1923_v51  ;;  %v1954_v51 = vperm.slane %v736_v14, 6  ;;  %v1970_v14 = vperm.slane %v4630_v42, 6 }
 0x29a   :  { %3397 = vmatmul.msk.f32.gmra.mxu1 %vm840_vm15, %v3559_v3 }
 0x2a0   :  { %v4641_v19 = vld [vmem:[#allocation1] sm:$0xff] }
 0x2a1   :  { %2467 = vst [vmem:[#allocation1] ss:$9 sm:$0xff] %v1924_v27  ;;  %v1957_v27 = vperm.slane %v738_v25, 1 }
 0x2a2   :  { %2468 = vst [vmem:[#allocation1 + $0x1] ss:$9 sm:$0xff] %v1925_v39  ;;  %v1958_v39 = vperm.slane %v738_v25, 2  ;;  %3398 = vmatmul.msk.f32.gmra.mxu1 %vm841_vm1, %v3559_v3 }
 0x2a3   :  { %2469 = vst [vmem:[#allocation1 + $0x2] ss:$9 sm:$0xff] %v1926_v62 }
 0x2a4   :  { %2470 = vst [vmem:[#allocation1 + $0x3] ss:$9 sm:$0xff] %v1927_v34  ;;  %v1959_v34 = vperm.slane %v738_v25, 3 }
 0x2a5   :  { %2471 = vst [vmem:[#allocation1 + $0x4] ss:$9 sm:$0xff] %v1928_v6  ;;  %v1960_v6 = vperm.slane %v738_v25, 4 }
 0x2a6   :  { %2472 = vst [vmem:[#allocation1 + $0x5] ss:$9 sm:$0xff] %v1929_v31  ;;  %v1962_v31 = vperm.slane %v738_v25, 6 }
 0x2a7   :  { %2473 = vst [vmem:[#allocation1 + $0x6] ss:$9 sm:$0xff] %v1930_v53  ;;  %v1963_v53 = vperm.slane %v738_v25, 7  ;;  %v4754_v25 = vpop.xlane.xlu2 %745 }
 0x2a8   :  { %2474 = vst [vmem:[#allocation1 + $0x7] ss:$9 sm:$0xff] %v1931_v40  ;;  %v3332_v40 = vsel %vm839_vm14, 1.0, %v3560_v13  ;;  %vm843_vm5 = vcmp.eq.s32.totalorder %v4754_v25, %v4063_v57 }
 0x2a9   :  { %v1626_v20 = vadd.f32 %v3332_v40, %v1625_v60  ;;  %v1993_v40 = vperm.slane %v4754_v25, 5 }
 0x2aa   :  { %3399 = vmatmul.msk.f32.gmra.mxu1 %vm842_vm2, %v3559_v3 }
 0x2af   :  { %v4667_v0 = vld [vmem:[#allocation1] sm:$0xff] }
 0x2b0   :  { %2476 = vst [vmem:[#allocation1] ss:$9 sm:$0xff] %v1932_v52 }
 0x2b1   :  { %2477 = vst [vmem:[#allocation1 + $0x1] ss:$9 sm:$0xff] %v1933_v59  ;;  %v1966_v59 = vperm.slane %v4630_v42, 2 }
 0x2b2   :  { %2478 = vst [vmem:[#allocation1 + $0x2] ss:$9 sm:$0xff] %v1934_v54  ;;  %v1967_v54 = vperm.slane %v4630_v42, 3  ;;  %3400 = vmatmul.msk.f32.gmra.mxu1 %vm843_vm5, %v3559_v3 }
 0x2b3   :  { %2479 = vst [vmem:[#allocation1 + $0x3] ss:$9 sm:$0xff] %v1935_v7  ;;  %v1968_v7 = vperm.slane %v4630_v42, 4 }
 0x2b4   :  { %2480 = vst [vmem:[#allocation1 + $0x4] ss:$9 sm:$0xff] %v1936_v10  ;;  %v1969_v10 = vperm.slane %v4630_v42, 5 }
 0x2b5   :  { %2481 = vst [vmem:[#allocation1 + $0x5] ss:$9 sm:$0xff] %v1937_v48  ;;  %v1971_v48 = vperm.slane %v4630_v42, 7  ;;  %v1987_v42 = vperm.slane %v4602_v16, 7 }
 0x2b6   :  { %2482 = vst [vmem:[#allocation1 + $0x6] ss:$9 sm:$0xff] %v1938_v9  ;;  %v1059_v9 = vpop.f32.mrf.mxu1 }
 0x2b7   :  { %2483 = vst [vmem:[#allocation1 + $0x7] ss:$9 sm:$0xff] %v1939_v15  ;;  %v1972_v15 = vperm.slane %v4656_v55, 0 }
 0x2b8   :  { %1681 = vst.msk [vmem:[%s5853_s3 + $0x68] sm:$0xff] %vm100_vm0, %v1059_v9 }
 0x2be   :  { %v4685_v36 = vld [vmem:[#allocation1] sm:$0xff] }
 0x2bf   :  { %2485 = vst [vmem:[#allocation1] ss:$9 sm:$0xff] %v1940_v47  ;;  %v1975_v47 = vperm.slane %v4656_v55, 3 }
 0x2c0   :  { %2486 = vst [vmem:[#allocation1 + $0x1] ss:$9 sm:$0xff] %v1941_v45  ;;  %v1976_v45 = vperm.slane %v4656_v55, 4 }
 0x2c1   :  { %2487 = vst [vmem:[#allocation1 + $0x2] ss:$9 sm:$0xff] %v1942_v11  ;;  %v1977_v11 = vperm.slane %v4656_v55, 5 }
 0x2c2   :  { %2488 = vst [vmem:[#allocation1 + $0x3] ss:$9 sm:$0xff] %v1943_v50  ;;  %v1978_v50 = vperm.slane %v4656_v55, 6 }
 0x2c3   :  { %2489 = vst [vmem:[#allocation1 + $0x4] ss:$9 sm:$0xff] %v1944_v5  ;;  %v1979_v5 = vperm.slane %v4656_v55, 7 }
 0x2c4   :  { %2490 = vst [vmem:[#allocation1 + $0x5] ss:$9 sm:$0xff] %v1945_v2  ;;  %v1980_v2 = vperm.slane %v4602_v16, 0 }
 0x2c5   :  { %2491 = vst [vmem:[#allocation1 + $0x6] ss:$9 sm:$0xff] %v1946_v24  ;;  %v1981_v24 = vperm.slane %v4602_v16, 1 }
 0x2c6   :  { %2492 = vst [vmem:[#allocation1 + $0x7] ss:$9 sm:$0xff] %v1947_v26 }
 0x2cd   :  { %v4692_v46 = vld [vmem:[#allocation1] sm:$0xff] }
 0x2ce   :  { %2494 = vst [vmem:[#allocation1] ss:$9 sm:$0xff] %v1948_v28  ;;  %v1982_v28 = vperm.slane %v4602_v16, 2 }
 0x2cf   :  { %2495 = vst [vmem:[#allocation1 + $0x1] ss:$9 sm:$0xff] %v1949_v38  ;;  %v1983_v38 = vperm.slane %v4602_v16, 3 }
 0x2d0   :  { %2496 = vst [vmem:[#allocation1 + $0x2] ss:$9 sm:$0xff] %v1950_v33  ;;  %v3333_v33 = vsel %vm840_vm15, 1.0, %v3560_v13 }
 0x2d1   :  { %2497 = vst [vmem:[#allocation1 + $0x3] ss:$9 sm:$0xff] %v1951_v23  ;;  %v1984_v23 = vperm.slane %v4602_v16, 4 }
 0x2d2   :  { %2498 = vst [vmem:[#allocation1 + $0x4] ss:$9 sm:$0xff] %v1952_v4  ;;  %v1627_v4 = vadd.f32 %v3333_v33, %v1626_v20  ;;  %v1994_v20 = vperm.slane %v4754_v25, 6  ;;  %v2007_v33 = vperm.slane %v4694_v44, 3 }
 0x2d3   :  { %2499 = vst [vmem:[#allocation1 + $0x5] ss:$9 sm:$0xff] %v1953_v37  ;;  %v1985_v37 = vperm.slane %v4602_v16, 5 }
 0x2d4   :  { %2500 = vst [vmem:[#allocation1 + $0x6] ss:$9 sm:$0xff] %v1954_v51  ;;  %v4749_v51 = vpop.xlane.xlu1 %755 }
 0x2d5   :  { %2501 = vst [vmem:[#allocation1 + $0x7] ss:$9 sm:$0xff] %v1955_v12  ;;  %v1986_v12 = vperm.slane %v4602_v16, 6  ;;  %vm848_vm3 = vcmp.eq.s32.totalorder %v4749_v51, %v4063_v57 }
 0x2d6   :  { %3405 = vmatmul.msk.f32.vlgmr.msrb.gmra.mxu3 %vm848_vm3, %v3559_v3 }
 0x2dc   :  { %v4696_v62 = vld [vmem:[#allocation1] sm:$0xff] }
 0x2dd   :  { %2503 = vst [vmem:[#allocation1] ss:$9 sm:$0xff] %v1956_v43  ;;  %v1062_v43 = vpop.f32.mrf.mxu1 }
 0x2de   :  { %2504 = vst [vmem:[#allocation1 + $0x1] ss:$9 sm:$0xff] %v1957_v27  ;;  %v1988_v27 = vperm.slane %v4754_v25, 0 }
 0x2df   :  { %2505 = vst [vmem:[#allocation1 + $0x2] ss:$9 sm:$0xff] %v1958_v39  ;;  %v1989_v39 = vperm.slane %v4754_v25, 1 }
 0x2e0   :  { %2506 = vst [vmem:[#allocation1 + $0x3] ss:$9 sm:$0xff] %v1959_v34  ;;  %v4773_v34 = vpop.xlane.xlu2 %751 }
 0x2e1   :  { %2507 = vst [vmem:[#allocation1 + $0x4] ss:$9 sm:$0xff] %v1960_v6  ;;  %vm846_vm11 = vcmp.eq.s32.totalorder %v4773_v34, %v4063_v57 }
 0x2e2   :  { %2508 = vst [vmem:[#allocation1 + $0x5] ss:$9 sm:$0xff] %v1961_v29  ;;  %v1990_v29 = vperm.slane %v4754_v25, 2 }
 0x2e3   :  { %2509 = vst [vmem:[#allocation1 + $0x6] ss:$9 sm:$0xff] %v1962_v31  ;;  %v1991_v31 = vperm.slane %v4754_v25, 3 }
 0x2e4   :  { %2510 = vst [vmem:[#allocation1 + $0x7] ss:$9 sm:$0xff] %v1963_v53  ;;  %v1992_v53 = vperm.slane %v4754_v25, 4 }
 0x2e5   :  { %1682 = vst.msk [vmem:[%s5853_s3 + $0x70] sm:$0xff] %vm100_vm0, %v1062_v43  ;;  %v1065_v16 = vpop.f32.mrf.mxu1  ;;  %v2012_v43 = vperm.slane %v4773_v34, 0 }
 0x2e6   :  { %1683 = vst.msk [vmem:[%s5853_s3 + $0x78] sm:$0xff] %vm100_vm0, %v1065_v16 }
 0x2eb   :  { %v4703_v52 = vld [vmem:[#allocation1] sm:$0xff] }
 0x2ec   :  { %2512 = vst [vmem:[#allocation1] ss:$9 sm:$0xff] %v1964_v58  ;;  %v4782_v58 = vpop.xlane.xlu0 %747 }
 0x2ed   :  { %2513 = vst [vmem:[#allocation1 + $0x1] ss:$9 sm:$0xff] %v1965_v17  ;;  %v1995_v17 = vperm.slane %v4754_v25, 7  ;;  %v1998_v55 = vperm.slane %v4782_v58, 2  ;;  %v4861_v25 = vld [vmem:[%s5851_s1] ss:$0 sm:$0xff]  ;;  %vm844_vm8 = vcmp.eq.s32.totalorder %v4782_v58, %v4063_v57 }
 0x2ee   :  { %2514 = vst [vmem:[#allocation1 + $0x2] ss:$9 sm:$0xff] %v1966_v59  ;;  %v4785_v59 = vpop.xlane.xlu2 %757  ;;  %3401 = vmatmul.msk.f32.gmra.mxu1 %vm844_vm8, %v3559_v3 }
 0x2ef   :  { %2515 = vst [vmem:[#allocation1 + $0x3] ss:$9 sm:$0xff] %v1967_v54  ;;  %v3334_v54 = vsel %vm841_vm1, 1.0, %v3560_v13  ;;  %vm849_vm4 = vcmp.eq.s32.totalorder %v4785_v59, %v4063_v57 }
 0x2f0   :  { %2516 = vst [vmem:[#allocation1 + $0x4] ss:$9 sm:$0xff] %v1968_v7  ;;  %v1628_v7 = vadd.f32 %v3334_v54, %v1627_v4  ;;  %3406 = vmatmul.msk.f32.gmra.mxu3 %vm849_vm4, %v3559_v3  ;;  %v2009_v4 = vperm.slane %v4694_v44, 5  ;;  %v2016_v54 = vperm.slane %v4773_v34, 4 }
 0x2f1   :  { %2517 = vst [vmem:[#allocation1 + $0x5] ss:$9 sm:$0xff] %v1969_v10  ;;  %v1996_v10 = vperm.slane %v4782_v58, 0 }
 0x2f2   :  { %2518 = vst [vmem:[#allocation1 + $0x6] ss:$9 sm:$0xff] %v1970_v14  ;;  %v1997_v14 = vperm.slane %v4782_v58, 1 }
 0x2f3   :  { %2519 = vst [vmem:[#allocation1 + $0x7] ss:$9 sm:$0xff] %v1971_v48 }
 0x2f4   :  { %v4801_v9 = vpop.xlane.xlu0 %753 }
 0x2f5   :  { %v2025_v16 = vperm.slane %v4801_v9, 5  ;;  %vm847_vm13 = vcmp.eq.s32.totalorder %v4801_v9, %v4063_v57 }
 0x2f6   :  { %3402 = vmatmul.msk.f32.gmra.mxu1 %vm845_vm9, %v3559_v3 }
 0x2fa   :  { %v4723_v60 = vld [vmem:[#allocation1] sm:$0xff] }
 0x2fb   :  { %2521 = vst [vmem:[#allocation1] ss:$9 sm:$0xff] %v1972_v15  ;;  %v1999_v15 = vperm.slane %v4782_v58, 3 }
 0x2fc   :  { %2522 = vst [vmem:[#allocation1 + $0x1] ss:$9 sm:$0xff] %v1973_v35  ;;  %v2000_v35 = vperm.slane %v4782_v58, 4 }
 0x2fd   :  { %2523 = vst [vmem:[#allocation1 + $0x2] ss:$9 sm:$0xff] %v1974_v1  ;;  %v2001_v1 = vperm.slane %v4782_v58, 5 }
 0x2fe   :  { %2524 = vst [vmem:[#allocation1 + $0x3] ss:$9 sm:$0xff] %v1975_v47  ;;  %v3335_v47 = vsel %vm842_vm2, 1.0, %v3560_v13  ;;  %3403 = vmatmul.msk.f32.gmra.mxu1 %vm846_vm11, %v3559_v3 }
 0x2ff   :  { %2525 = vst [vmem:[#allocation1 + $0x4] ss:$9 sm:$0xff] %v1976_v45  ;;  %v2002_v45 = vperm.slane %v4782_v58, 6 }
 0x300   :  { %2526 = vst [vmem:[#allocation1 + $0x5] ss:$9 sm:$0xff] %v1977_v11  ;;  %v1629_v11 = vadd.f32 %v3335_v47, %v1628_v7  ;;  %v2017_v7 = vperm.slane %v4773_v34, 5 }
 0x301   :  { %2527 = vst [vmem:[#allocation1 + $0x6] ss:$9 sm:$0xff] %v1978_v50  ;;  %v2003_v50 = vperm.slane %v4782_v58, 7  ;;  %v2028_v58 = vperm.slane %v4749_v51, 0 }
 0x302   :  { %2528 = vst [vmem:[#allocation1 + $0x7] ss:$9 sm:$0xff] %v1979_v5  ;;  %v4813_v5 = vpop.xlane.xlu0 %759 }
 0x303   :  { %vm850_vm6 = vcmp.eq.s32.totalorder %v4813_v5, %v4063_v57 }
 0x304   :  { %3407 = vmatmul.msk.f32.gmra.mxu3 %vm850_vm6, %v3559_v3 }
 0x306   :  { %3404 = vmatmul.msk.f32.gmra.mxu1 %vm847_vm13, %v3559_v3 }
 0x309   :  { %v4739_v26 = vld [vmem:[#allocation1] sm:$0xff] }
 0x30a   :  { %2530 = vst [vmem:[#allocation1] ss:$9 sm:$0xff] %v1980_v2  ;;  %v2004_v2 = vperm.slane %v4694_v44, 0 }
 0x30b   :  { %2531 = vst [vmem:[#allocation1 + $0x1] ss:$9 sm:$0xff] %v1981_v24  ;;  %v2005_v24 = vperm.slane %v4694_v44, 1 }
 0x30c   :  { %2532 = vst [vmem:[#allocation1 + $0x2] ss:$9 sm:$0xff] %v1982_v28 }
 0x30d   :  { %2533 = vst [vmem:[#allocation1 + $0x3] ss:$9 sm:$0xff] %v1983_v38  ;;  %v2006_v38 = vperm.slane %v4694_v44, 2 }
 0x30e   :  { %2534 = vst [vmem:[#allocation1 + $0x4] ss:$9 sm:$0xff] %v1984_v23  ;;  %v2008_v23 = vperm.slane %v4694_v44, 4 }
 0x30f   :  { %2535 = vst [vmem:[#allocation1 + $0x5] ss:$9 sm:$0xff] %v1985_v37  ;;  %v2010_v37 = vperm.slane %v4694_v44, 6 }
 0x310   :  { %2536 = vst [vmem:[#allocation1 + $0x6] ss:$9 sm:$0xff] %v1986_v12  ;;  %v2011_v12 = vperm.slane %v4694_v44, 7  ;;  %v2042_v44 = vperm.slane %v4785_v59, 6 }
 0x311   :  { %2537 = vst [vmem:[#allocation1 + $0x7] ss:$9 sm:$0xff] %v1987_v42  ;;  %v529_v42 = vpop.f32.mrf.mxu2 }
 0x318   :  { %v4775_v6 = vld [vmem:[#allocation1] sm:$0xff] }
 0x319   :  { %2539 = vst [vmem:[#allocation1] ss:$9 sm:$0xff] %v1988_v27  ;;  %v2013_v27 = vperm.slane %v4773_v34, 1 }
 0x31a   :  { %2540 = vst [vmem:[#allocation1 + $0x1] ss:$9 sm:$0xff] %v1989_v39 }
 0x31b   :  { %2541 = vst [vmem:[#allocation1 + $0x2] ss:$9 sm:$0xff] %v1990_v29  ;;  %v2014_v29 = vperm.slane %v4773_v34, 2 }
 0x31c   :  { %2542 = vst [vmem:[#allocation1 + $0x3] ss:$9 sm:$0xff] %v1991_v31  ;;  %v4846_v31 = vpop.xlane.xlu1 %761 }
 0x31d   :  { %2543 = vst [vmem:[#allocation1 + $0x4] ss:$9 sm:$0xff] %v1992_v53  ;;  %v607_v53 = vmul.f32 2.0, %v529_v42  ;;  %vm851_vm7 = vcmp.eq.s32.totalorder %v4846_v31, %v4063_v57  ;;  %v2031_v42 = vperm.slane %v4749_v51, 3 }
 0x31e   :  { %2544 = vst [vmem:[#allocation1 + $0x5] ss:$9 sm:$0xff] %v1993_v40  ;;  %v3336_v40 = vsel %vm843_vm5, 1.0, %v3560_v13  ;;  %3408 = vmatmul.msk.f32.gmra.mxu3 %vm851_vm7, %v3559_v3 }
 0x31f   :  { %2545 = vst [vmem:[#allocation1 + $0x6] ss:$9 sm:$0xff] %v1994_v20  ;;  %v2015_v20 = vperm.slane %v4773_v34, 3 }
 0x320   :  { %2546 = vst [vmem:[#allocation1 + $0x7] ss:$9 sm:$0xff] %v1995_v17  ;;  %v1630_v17 = vadd.f32 %v3336_v40, %v1629_v11  ;;  %v2023_v11 = vperm.slane %v4801_v9, 3  ;;  %v2036_v40 = vperm.slane %v4785_v59, 0 }
 0x327   :  { %v4799_v48 = vld [vmem:[#allocation1] sm:$0xff] }
 0x328   :  { %2548 = vst [vmem:[#allocation1] ss:$9 sm:$0xff] %v1996_v10  ;;  %v2018_v10 = vperm.slane %v4773_v34, 6 }
 0x329   :  { %2549 = vst [vmem:[#allocation1 + $0x1] ss:$9 sm:$0xff] %v1997_v14  ;;  %v674_v14 = vsub.f32 %v4861_v25, %v607_v53 }
 0x32a   :  { %2550 = vst [vmem:[#allocation1 + $0x2] ss:$9 sm:$0xff] %v1998_v55  ;;  %v2019_v55 = vperm.slane %v4773_v34, 7  ;;  %v2048_v34 = vperm.slane %v4813_v5, 4 }
 0x32b   :  { %2551 = vst [vmem:[#allocation1 + $0x3] ss:$9 sm:$0xff] %v1999_v15  ;;  %795 = vmin.index.xlane.f32.xlu0 %v674_v14  ;;  %v1068_v15 = vpop.f32.mrf.mxu1  ;;  %v2041_v14 = vperm.slane %v4785_v59, 5 }
 0x32c   :  { %2552 = vst [vmem:[#allocation1 + $0x4] ss:$9 sm:$0xff] %v2000_v35  ;;  %v2020_v35 = vperm.slane %v4801_v9, 0 }
 0x32d   :  { %2553 = vst [vmem:[#allocation1 + $0x5] ss:$9 sm:$0xff] %v2001_v1  ;;  %v2021_v1 = vperm.slane %v4801_v9, 1 }
 0x32e   :  { %2554 = vst [vmem:[#allocation1 + $0x6] ss:$9 sm:$0xff] %v2002_v45  ;;  %v2022_v45 = vperm.slane %v4801_v9, 2 }
 0x32f   :  { %2555 = vst [vmem:[#allocation1 + $0x7] ss:$9 sm:$0xff] %v2003_v50  ;;  %v2024_v50 = vperm.slane %v4801_v9, 4 }
 0x330   :  { %1684 = vst.msk [vmem:[%s5853_s3 + $0x80] sm:$0xff] %vm100_vm0, %v1068_v15  ;;  %v4944_v15 = vpop.xlane.xlu0 %765 }
 0x331   :  { %vm853_vm12 = vcmp.eq.s32.totalorder %v4944_v15, %v4063_v57 }
 0x333   :  { %v1071_v53 = vpop.f32.mrf.mxu1 }
 0x334   :  { %1685 = vst.msk [vmem:[%s5853_s3 + $0x88] sm:$0xff] %vm100_vm0, %v1071_v53 }
 0x336   :  { %v4833_v28 = vld [vmem:[#allocation1] sm:$0xff] }
 0x337   :  { %2557 = vst [vmem:[#allocation1] ss:$9 sm:$0xff] %v2004_v2  ;;  %v2026_v2 = vperm.slane %v4801_v9, 6 }
 0x338   :  { %2558 = vst [vmem:[#allocation1 + $0x1] ss:$9 sm:$0xff] %v2005_v24  ;;  %v3337_v24 = vsel %vm844_vm8, 1.0, %v3560_v13 }
 0x339   :  { %2559 = vst [vmem:[#allocation1 + $0x2] ss:$9 sm:$0xff] %v2006_v38  ;;  %v2027_v38 = vperm.slane %v4801_v9, 7  ;;  %v2046_v9 = vperm.slane %v4813_v5, 2 }
 0x33a   :  { %2560 = vst [vmem:[#allocation1 + $0x3] ss:$9 sm:$0xff] %v2007_v33  ;;  %v1631_v33 = vadd.f32 %v3337_v24, %v1630_v17  ;;  %v2047_v24 = vperm.slane %v4813_v5, 3 }
 0x33b   :  { %2561 = vst [vmem:[#allocation1 + $0x4] ss:$9 sm:$0xff] %v2008_v23  ;;  %v4899_v23 = vpop.xlane.xlu2 %763  ;;  %v1074_v53 = vpop.f32.mrf.mxu1 }
 0x33c   :  { %2562 = vst [vmem:[#allocation1 + $0x5] ss:$9 sm:$0xff] %v2009_v4  ;;  %vm852_vm10 = vcmp.eq.s32.totalorder %v4899_v23, %v4063_v57 }
 0x33d   :  { %2563 = vst [vmem:[#allocation1 + $0x6] ss:$9 sm:$0xff] %v2010_v37  ;;  %3409 = vmatmul.msk.f32.gmra.mxu3 %vm852_vm10, %v3559_v3  ;;  %v2029_v37 = vperm.slane %v4749_v51, 1 }
 0x33e   :  { %2564 = vst [vmem:[#allocation1 + $0x7] ss:$9 sm:$0xff] %v2011_v12  ;;  %v2030_v12 = vperm.slane %v4749_v51, 2 }
 0x33f   :  { %2864 = vperm.xlu0 %3503, %v4364_v8   ;;  %v2034_v8 = vperm.slane %v4749_v51, 6  ;;  %1686 = vst.msk [vmem:[%s5853_s3 + $0x90] sm:$0xff] %vm100_vm0, %v1074_v53 }
 0x345   :  { %v4843_v39 = vld [vmem:[#allocation1] sm:$0xff]  ;;  %3410 = vmatmul.msk.f32.gmra.mxu3 %vm853_vm12, %v3559_v3 }
 0x346   :  { %2566 = vst [vmem:[#allocation1] ss:$9 sm:$0xff] %v2012_v43  ;;  %v2032_v43 = vperm.slane %v4749_v51, 4 }
 0x347   :  { %2567 = vst [vmem:[#allocation1 + $0x1] ss:$9 sm:$0xff] %v2013_v27  ;;  %v2033_v27 = vperm.slane %v4749_v51, 5  ;;  %2873 = vperm.xlu0 %3503, %v4452_v21   ;;  %v2038_v21 = vperm.slane %v4785_v59, 2 }
 0x348   :  { %2568 = vst [vmem:[#allocation1 + $0x2] ss:$9 sm:$0xff] %v2014_v29  ;;  %v2035_v29 = vperm.slane %v4749_v51, 7 }
 0x349   :  { %2569 = vst [vmem:[#allocation1 + $0x3] ss:$9 sm:$0xff] %v2015_v20  ;;  %v2037_v20 = vperm.slane %v4785_v59, 1 }
 0x34a   :  { %2570 = vst [vmem:[#allocation1 + $0x4] ss:$9 sm:$0xff] %v2016_v54  ;;  %v3338_v54 = vsel %vm845_vm9, 1.0, %v3560_v13 }
 0x34b   :  { %2571 = vst [vmem:[#allocation1 + $0x5] ss:$9 sm:$0xff] %v2017_v7  ;;  %v2039_v7 = vperm.slane %v4785_v59, 3 }
 0x34c   :  { %2572 = vst [vmem:[#allocation1 + $0x6] ss:$9 sm:$0xff] %v2018_v10  ;;  %v1632_v10 = vadd.f32 %v3338_v54, %v1631_v33  ;;  %v2049_v33 = vperm.slane %v4813_v5, 5 }
 0x34d   :  { %2573 = vst [vmem:[#allocation1 + $0x7] ss:$9 sm:$0xff] %v2019_v55  ;;  %v2043_v55 = vperm.slane %v4785_v59, 7 }
 0x34f   :  { %2882 = vperm.xlu0 %3503, %v4525_v61   ;;  %v2040_v61 = vperm.slane %v4785_v59, 4  ;;  %v3344_v59 = vsel %vm851_vm7, 1.0, %v3560_v13 }
 0x354   :  { %v4881_v47 = vld [vmem:[#allocation1] sm:$0xff] }
 0x355   :  { %2575 = vst [vmem:[#allocation1] ss:$9 sm:$0xff] %v2020_v35  ;;  %v4956_v35 = vpop.xlane.xlu2 %769 }
 0x356   :  { %2576 = vst [vmem:[#allocation1 + $0x1] ss:$9 sm:$0xff] %v2021_v1  ;;  %v2044_v1 = vperm.slane %v4813_v5, 0  ;;  %vm855_vm15 = vcmp.eq.s32.totalorder %v4956_v35, %v4063_v57 }
 0x357   :  { %2577 = vst [vmem:[#allocation1 + $0x2] ss:$9 sm:$0xff] %v2022_v45  ;;  %2891 = vperm.xlu0 %3503, %v4589_v63   ;;  %v3339_v63 = vsel %vm846_vm11, 1.0, %v3560_v13  ;;  %vm3022_vm11 = vcmask 130112  }
 0x358   :  { %2578 = vst [vmem:[#allocation1 + $0x3] ss:$9 sm:$0xff] %v2023_v11  ;;  %v2045_v11 = vperm.slane %v4813_v5, 1 }
 0x359   :  { %2579 = vst [vmem:[#allocation1 + $0x4] ss:$9 sm:$0xff] %v2024_v50  ;;  %v1633_v50 = vadd.f32 %v3339_v63, %v1632_v10  ;;  %v3346_v10 = vsel %vm853_vm12, 1.0, %v3560_v13  ;;  %vm3026_vm12 = vcmask 195712  }
 0x35a   :  { %2580 = vst [vmem:[#allocation1 + $0x5] ss:$9 sm:$0xff] %v2025_v16  ;;  %v4968_v16 = vpop.xlane.xlu1 %767 }
 0x35b   :  { %2581 = vst [vmem:[#allocation1 + $0x6] ss:$9 sm:$0xff] %v2026_v2  ;;  %v3340_v2 = vsel %vm847_vm13, 1.0, %v3560_v13  ;;  %vm854_vm14 = vcmp.eq.s32.totalorder %v4968_v16, %v4063_v57  ;;  %vm3030_vm13 = vcmask 261312  }
 0x35c   :  { %2582 = vst [vmem:[#allocation1 + $0x7] ss:$9 sm:$0xff] %v2027_v38  ;;  %v1634_v38 = vadd.f32 %v3340_v2, %v1633_v50  ;;  %v3347_v63 = vsel %vm854_vm14, 1.0, %v3560_v13  ;;  %3411 = vmatmul.msk.f32.gmra.mxu3 %vm854_vm14, %v3559_v3  ;;  %v3348_v50 = vsel %vm855_vm15, 1.0, %v3560_v13  ;;  %v2057_v2 = vperm.slane %v4846_v31, 5 }
 0x35d   :  { %vm3034_vm14 = vcmask 326912  }
 0x35f   :  { %2900 = vperm.xlu0 %3503, %v4667_v0   ;;  %v3341_v0 = vsel %vm848_vm3, 1.0, %v3560_v13 }
 0x363   :  { %v4909_v4 = vld [vmem:[#allocation1] sm:$0xff] }
 0x364   :  { %2584 = vst [vmem:[#allocation1] ss:$9 sm:$0xff] %v2028_v58  ;;  %v1635_v58 = vadd.f32 %v3341_v0, %v1634_v38  ;;  %3412 = vmatmul.msk.f32.gmra.mxu3 %vm855_vm15, %v3559_v3  ;;  %vm3038_vm15 = vcmask 392512  }
 0x365   :  { %2585 = vst [vmem:[#allocation1 + $0x1] ss:$9 sm:$0xff] %v2029_v37  ;;  %v2050_v37 = vperm.slane %v4813_v5, 6 }
 0x366   :  { %2586 = vst [vmem:[#allocation1 + $0x2] ss:$9 sm:$0xff] %v2030_v12  ;;  %v3342_v12 = vsel %vm849_vm4, 1.0, %v3560_v13 }
 0x367   :  { %2587 = vst [vmem:[#allocation1 + $0x3] ss:$9 sm:$0xff] %v2031_v42  ;;  %v2051_v42 = vperm.slane %v4813_v5, 7  ;;  %v1636_v51 = vadd.f32 %v3342_v12, %v1635_v58  ;;  %2909 = vperm.xlu0 %3503, %v4696_v62   ;;  %v5001_v62 = vpop.xlane.xlu1 %773  ;;  %v2059_v58 = vperm.slane %v4846_v31, 7 }
 0x368   :  { %2588 = vst [vmem:[#allocation1 + $0x4] ss:$9 sm:$0xff] %v2032_v43  ;;  %v3343_v43 = vsel %vm850_vm6, 1.0, %v3560_v13  ;;  %vm857_vm2 = vcmp.eq.s32.totalorder %v5001_v62, %v4063_v57 }
 0x369   :  { %2589 = vst [vmem:[#allocation1 + $0x5] ss:$9 sm:$0xff] %v2033_v27  ;;  %v4989_v27 = vpop.xlane.xlu2 %775 }
 0x36a   :  { %2590 = vst [vmem:[#allocation1 + $0x6] ss:$9 sm:$0xff] %v2034_v8  ;;  %v1637_v8 = vadd.f32 %v3343_v43, %v1636_v51  ;;  %vm858_vm3 = vcmp.eq.s32.totalorder %v4989_v27, %v4063_v57 }
 0x36b   :  { %2591 = vst [vmem:[#allocation1 + $0x7] ss:$9 sm:$0xff] %v2035_v29  ;;  %v4991_v29 = vpop.xlane.xlu0 %771 }
 0x36c   :  { %v1638_v5 = vadd.f32 %v3344_v59, %v1637_v8  ;;  %vm856_vm1 = vcmp.eq.s32.totalorder %v4991_v29, %v4063_v57 }
 0x36d   :  { %3413 = vmatmul.msk.f32.gmra.mxu3 %vm856_vm1, %v3559_v3 }
 0x36f   :  { %2918 = vperm.xlu0 %3503, %v4739_v26  }
 0x372   :  { %v4926_v17 = vld [vmem:[#allocation1] sm:$0xff] }
 0x373   :  { %2593 = vst [vmem:[#allocation1] ss:$9 sm:$0xff] %v2036_v40  ;;  %v532_v40 = vpop.f32.mrf.mxu2  ;;  %v5035_v38 = vpop.xlane.xlu0 %777 }
 0x374   :  { %2594 = vst [vmem:[#allocation1 + $0x1] ss:$9 sm:$0xff] %v2037_v20  ;;  %v608_v20 = vmul.f32 2.0, %v532_v40  ;;  %vm859_vm4 = vcmp.eq.s32.totalorder %v5035_v38, %v4063_v57 }
 0x375   :  { %2595 = vst [vmem:[#allocation1 + $0x2] ss:$9 sm:$0xff] %v2038_v21  ;;  %v3345_v21 = vsel %vm852_vm10, 1.0, %v3560_v13  ;;  %v3352_v8 = vsel %vm859_vm4, 1.0, %v3560_v13  ;;  %3414 = vmatmul.msk.f32.gmra.mxu3 %vm857_vm2, %v3559_v3 }
 0x376   :  { %2596 = vst [vmem:[#allocation1 + $0x3] ss:$9 sm:$0xff] %v2039_v7  ;;  %v1639_v54 = vadd.f32 %v3345_v21, %v1638_v5  ;;  %v2052_v7 = vperm.slane %v4846_v31, 0  ;;  %v2061_v21 = vperm.slane %v4899_v23, 1 }
 0x377   :  { %2597 = vst [vmem:[#allocation1 + $0x4] ss:$9 sm:$0xff] %v2040_v61  ;;  %2927 = vperm.xlu0 %3503, %v4833_v28   ;;  %v2060_v28 = vperm.slane %v4899_v23, 0 }
 0x378   :  { %2598 = vst [vmem:[#allocation1 + $0x5] ss:$9 sm:$0xff] %v2041_v14  ;;  %v2053_v14 = vperm.slane %v4846_v31, 1 }
 0x379   :  { %2599 = vst [vmem:[#allocation1 + $0x6] ss:$9 sm:$0xff] %v2042_v44  ;;  %v675_v44 = vsub.f32 %v4861_v25, %v608_v20 }
 0x37a   :  { %2600 = vst [vmem:[#allocation1 + $0x7] ss:$9 sm:$0xff] %v2043_v55  ;;  %v1640_v55 = vadd.f32 %v3346_v10, %v1639_v54 }
 0x37b   :  { %797 = vmin.index.xlane.f32.xlu1 %v675_v44  ;;  %v535_v53 = vpop.f32.mrf.mxu2  ;;  %v5073_v5 = vpop.xlane.xlu0 %783  ;;  %v2063_v44 = vperm.slane %v4899_v23, 3 }
 0x37c   :  { %v1641_v26 = vadd.f32 %v3347_v63, %v1640_v55  ;;  %v609_v10 = vmul.f32 2.0, %v535_v53  ;;  %vm862_vm7 = vcmp.eq.s32.totalorder %v5073_v5, %v4063_v57 }
 0x37d   :  { %v3355_v63 = vsel %vm862_vm7, 1.0, %v3560_v13  ;;  %3415 = vmatmul.msk.f32.gmra.mxu3 %vm858_vm3, %v3559_v3 }
 0x37e   :  { %v1642_v0 = vadd.f32 %v3348_v50, %v1641_v26  ;;  %v2066_v26 = vperm.slane %v4899_v23, 6 }
 0x37f   :  { %2936 = vperm.xlu0 %3503, %v4909_v4  }
 0x381   :  { %v4964_v45 = vld [vmem:[#allocation1] sm:$0xff] }
 0x382   :  { %2602 = vst [vmem:[#allocation1] ss:$9 sm:$0xff] %v2044_v1  ;;  %v2054_v1 = vperm.slane %v4846_v31, 2 }
 0x383   :  { %2603 = vst [vmem:[#allocation1 + $0x1] ss:$9 sm:$0xff] %v2045_v11  ;;  %v2055_v11 = vperm.slane %v4846_v31, 3 }
 0x384   :  { %2604 = vst [vmem:[#allocation1 + $0x2] ss:$9 sm:$0xff] %v2046_v9  ;;  %v2056_v9 = vperm.slane %v4846_v31, 4 }
 0x385   :  { %2605 = vst [vmem:[#allocation1 + $0x3] ss:$9 sm:$0xff] %v2047_v24  ;;  %v5033_v24 = vpop.xlane.xlu2 %781  ;;  %3416 = vmatmul.msk.f32.gmra.mxu3 %vm859_vm4, %v3559_v3  ;;  %vm3054_vm4 = vcmask 654912  }
 0x386   :  { %2606 = vst [vmem:[#allocation1 + $0x4] ss:$9 sm:$0xff] %v2048_v34  ;;  %v3349_v34 = vsel %vm856_vm1, 1.0, %v3560_v13  ;;  %vm861_vm6 = vcmp.eq.s32.totalorder %v5033_v24, %v4063_v57  ;;  %vm3042_vm1 = vcmask 458112  }
 0x387   :  { %2607 = vst [vmem:[#allocation1 + $0x5] ss:$9 sm:$0xff] %v2049_v33  ;;  %v2058_v33 = vperm.slane %v4846_v31, 6  ;;  %v1643_v12 = vadd.f32 %v3349_v34, %v1642_v0  ;;  %v3351_v31 = vsel %vm858_vm3, 1.0, %v3560_v13  ;;  %v3354_v4 = vsel %vm861_vm6, 1.0, %v3560_v13 }
 0x388   :  { %2608 = vst [vmem:[#allocation1 + $0x6] ss:$9 sm:$0xff] %v2050_v37  ;;  %v5045_v37 = vpop.xlane.xlu1 %779  ;;  %v2067_v0 = vperm.slane %v4899_v23, 7  ;;  %vm3050_vm3 = vcmask 589312  }
 0x389   :  { %2609 = vst [vmem:[#allocation1 + $0x7] ss:$9 sm:$0xff] %v2051_v42  ;;  %v3350_v42 = vsel %vm857_vm2, 1.0, %v3560_v13  ;;  %vm860_vm5 = vcmp.eq.s32.totalorder %v5045_v37, %v4063_v57  ;;  %vm3046_vm2 = vcmask 523712  }
 0x38a   :  { %v1644_v51 = vadd.f32 %v3350_v42, %v1643_v12  ;;  %v3353_v20 = vsel %vm860_vm5, 1.0, %v3560_v13  ;;  %v5126_v12 = vpop.xlane.xlu0 %789 }
 0x38b   :  { %vm865_vm10 = vcmp.eq.s32.totalorder %v5126_v12, %v4063_v57 }
 0x38c   :  { %v1645_v43 = vadd.f32 %v3351_v31, %v1644_v51  ;;  %v3358_v51 = vsel %vm865_vm10, 1.0, %v3560_v13 }
 0x38d   :  { %v5071_v40 = vpop.xlane.xlu2 %787  ;;  %3417 = vmatmul.msk.f32.gmra.mxu3 %vm860_vm5, %v3559_v3  ;;  %vm3058_vm5 = vcmask 720512  }
 0x38e   :  { %v1646_v59 = vadd.f32 %v3352_v8, %v1645_v43  ;;  %vm864_vm9 = vcmp.eq.s32.totalorder %v5071_v40, %v4063_v57  ;;  %v2069_v8 = vperm.slane %v4944_v15, 1 }
 0x390   :  { %v5012_v61 = vld [vmem:[#allocation1] sm:$0xff]  ;;  %v1647_v55 = vadd.f32 %v3353_v20, %v1646_v59  ;;  %v2070_v59 = vperm.slane %v4944_v15, 2 }
 0x391   :  { %2611 = vst [vmem:[#allocation1] ss:$9 sm:$0xff] %v2052_v7  ;;  %v2062_v7 = vperm.slane %v4899_v23, 2  ;;  %2945 = vperm.xlu0 %3503, %v5012_v61   ;;  %v2068_v61 = vperm.slane %v4944_v15, 0 }
 0x392   :  { %2612 = vst [vmem:[#allocation1 + $0x1] ss:$9 sm:$0xff] %v2053_v14  ;;  %v5083_v14 = vpop.xlane.xlu1 %785  ;;  %v1648_v50 = vadd.f32 %v3354_v4, %v1647_v55 }
 0x393   :  { %2613 = vst [vmem:[#allocation1 + $0x2] ss:$9 sm:$0xff] %v2054_v1  ;;  %v2064_v1 = vperm.slane %v4899_v23, 4  ;;  %vm863_vm8 = vcmp.eq.s32.totalorder %v5083_v14, %v4063_v57 }
 0x394   :  { %2614 = vst [vmem:[#allocation1 + $0x3] ss:$9 sm:$0xff] %v2055_v11  ;;  %v2065_v11 = vperm.slane %v4899_v23, 5  ;;  %v1649_v34 = vadd.f32 %v3355_v63, %v1648_v50  ;;  %2870 = vperm.xlu1 %3501, %v4422_v22   ;;  %v2073_v22 = vperm.slane %v4944_v15, 5  ;;  %v2077_v63 = vperm.slane %v4968_v16, 1 }
 0x395   :  { %2615 = vst [vmem:[#allocation1 + $0x4] ss:$9 sm:$0xff] %v2056_v9  ;;  %v676_v9 = vsub.f32 %v4861_v25, %v609_v10  ;;  %v1077_v25 = vpop.f32.mrf.mxu1  ;;  %v5124_v23 = vpop.xlane.xlu2 %793  ;;  %v2075_v10 = vperm.slane %v4944_v15, 7  ;;  %v2079_v50 = vperm.slane %v4968_v16, 3  ;;  %3418 = vmatmul.msk.f32.gmra.mxu3 %vm861_vm6, %v3559_v3  ;;  %vm3062_vm6 = vcmask 786112  }
 0x396   :  { %2616 = vst [vmem:[#allocation1 + $0x5] ss:$9 sm:$0xff] %v2057_v2  ;;  %v3356_v2 = vsel %vm863_vm8, 1.0, %v3560_v13 }
 0x397   :  { %2617 = vst [vmem:[#allocation1 + $0x6] ss:$9 sm:$0xff] %v2058_v33  ;;  %799 = vmin.index.xlane.f32.xlu2 %v676_v9  ;;  %v3357_v33 = vsel %vm864_vm9, 1.0, %v3560_v13  ;;  %v2080_v9 = vperm.slane %v4968_v16, 4 }
 0x398   :  { %2618 = vst [vmem:[#allocation1 + $0x7] ss:$9 sm:$0xff] %v2059_v58  ;;  %v1650_v58 = vadd.f32 %v3356_v2, %v1649_v34  ;;  %v2083_v34 = vperm.slane %v4968_v16, 7 }
 0x399   :  { %1687 = vst.msk [vmem:[%s5853_s3 + $0x98] sm:$0xff] %vm100_vm0, %v1077_v25 }
 0x39a   :  { %v1651_v42 = vadd.f32 %v3357_v33, %v1650_v58  ;;  %v5163_v55 = vpop.xlane.xlu1 %791  ;;  %v5204_v58 = vadd.s32 4294967288, %v4063_v57 }
 0x39c   :  { %v5140_v31 = vadd.f32 %v3358_v51, %v1651_v42  ;;  %2879 = vperm.xlu1 %3501, %v4502_v30   ;;  %v5173_v30 = vpop.xlane.xlu0 %801 }
 0x39d   :  { %v1080_v53 = vpop.f32.mrf.mxu1  ;;  %v5148_v20 = vpop.xlane.xlu2 %805  ;;  %3419 = vmatmul.msk.f32.gmra.mxu3 %vm862_vm7, %v3559_v3  ;;  %vm866_vm7 = vcmp.eq.s32.totalorder %v5163_v55, %v4063_v57 }
 0x39e   :  { %1688 = vst.msk [vmem:[%s5853_s3 + $0xa0] sm:$0xff] %vm100_vm0, %v1080_v53  ;;  %v5219_v53 = vadd.s32 4294967272, %v4063_v57 }
 0x39f   :  { %v5080_v54 = vld [vmem:[#allocation1] sm:$0xff] }
 0x3a0   :  { %2620 = vst [vmem:[#allocation1] ss:$9 sm:$0xff] %v2060_v28  ;;  %v2071_v28 = vperm.slane %v4944_v15, 3 }
 0x3a1   :  { %2621 = vst [vmem:[#allocation1 + $0x1] ss:$9 sm:$0xff] %v2061_v21  ;;  %v2072_v21 = vperm.slane %v4944_v15, 4 }
 0x3a2   :  { %2622 = vst [vmem:[#allocation1 + $0x2] ss:$9 sm:$0xff] %v2062_v7  ;;  %v2074_v7 = vperm.slane %v4944_v15, 6  ;;  %v2076_v15 = vperm.slane %v4968_v16, 0  ;;  %v5182_v2 = vpop.xlane.xlu1 %803 }
 0x3a3   :  { %2623 = vst [vmem:[#allocation1 + $0x3] ss:$9 sm:$0xff] %v2063_v44 }
 0x3a4   :  { %2624 = vst [vmem:[#allocation1 + $0x4] ss:$9 sm:$0xff] %v2064_v1  ;;  %2888 = vperm.xlu1 %3501, %v4569_v32   ;;  %v2081_v32 = vperm.slane %v4968_v16, 5  ;;  %v5191_v33 = vpop.xlane.xlu0 %807 }
 0x3a5   :  { %2625 = vst [vmem:[#allocation1 + $0x5] ss:$9 sm:$0xff] %v2065_v11  ;;  %v1083_v44 = vpop.f32.mrf.mxu1  ;;  %v2832_v1 = vpop.permute.xlu2 %2831  ;;  %v2078_v11 = vperm.slane %v4968_v16, 2  ;;  %3420 = vmatmul.msk.f32.gmra.mxu3 %vm863_vm8, %v3559_v3  ;;  %vm867_vm8 = vcmp.eq.s32.totalorder %v5124_v23, %v4063_v57 }
 0x3a6   :  { %2626 = vst [vmem:[#allocation1 + $0x6] ss:$9 sm:$0xff] %v2066_v26 }
 0x3a7   :  { %2627 = vst [vmem:[#allocation1 + $0x7] ss:$9 sm:$0xff] %v2067_v0 }
 0x3a8   :  { %1689 = vst.msk [vmem:[%s5853_s3 + $0xa8] sm:$0xff] %vm100_vm0, %v1083_v44 }
 0x3ac   :  { %2897 = vperm.xlu1 %3501, %v4641_v19   ;;  %v2084_v19 = vperm.slane %v4956_v35, 0 }
 0x3ad   :  { %v1086_v26 = vpop.f32.mrf.mxu1  ;;  %v2838_v0 = vpop.permute.xlu2 %2837  ;;  %3421 = vmatmul.msk.f32.gmra.mxu3 %vm864_vm9, %v3559_v3 }
 0x3ae   :  { %v5143_v43 = vld [vmem:[#allocation1] sm:$0xff]  ;;  %1690 = vst.msk [vmem:[%s5853_s3 + $0xb0] sm:$0xff] %vm100_vm0, %v1086_v26  ;;  %v2091_v26 = vperm.slane %v4956_v35, 7 }
 0x3af   :  { %2629 = vst [vmem:[#allocation1] ss:$9 sm:$0xff] %v2068_v61  ;;  %2876 = vperm.xlu2 %3502, %v4478_v49   ;;  %v2082_v49 = vperm.slane %v4968_v16, 6  ;;  %v2829_v16 = vpop.permute.xlu1 %2828 }
 0x3b0   :  { %2630 = vst [vmem:[#allocation1 + $0x1] ss:$9 sm:$0xff] %v2069_v8  ;;  %v3019_v42 = vperm.slane %v2829_v16, %v4063_v57  ;;  %v2086_v8 = vperm.slane %v4956_v35, 2 }
 0x3b1   :  { %2631 = vst [vmem:[#allocation1 + $0x2] ss:$9 sm:$0xff] %v2070_v59  ;;  %v3021_v59 = vperm.slane %v2832_v1, %v5204_v58  ;;  %v5232_v1 = vadd.s32 4294967264, %v4063_v57 }
 0x3b2   :  { %2632 = vst [vmem:[#allocation1 + $0x3] ss:$9 sm:$0xff] %v2071_v28  ;;  %v2835_v28 = vpop.permute.xlu0 %2834 }
 0x3b3   :  { %2633 = vst [vmem:[#allocation1 + $0x4] ss:$9 sm:$0xff] %v2072_v21  ;;  %v2087_v21 = vperm.slane %v4956_v35, 3 }
 0x3b4   :  { %2634 = vst [vmem:[#allocation1 + $0x5] ss:$9 sm:$0xff] %v2073_v22  ;;  %2906 = vperm.xlu1 %3501, %v4692_v46   ;;  %v2088_v22 = vperm.slane %v4956_v35, 4  ;;  %v5224_v46 = vadd.s32 4294967280, %v4063_v57 }
 0x3b5   :  { %2635 = vst [vmem:[#allocation1 + $0x6] ss:$9 sm:$0xff] %v2074_v7  ;;  %v1089_v25 = vpop.f32.mrf.mxu1  ;;  %v2844_v61 = vpop.permute.xlu2 %2843  ;;  %v5228_v7 = vadd.s32 4294967256, %v4063_v57  ;;  %3422 = vmatmul.msk.f32.gmra.mxu3 %vm865_vm10, %v3559_v3  ;;  %vm3066_vm10 = vcmask 851712  }
 0x3b6   :  { %2636 = vst [vmem:[#allocation1 + $0x7] ss:$9 sm:$0xff] %v2075_v10  ;;  %v3023_v10 = vsel %vm3022_vm11, %v3021_v59, %v3019_v42 }
 0x3b7   :  { %2885 = vperm.xlu2 %3502, %v4548_v18   ;;  %1691 = vst.msk [vmem:[%s5853_s3 + $0xb8] sm:$0xff] %vm100_vm0, %v1089_v25  ;;  %v2085_v18 = vperm.slane %v4956_v35, 1 }
 0x3bc   :  { %2915 = vperm.xlu1 %3501, %v4723_v60  }
 0x3bd   :  { %v2637_v4 = vld [vmem:[#allocation1] sm:$0xff]  ;;  %v1092_v44 = vpop.f32.mrf.mxu1  ;;  %v2850_v25 = vpop.permute.xlu2 %2849  ;;  %3423 = vmatmul.msk.f32.gmra.mxu3 %vm866_vm7, %v3559_v3 }
 0x3be   :  { %2638 = vst [vmem:[#allocation1] ss:$9 sm:$0xff] %v2076_v15  ;;  %2954 = vperm.xlu0 %3503, %v2637_v4   ;;  %v2089_v15 = vperm.slane %v4956_v35, 5  ;;  %v3025_v4 = vperm.slane %v2835_v28, %v5224_v46  ;;  %v2094_v28 = vperm.slane %v4991_v29, 2 }
 0x3bf   :  { %2639 = vst [vmem:[#allocation1 + $0x1] ss:$9 sm:$0xff] %v2077_v63  ;;  %2894 = vperm.xlu2 %3502, %v4614_v41   ;;  %v2841_v63 = vpop.permute.xlu1 %2840  ;;  %v2090_v41 = vperm.slane %v4956_v35, 6 }
 0x3c0   :  { %2640 = vst [vmem:[#allocation1 + $0x2] ss:$9 sm:$0xff] %v2078_v11  ;;  %v3029_v11 = vperm.slane %v2838_v0, %v5219_v53 }
 0x3c1   :  { %2641 = vst [vmem:[#allocation1 + $0x3] ss:$9 sm:$0xff] %v2079_v50  ;;  %v3033_v50 = vperm.slane %v2841_v63, %v5232_v1 }
 0x3c2   :  { %2642 = vst [vmem:[#allocation1 + $0x4] ss:$9 sm:$0xff] %v2080_v9  ;;  %v3027_v9 = vsel %vm3026_vm12, %v3025_v4, %v3023_v10  ;;  %v2096_v10 = vperm.slane %v4991_v29, 4  ;;  %v5287_v4 = vadd.s32 4294967216, %v4063_v57 }
 0x3c3   :  { %2643 = vst [vmem:[#allocation1 + $0x5] ss:$9 sm:$0xff] %v2081_v32  ;;  %v3037_v32 = vperm.slane %v2844_v61, %v5228_v7 }
 0x3c4   :  { %2644 = vst [vmem:[#allocation1 + $0x6] ss:$9 sm:$0xff] %v2082_v49  ;;  %v3031_v49 = vsel %vm3030_vm13, %v3029_v11, %v3027_v9  ;;  %2924 = vperm.xlu1 %3501, %v4799_v48   ;;  %v2856_v48 = vpop.permute.xlu0 %2855  ;;  %v2098_v11 = vperm.slane %v4991_v29, 6  ;;  %v2099_v9 = vperm.slane %v4991_v29, 7 }
 0x3c5   :  { %2645 = vst [vmem:[#allocation1 + $0x7] ss:$9 sm:$0xff] %v2083_v34  ;;  %v3035_v0 = vsel %vm3034_vm14, %v3033_v50, %v3031_v49  ;;  %v5255_v34 = vadd.s32 4294967240, %v4063_v57  ;;  %v1095_v16 = vpop.f32.mrf.mxu1  ;;  %v2859_v50 = vpop.permute.xlu2 %2858  ;;  %3424 = vmatmul.msk.f32.gmra.mxu3 %vm867_vm8, %v3559_v3 }
 0x3c6   :  { %1692 = vst.msk [vmem:[%s5853_s3 + $0xc0] sm:$0xff] %vm100_vm0, %v1092_v44  ;;  %v3039_v35 = vsel %vm3038_vm15, %v3037_v32, %v3035_v0  ;;  %v5282_v44 = vadd.s32 4294967224, %v4063_v57  ;;  %v3057_v49 = vperm.slane %v2859_v50, %v5287_v4  ;;  %v2113_v50 = vperm.slane %v4989_v27, 5 }
 0x3c7   :  { %2903 = vperm.xlu2 %3502, %v4685_v36   ;;  %1693 = vst.msk [vmem:[%s5853_s3 + $0xc8] sm:$0xff] %vm100_vm0, %v1095_v16  ;;  %v2847_v60 = vpop.permute.xlu1 %2846  ;;  %v3045_v36 = vperm.slane %v2850_v25, %v5255_v34  ;;  %v5311_v16 = vadd.s32 4294967208, %v4063_v57 }
 0x3c8   :  { %v3053_v32 = vperm.slane %v2856_v48, %v5282_v44 }
 0x3cc   :  { %v5214_v51 = vld [vmem:[#allocation1] sm:$0xff]  ;;  %2933 = vperm.xlu1 %3501, %v4881_v47  }
 0x3cd   :  { %2647 = vst [vmem:[#allocation1] ss:$9 sm:$0xff] %v2084_v19  ;;  %v5259_v19 = vadd.s32 4294967248, %v4063_v57  ;;  %v1098_v63 = vpop.f32.mrf.mxu1 }
 0x3ce   :  { %2648 = vst [vmem:[#allocation1 + $0x1] ss:$9 sm:$0xff] %v2085_v18  ;;  %v2092_v18 = vperm.slane %v4991_v29, 0 }
 0x3cf   :  { %2649 = vst [vmem:[#allocation1 + $0x2] ss:$9 sm:$0xff] %v2086_v8  ;;  %v3041_v42 = vperm.slane %v2847_v60, %v5259_v19  ;;  %v2093_v8 = vperm.slane %v4991_v29, 1  ;;  %2912 = vperm.xlu2 %3502, %v4703_v52   ;;  %v2100_v60 = vperm.slane %v5001_v62, 0 }
 0x3d0   :  { %2650 = vst [vmem:[#allocation1 + $0x3] ss:$9 sm:$0xff] %v2087_v21 }
 0x3d1   :  { %2651 = vst [vmem:[#allocation1 + $0x4] ss:$9 sm:$0xff] %v2088_v22  ;;  %v3043_v59 = vsel %vm3042_vm1, %v3041_v42, %v3039_v35  ;;  %v2095_v22 = vperm.slane %v4991_v29, 3 }
 0x3d2   :  { %2652 = vst [vmem:[#allocation1 + $0x5] ss:$9 sm:$0xff] %v2089_v15  ;;  %v3047_v21 = vsel %vm3046_vm2, %v3045_v36, %v3043_v59  ;;  %v2097_v15 = vperm.slane %v4991_v29, 5  ;;  %v2102_v36 = vperm.slane %v5001_v62, 2 }
 0x3d3   :  { %2653 = vst [vmem:[#allocation1 + $0x6] ss:$9 sm:$0xff] %v2090_v41  ;;  %v5290_v41 = vadd.s32 4294967232, %v4063_v57 }
 0x3d4   :  { %2654 = vst [vmem:[#allocation1 + $0x7] ss:$9 sm:$0xff] %v2091_v26  ;;  %v2853_v26 = vpop.permute.xlu1 %2852  ;;  %2942 = vperm.xlu1 %3501, %v4964_v45   ;;  %v2107_v45 = vperm.slane %v5001_v62, 7 }
 0x3d5   :  { %v3049_v52 = vperm.slane %v2853_v26, %v5290_v41  ;;  %1694 = vst.msk [vmem:[%s5853_s3 + $0xd0] sm:$0xff] %vm100_vm0, %v1098_v63  ;;  %v1101_v25 = vpop.f32.mrf.mxu1  ;;  %v2111_v63 = vperm.slane %v4989_v27, 3  ;;  %v1131_v26 = vpop.f32.mrf.mxu3 }
 0x3d6   :  { %1695 = vst.msk [vmem:[%s5853_s3 + $0xd8] sm:$0xff] %vm100_vm0, %v1101_v25 }
 0x3d7   :  { %v3051_v0 = vsel %vm3050_vm3, %v3049_v52, %v3047_v21  ;;  %2921 = vperm.xlu2 %3502, %v4775_v6   ;;  %v2101_v6 = vperm.slane %v5001_v62, 1  ;;  %v2105_v21 = vperm.slane %v5001_v62, 5  ;;  %v2114_v52 = vperm.slane %v4989_v27, 6  ;;  %1705 = vst.msk [vmem:[%s5853_s3 + $0x128] sm:$0xff] %vm100_vm0, %v1131_v26 }
 0x3d8   :  { %v3055_v29 = vsel %vm3054_vm4, %v3053_v32, %v3051_v0  ;;  %v5370_v32 = vpop.xlane.xlu0 %795 }
 0x3d9   :  { %v3059_v35 = vsel %vm3058_vm5, %v3057_v49, %v3055_v29  ;;  %v2115_v49 = vperm.slane %v4989_v27, 7  ;;  %vm868_vm9 = vcmp.eq.s32.totalorder %v5370_v32, %v4063_v57 }
 0x3da   :  { %3425 = vmatmul.msk.f32.gmra.mxu3 %vm868_vm9, %v3559_v3 }
 0x3db   :  { %v5272_v61 = vld [vmem:[#allocation1] sm:$0xff] }
 0x3dc   :  { %2656 = vst [vmem:[#allocation1] ss:$9 sm:$0xff] %v2092_v18  ;;  %v2862_v47 = vpop.permute.xlu1 %2861  ;;  %2951 = vperm.xlu1 %3501, %v5143_v43   ;;  %v3359_v43 = vsel %vm866_vm7, 1.0, %v3560_v13 }
 0x3dd   :  { %2657 = vst [vmem:[#allocation1 + $0x1] ss:$9 sm:$0xff] %v2093_v8  ;;  %v3061_v18 = vperm.slane %v2862_v47, %v5311_v16  ;;  %v2103_v8 = vperm.slane %v5001_v62, 3  ;;  %v1134_v29 = vpop.f32.mrf.mxu3 }
 0x3de   :  { %2658 = vst [vmem:[#allocation1 + $0x2] ss:$9 sm:$0xff] %v2094_v28  ;;  %v2104_v28 = vperm.slane %v5001_v62, 4 }
 0x3df   :  { %2659 = vst [vmem:[#allocation1 + $0x3] ss:$9 sm:$0xff] %v2095_v22  ;;  %v5328_v59 = vsel %vm3062_vm6, %v3061_v18, %v3059_v35  ;;  %2930 = vperm.xlu2 %3502, %v4843_v39   ;;  %v2106_v22 = vperm.slane %v5001_v62, 6  ;;  %v2108_v62 = vperm.slane %v4989_v27, 0  ;;  %v2116_v35 = vperm.slane %v5035_v38, 0 }
 0x3e0   :  { %2660 = vst [vmem:[#allocation1 + $0x4] ss:$9 sm:$0xff] %v2096_v10  ;;  %v1104_v10 = vpop.f32.mrf.mxu1  ;;  %v2121_v18 = vperm.slane %v5035_v38, 5 }
 0x3e1   :  { %2661 = vst [vmem:[#allocation1 + $0x5] ss:$9 sm:$0xff] %v2097_v15  ;;  %v2109_v15 = vperm.slane %v4989_v27, 1 }
 0x3e2   :  { %2662 = vst [vmem:[#allocation1 + $0x6] ss:$9 sm:$0xff] %v2098_v11  ;;  %v2112_v11 = vperm.slane %v4989_v27, 4 }
 0x3e3   :  { %2663 = vst [vmem:[#allocation1 + $0x7] ss:$9 sm:$0xff] %v2099_v9  ;;  %v1653_v9 = vadd.f32 %v3359_v43, %v5140_v31 }
 0x3e4   :  { %1696 = vst.msk [vmem:[%s5853_s3 + $0xe0] sm:$0xff] %vm100_vm0, %v1104_v10  ;;  %2960 = vperm.xlu1 %3501, %v5272_v61   ;;  %v3360_v61 = vsel %vm867_vm8, 1.0, %v3560_v13  ;;  %v5411_v10 = vadd.s32 4294967192, %v4063_v57  ;;  %vm5856_vm8 = vcmask 917312  }
 0x3e5   :  { %v1654_v31 = vadd.f32 %v3360_v61, %v1653_v9  ;;  %1706 = vst.msk [vmem:[%s5853_s3 + $0x130] sm:$0xff] %vm100_vm0, %v1134_v29  ;;  %v2126_v61 = vperm.slane %v5045_v37, 2 }
 0x3e7   :  { %2939 = vperm.xlu2 %3502, %v4926_v17   ;;  %v2110_v17 = vperm.slane %v4989_v27, 2 }
 0x3e8   :  { %v1107_v39 = vpop.f32.mrf.mxu1 }
 0x3e9   :  { %1697 = vst.msk [vmem:[%s5853_s3 + $0xe8] sm:$0xff] %vm100_vm0, %v1107_v39  ;;  %v2865_v39 = vpop.permute.xlu0 %2864 }
 0x3ea   :  { %v2664_v42 = vld [vmem:[#allocation1] sm:$0xff] }
 0x3eb   :  { %2665 = vst [vmem:[#allocation1] ss:$9 sm:$0xff] %v2100_v60  ;;  %2963 = vperm.xlu0 %3503, %v2664_v42   ;;  %v2117_v60 = vperm.slane %v5035_v38, 1  ;;  %v2118_v42 = vperm.slane %v5035_v38, 2 }
 0x3ec   :  { %2666 = vst [vmem:[#allocation1 + $0x1] ss:$9 sm:$0xff] %v2101_v6  ;;  %v2119_v6 = vperm.slane %v5035_v38, 3 }
 0x3ed   :  { %2667 = vst [vmem:[#allocation1 + $0x2] ss:$9 sm:$0xff] %v2102_v36  ;;  %v2122_v36 = vperm.slane %v5035_v38, 6 }
 0x3ee   :  { %2668 = vst [vmem:[#allocation1 + $0x3] ss:$9 sm:$0xff] %v2103_v8  ;;  %v1137_v8 = vpop.f32.mrf.mxu3 }
 0x3ef   :  { %2669 = vst [vmem:[#allocation1 + $0x4] ss:$9 sm:$0xff] %v2104_v28  ;;  %2948 = vperm.xlu2 %3502, %v5080_v54   ;;  %v3361_v54 = vsel %vm868_vm9, 1.0, %v3560_v13  ;;  %v2123_v28 = vperm.slane %v5035_v38, 7 }
 0x3f0   :  { %2670 = vst [vmem:[#allocation1 + $0x5] ss:$9 sm:$0xff] %v2105_v21  ;;  %v1110_v0 = vpop.f32.mrf.mxu1  ;;  %v1655_v27 = vadd.f32 %v3361_v54, %v1654_v31  ;;  %v2129_v31 = vperm.slane %v5045_v37, 5 }
 0x3f1   :  { %2671 = vst [vmem:[#allocation1 + $0x6] ss:$9 sm:$0xff] %v2106_v22  ;;  %v5408_v22 = vadd.s32 4294967200, %v4063_v57 }
 0x3f2   :  { %2672 = vst [vmem:[#allocation1 + $0x7] ss:$9 sm:$0xff] %v2107_v45  ;;  %v2868_v45 = vpop.permute.xlu2 %2867 }
 0x3f3   :  { %1698 = vst.msk [vmem:[%s5853_s3 + $0xf0] sm:$0xff] %vm100_vm0, %v1110_v0  ;;  %v2128_v0 = vperm.slane %v5045_v37, 4 }
 0x3f4   :  { %1707 = vst.msk [vmem:[%s5853_s3 + $0x138] sm:$0xff] %vm100_vm0, %v1137_v8 }
 0x3f7   :  { %2957 = vperm.xlu2 %3502, %v5214_v51   ;;  %v2120_v51 = vperm.slane %v5035_v38, 4  ;;  %v3065_v38 = vperm.slane %v2865_v39, %v5408_v22  ;;  %v5488_v39 = vpop.permute.xlu0 %2873 }
 0x3f8   :  { %v1113_v25 = vpop.f32.mrf.mxu1 }
 0x3f9   :  { %v2673_v48 = vld [vmem:[#allocation1] sm:$0xff]  ;;  %1699 = vst.msk [vmem:[%s5853_s3 + $0xf8] sm:$0xff] %vm100_vm0, %v1113_v25  ;;  %v3067_v43 = vsel %vm3066_vm10, %v3065_v38, %v5328_v59  ;;  %v2127_v59 = vperm.slane %v5045_v37, 3  ;;  %v2136_v38 = vperm.slane %v5033_v24, 4 }
 0x3fa   :  { %2674 = vst [vmem:[#allocation1] ss:$9 sm:$0xff] %v2108_v62  ;;  %v5422_v62 = vpop.xlane.xlu1 %797 }
 0x3fb   :  { %2675 = vst [vmem:[#allocation1 + $0x1] ss:$9 sm:$0xff] %v2109_v15  ;;  %v3069_v15 = vperm.slane %v2868_v45, %v5411_v10  ;;  %vm869_vm7 = vcmp.eq.s32.totalorder %v5422_v62, %v4063_v57  ;;  %v2135_v45 = vperm.slane %v5033_v24, 3 }
 0x3fc   :  { %2676 = vst [vmem:[#allocation1 + $0x2] ss:$9 sm:$0xff] %v2110_v17  ;;  %v2124_v17 = vperm.slane %v5045_v37, 0  ;;  %3426 = vmatmul.msk.f32.gmra.mxu3 %vm869_vm7, %v3559_v3 }
 0x3fd   :  { %2677 = vst [vmem:[#allocation1 + $0x3] ss:$9 sm:$0xff] %v2111_v63  ;;  %v3362_v63 = vsel %vm869_vm7, 1.0, %v3560_v13  ;;  %vm871_vm7 = vcmp.eq.s32.totalorder %v5173_v30, %v4063_v57 }
 0x3fe   :  { %2678 = vst [vmem:[#allocation1 + $0x4] ss:$9 sm:$0xff] %v2112_v11  ;;  %v1656_v9 = vadd.f32 %v3362_v63, %v1655_v27  ;;  %v2130_v27 = vperm.slane %v5045_v37, 6 }
 0x3ff   :  { %2679 = vst [vmem:[#allocation1 + $0x5] ss:$9 sm:$0xff] %v2113_v50  ;;  %2966 = vperm.xlu2 %3502, %v2673_v48   ;;  %v1140_v48 = vpop.f32.mrf.mxu3  ;;  %v2125_v50 = vperm.slane %v5045_v37, 1 }
 0x400   :  { %2680 = vst [vmem:[#allocation1 + $0x6] ss:$9 sm:$0xff] %v2114_v52  ;;  %v1116_v21 = vpop.f32.mrf.mxu1  ;;  %v3071_v52 = vsel %vm5856_vm8, %v3069_v15, %v3067_v43  ;;  %vm872_vm8 = vcmp.eq.s32.totalorder %v5182_v2, %v4063_v57  ;;  %v2138_v43 = vperm.slane %v5033_v24, 6 }
 0x401   :  { %2681 = vst [vmem:[#allocation1 + $0x7] ss:$9 sm:$0xff] %v2115_v49 }
 0x402   :  { %1700 = vst.msk [vmem:[%s5853_s3 + $0x100] sm:$0xff] %vm100_vm0, %v1116_v21 }
 0x403   :  { %1708 = vst.msk [vmem:[%s5853_s3 + $0x140] sm:$0xff] %vm100_vm0, %v1140_v48  ;;  %v2137_v48 = vperm.slane %v5033_v24, 5 }
 0x406   :  { %v2871_v63 = vpop.permute.xlu1 %2870 }
 0x407   :  { %v1143_v25 = vpop.f32.mrf.mxu3 }
 0x408   :  { %v2682_v47 = vld [vmem:[#allocation1] sm:$0xff]  ;;  %v1119_v26 = vpop.f32.mrf.mxu1  ;;  %1709 = vst.msk [vmem:[%s5853_s3 + $0x148] sm:$0xff] %vm100_vm0, %v1143_v25 }
 0x409   :  { %2683 = vst [vmem:[#allocation1] ss:$9 sm:$0xff] %v2116_v35  ;;  %2969 = vperm.xlu1 %3501, %v2682_v47   ;;  %v2131_v35 = vperm.slane %v5045_v37, 7  ;;  %v3364_v47 = vsel %vm871_vm7, 1.0, %v3560_v13 }
 0x40a   :  { %2684 = vst [vmem:[#allocation1 + $0x1] ss:$9 sm:$0xff] %v2117_v60  ;;  %v5440_v49 = vpop.xlane.xlu2 %799 }
 0x40b   :  { %2685 = vst [vmem:[#allocation1 + $0x2] ss:$9 sm:$0xff] %v2118_v42  ;;  %vm870_vm9 = vcmp.eq.s32.totalorder %v5440_v49, %v4063_v57 }
 0x40c   :  { %2686 = vst [vmem:[#allocation1 + $0x3] ss:$9 sm:$0xff] %v2119_v6  ;;  %v3363_v54 = vsel %vm870_vm9, 1.0, %v3560_v13  ;;  %3427 = vmatmul.msk.f32.gmra.mxu3 %vm870_vm9, %v3559_v3  ;;  %v3365_v6 = vsel %vm872_vm8, 1.0, %v3560_v13  ;;  %vm3074_vm9 = vcmask 982912  }
 0x40d   :  { %2687 = vst [vmem:[#allocation1 + $0x4] ss:$9 sm:$0xff] %v2120_v51  ;;  %v1657_v29 = vadd.f32 %v3363_v54, %v1656_v9  ;;  %v2132_v51 = vperm.slane %v5033_v24, 0 }
 0x40e   :  { %2688 = vst [vmem:[#allocation1 + $0x5] ss:$9 sm:$0xff] %v2121_v18 }
 0x40f   :  { %2689 = vst [vmem:[#allocation1 + $0x6] ss:$9 sm:$0xff] %v2122_v36  ;;  %v1658_v60 = vadd.f32 %v3364_v47, %v1657_v29  ;;  %v1146_v18 = vpop.f32.mrf.mxu3  ;;  %v2133_v36 = vperm.slane %v5033_v24, 1  ;;  %v2141_v29 = vperm.slane %v5073_v5, 1  ;;  %v2142_v47 = vperm.slane %v5073_v5, 2 }
 0x410   :  { %2690 = vst [vmem:[#allocation1 + $0x7] ss:$9 sm:$0xff] %v2123_v28  ;;  %v1122_v42 = vpop.f32.mrf.mxu1  ;;  %v2134_v28 = vperm.slane %v5033_v24, 2 }
 0x411   :  { %1701 = vst.msk [vmem:[%s5853_s3 + $0x108] sm:$0xff] %vm100_vm0, %v1119_v26  ;;  %v5466_v37 = vadd.f32 %v3365_v6, %v1658_v60  ;;  %v2143_v6 = vperm.slane %v5073_v5, 3 }
 0x412   :  { %1702 = vst.msk [vmem:[%s5853_s3 + $0x110] sm:$0xff] %vm100_vm0, %v1122_v42  ;;  %v2877_v15 = vpop.permute.xlu2 %2876 }
 0x413   :  { %1710 = vst.msk [vmem:[%s5853_s3 + $0x150] sm:$0xff] %vm100_vm0, %v1146_v18  ;;  %v2144_v18 = vperm.slane %v5073_v5, 4 }
 0x414   :  { %3428 = vmatmul.msk.f32.gmra.mxu3 %vm871_vm7, %v3559_v3  ;;  %vm874_vm7 = vcmp.eq.s32.totalorder %v5191_v33, %v4063_v57 }
 0x417   :  { %v2691_v11 = vld [vmem:[#allocation1] sm:$0xff]  ;;  %v1149_v26 = vpop.f32.mrf.mxu3 }
 0x418   :  { %2692 = vst [vmem:[#allocation1] ss:$9 sm:$0xff] %v2124_v17  ;;  %2972 = vperm.xlu0 %3503, %v2691_v11   ;;  %v1125_v21 = vpop.f32.mrf.mxu1  ;;  %v5493_v17 = vadd.s32 4294967184, %v4063_v57  ;;  %v2139_v11 = vperm.slane %v5033_v24, 7 }
 0x419   :  { %2693 = vst [vmem:[#allocation1 + $0x1] ss:$9 sm:$0xff] %v2125_v50 }
 0x41a   :  { %2694 = vst [vmem:[#allocation1 + $0x2] ss:$9 sm:$0xff] %v2126_v61  ;;  %v3073_v50 = vperm.slane %v2871_v63, %v5493_v17  ;;  %v2886_v61 = vpop.permute.xlu2 %2885  ;;  %v2148_v63 = vperm.slane %v5083_v14, 0 }
 0x41b   :  { %2695 = vst [vmem:[#allocation1 + $0x3] ss:$9 sm:$0xff] %v2127_v59  ;;  %v2880_v59 = vpop.permute.xlu1 %2879  ;;  %v3085_v60 = vperm.slane %v2886_v61, %v5219_v53  ;;  %v2151_v61 = vperm.slane %v5083_v14, 3 }
 0x41c   :  { %2696 = vst [vmem:[#allocation1 + $0x4] ss:$9 sm:$0xff] %v2128_v0  ;;  %v5499_v9 = vsel %vm3074_vm9, %v3073_v50, %v3071_v52  ;;  %3429 = vmatmul.msk.f32.gmra.mxu3 %vm872_vm8, %v3559_v3  ;;  %v2883_v52 = vpop.permute.xlu0 %2882  ;;  %v2140_v0 = vperm.slane %v5073_v5, 0  ;;  %v3081_v54 = vperm.slane %v2880_v59, %v5204_v58  ;;  %vm873_vm8 = vcmp.eq.s32.totalorder %v5148_v20, %v4063_v57 }
 0x41d   :  { %2697 = vst [vmem:[#allocation1 + $0x5] ss:$9 sm:$0xff] %v2129_v31  ;;  %v3080_v31 = vperm.slane %v2877_v15, %v4063_v57  ;;  %v2152_v59 = vperm.slane %v5083_v14, 4 }
 0x41e   :  { %2698 = vst [vmem:[#allocation1 + $0x6] ss:$9 sm:$0xff] %v2130_v27 }
 0x41f   :  { %2699 = vst [vmem:[#allocation1 + $0x7] ss:$9 sm:$0xff] %v2131_v35  ;;  %v3083_v35 = vperm.slane %v2883_v52, %v5224_v46  ;;  %v1152_v25 = vpop.f32.mrf.mxu3  ;;  %v3082_v42 = vsel %vm3022_vm11, %v3081_v54, %v3080_v31  ;;  %v2153_v31 = vperm.slane %v5083_v14, 5  ;;  %v2154_v54 = vperm.slane %v5083_v14, 6 }
 0x420   :  { %1703 = vst.msk [vmem:[%s5853_s3 + $0x118] sm:$0xff] %vm100_vm0, %v1125_v21  ;;  %v1128_v24 = vpop.f32.mrf.mxu1  ;;  %v2147_v21 = vperm.slane %v5073_v5, 7 }
 0x421   :  { %1711 = vst.msk [vmem:[%s5853_s3 + $0x158] sm:$0xff] %vm100_vm0, %v1149_v26  ;;  %v2149_v26 = vperm.slane %v5083_v14, 1 }
 0x422   :  { %1704 = vst.msk [vmem:[%s5853_s3 + $0x120] sm:$0xff] %vm100_vm0, %v1128_v24  ;;  %v2150_v24 = vperm.slane %v5083_v14, 2 }
 0x423   :  { %1712 = vst.msk [vmem:[%s5853_s3 + $0x160] sm:$0xff] %vm100_vm0, %v1152_v25 }
 0x424   :  { %3430 = vmatmul.msk.f32.gmra.mxu3 %vm873_vm8, %v3559_v3  ;;  %v2892_v15 = vpop.permute.xlu0 %2891 }
 0x426   :  { %v2700_v8 = vld [vmem:[#allocation1] sm:$0xff] }
 0x427   :  { %2701 = vst [vmem:[#allocation1] ss:$9 sm:$0xff] %v2132_v51  ;;  %2975 = vperm.xlu2 %3502, %v2700_v8   ;;  %v3084_v51 = vsel %vm3026_vm12, %v3083_v35, %v3082_v42  ;;  %v2145_v8 = vperm.slane %v5073_v5, 5 }
 0x428   :  { %2702 = vst [vmem:[#allocation1 + $0x1] ss:$9 sm:$0xff] %v2133_v36  ;;  %v3086_v36 = vsel %vm3030_vm13, %v3085_v60, %v3084_v51 }
 0x429   :  { %2703 = vst [vmem:[#allocation1 + $0x2] ss:$9 sm:$0xff] %v2134_v28  ;;  %v2146_v28 = vperm.slane %v5073_v5, 6 }
 0x42a   :  { %2704 = vst [vmem:[#allocation1 + $0x3] ss:$9 sm:$0xff] %v2135_v45  ;;  %v1155_v45 = vpop.f32.mrf.mxu3 }
 0x42b   :  { %2705 = vst [vmem:[#allocation1 + $0x4] ss:$9 sm:$0xff] %v2136_v38  ;;  %v2889_v38 = vpop.permute.xlu1 %2888 }
 0x42c   :  { %2706 = vst [vmem:[#allocation1 + $0x5] ss:$9 sm:$0xff] %v2137_v48  ;;  %3431 = vmatmul.msk.f32.gmra.mxu3 %vm874_vm7, %v3559_v3  ;;  %v3087_v5 = vperm.slane %v2889_v38, %v5232_v1  ;;  %v3089_v48 = vperm.slane %v2892_v15, %v5228_v7  ;;  %v2161_v15 = vperm.slane %v5071_v40, 5 }
 0x42d   :  { %2707 = vst [vmem:[#allocation1 + $0x6] ss:$9 sm:$0xff] %v2138_v43  ;;  %v2895_v43 = vpop.permute.xlu2 %2894 }
 0x42e   :  { %2708 = vst [vmem:[#allocation1 + $0x7] ss:$9 sm:$0xff] %v2139_v11  ;;  %v3088_v11 = vsel %vm3034_vm14, %v3087_v5, %v3086_v36  ;;  %v3091_v52 = vperm.slane %v2895_v43, %v5259_v19  ;;  %v2162_v5 = vperm.slane %v5071_v40, 6  ;;  %v2163_v43 = vperm.slane %v5071_v40, 7 }
 0x42f   :  { %1713 = vst.msk [vmem:[%s5853_s3 + $0x168] sm:$0xff] %vm100_vm0, %v1155_v45  ;;  %v3090_v3 = vsel %vm3038_vm15, %v3089_v48, %v3088_v11  ;;  %v2160_v45 = vperm.slane %v5071_v40, 4 }
 0x432   :  { %v1158_v25 = vpop.f32.mrf.mxu3 }
 0x433   :  { %v2898_v35 = vpop.permute.xlu1 %2897  ;;  %1714 = vst.msk [vmem:[%s5853_s3 + $0x170] sm:$0xff] %vm100_vm0, %v1158_v25  ;;  %v2168_v25 = vperm.slane %v5126_v12, 4 }
 0x435   :  { %v2709_v27 = vld [vmem:[#allocation1] sm:$0xff]  ;;  %v2904_v51 = vpop.permute.xlu2 %2903 }
 0x436   :  { %2710 = vst [vmem:[#allocation1] ss:$9 sm:$0xff] %v2140_v0  ;;  %2978 = vperm.xlu1 %3501, %v2709_v27   ;;  %v3092_v0 = vsel %vm3042_vm1, %v3091_v52, %v3090_v3  ;;  %v2901_v27 = vpop.permute.xlu0 %2900 }
 0x437   :  { %2711 = vst [vmem:[#allocation1 + $0x1] ss:$9 sm:$0xff] %v2141_v29  ;;  %v2155_v29 = vperm.slane %v5083_v14, 7  ;;  %v3095_v60 = vperm.slane %v2901_v27, %v5290_v41  ;;  %v2156_v14 = vperm.slane %v5071_v40, 0 }
 0x438   :  { %2712 = vst [vmem:[#allocation1 + $0x2] ss:$9 sm:$0xff] %v2142_v47  ;;  %v3093_v47 = vperm.slane %v2898_v35, %v5255_v34  ;;  %v2167_v35 = vperm.slane %v5126_v12, 3 }
 0x439   :  { %2713 = vst [vmem:[#allocation1 + $0x3] ss:$9 sm:$0xff] %v2143_v6 }
 0x43a   :  { %2714 = vst [vmem:[#allocation1 + $0x4] ss:$9 sm:$0xff] %v2144_v18  ;;  %v3094_v42 = vsel %vm3046_vm2, %v3093_v47, %v3092_v0  ;;  %v2157_v18 = vperm.slane %v5071_v40, 1  ;;  %v1161_v11 = vpop.f32.mrf.mxu3  ;;  %v2165_v0 = vperm.slane %v5126_v12, 1 }
 0x43b   :  { %2715 = vst [vmem:[#allocation1 + $0x5] ss:$9 sm:$0xff] %v2145_v8  ;;  %v3096_v6 = vsel %vm3050_vm3, %v3095_v60, %v3094_v42  ;;  %v2158_v8 = vperm.slane %v5071_v40, 2  ;;  %v2169_v60 = vperm.slane %v5126_v12, 5  ;;  %v2170_v42 = vperm.slane %v5126_v12, 6 }
 0x43c   :  { %2716 = vst [vmem:[#allocation1 + $0x6] ss:$9 sm:$0xff] %v2146_v28  ;;  %v3097_v28 = vperm.slane %v2904_v51, %v5282_v44  ;;  %v2171_v51 = vperm.slane %v5126_v12, 7 }
 0x43d   :  { %2717 = vst [vmem:[#allocation1 + $0x7] ss:$9 sm:$0xff] %v2147_v21  ;;  %v2159_v21 = vperm.slane %v5071_v40, 3  ;;  %v3366_v40 = vsel %vm873_vm8, 1.0, %v3560_v13  ;;  %v2913_v52 = vpop.permute.xlu2 %2912  ;;  %vm5857_vm8 = vcmask 917312  }
 0x43e   :  { %v3098_v38 = vsel %vm3054_vm4, %v3097_v28, %v3096_v6  ;;  %v2910_v48 = vpop.permute.xlu0 %2909  ;;  %1715 = vst.msk [vmem:[%s5853_s3 + $0x178] sm:$0xff] %vm100_vm0, %v1161_v11  ;;  %v3103_v27 = vperm.slane %v2913_v52, %v5408_v22  ;;  %v2175_v11 = vperm.slane %v5163_v55, 3 }
 0x444   :  { %v2718_v50 = vld [vmem:[#allocation1] sm:$0xff] }
 0x445   :  { %2719 = vst [vmem:[#allocation1] ss:$9 sm:$0xff] %v2148_v63  ;;  %2981 = vperm.xlu0 %3503, %v2718_v50   ;;  %v2907_v63 = vpop.permute.xlu1 %2906 }
 0x446   :  { %2720 = vst [vmem:[#allocation1 + $0x1] ss:$9 sm:$0xff] %v2149_v26  ;;  %v3099_v50 = vperm.slane %v2907_v63, %v5287_v4  ;;  %v3101_v26 = vperm.slane %v2910_v48, %v5311_v16  ;;  %v2919_v6 = vpop.permute.xlu0 %2918 }
 0x447   :  { %2721 = vst [vmem:[#allocation1 + $0x2] ss:$9 sm:$0xff] %v2150_v24 }
 0x448   :  { %2722 = vst [vmem:[#allocation1 + $0x3] ss:$9 sm:$0xff] %v2151_v61  ;;  %v3100_v3 = vsel %vm3058_vm5, %v3099_v50, %v3098_v38  ;;  %v1660_v61 = vadd.f32 %v3366_v40, %v5466_v37  ;;  %v2172_v38 = vperm.slane %v5163_v55, 0 }
 0x449   :  { %2723 = vst [vmem:[#allocation1 + $0x4] ss:$9 sm:$0xff] %v2152_v59  ;;  %v3102_v24 = vsel %vm3062_vm6, %v3101_v26, %v3100_v3  ;;  %v2164_v59 = vperm.slane %v5126_v12, 0  ;;  %v2176_v26 = vperm.slane %v5163_v55, 4 }
 0x44a   :  { %2724 = vst [vmem:[#allocation1 + $0x5] ss:$9 sm:$0xff] %v2153_v31  ;;  %v3104_v47 = vsel %vm3066_vm10, %v3103_v27, %v3102_v24  ;;  %v2177_v24 = vperm.slane %v5163_v55, 5 }
 0x44b   :  { %2725 = vst [vmem:[#allocation1 + $0x6] ss:$9 sm:$0xff] %v2154_v54  ;;  %v2166_v54 = vperm.slane %v5126_v12, 2 }
 0x44c   :  { %2726 = vst [vmem:[#allocation1 + $0x7] ss:$9 sm:$0xff] %v2155_v29  ;;  %v3367_v29 = vsel %vm874_vm7, 1.0, %v3560_v13  ;;  %vm3078_vm7 = vcmask 1048512  }
 0x44d   :  { %v1661_v37 = vadd.f32 %v3367_v29, %v1660_v61  ;;  %v2178_v61 = vperm.slane %v5163_v55, 6 }
 0x44e   :  { %v2928_v40 = vpop.permute.xlu0 %2927 }
 0x44f   :  { %v1662_v13 = vrot.slane %v1661_v37, 4 }
 0x453   :  { %v2727_v36 = vld [vmem:[#allocation1] sm:$0xff] }
 0x454   :  { %2728 = vst [vmem:[#allocation1] ss:$9 sm:$0xff] %v2156_v14  ;;  %2984 = vperm.xlu2 %3502, %v2727_v36   ;;  %v2916_v14 = vpop.permute.xlu1 %2915 }
 0x455   :  { %2729 = vst [vmem:[#allocation1 + $0x1] ss:$9 sm:$0xff] %v2157_v18  ;;  %v1164_v18 = vpop.f32.mrf.mxu3  ;;  %v3105_v36 = vperm.slane %v2916_v14, %v5411_v10  ;;  %v2189_v14 = vperm.slane %v5370_v32, 1 }
 0x456   :  { %2730 = vst [vmem:[#allocation1 + $0x2] ss:$9 sm:$0xff] %v2158_v8  ;;  %v3107_v8 = vperm.slane %v2919_v6, %v5493_v17  ;;  %v2187_v6 = vperm.slane %v5124_v23, 7 }
 0x457   :  { %2731 = vst [vmem:[#allocation1 + $0x3] ss:$9 sm:$0xff] %v2159_v21  ;;  %v3106_v28 = vsel %vm5857_vm8, %v3105_v36, %v3104_v47  ;;  %v1663_v21 = vadd.f32 %v1662_v13, %v1661_v37  ;;  %v2182_v37 = vperm.slane %v5124_v23, 2  ;;  %v2184_v47 = vperm.slane %v5124_v23, 4 }
 0x458   :  { %2732 = vst [vmem:[#allocation1 + $0x4] ss:$9 sm:$0xff] %v2160_v45  ;;  %v5619_v12 = vsel %vm3074_vm9, %v3107_v8, %v3106_v28  ;;  %v5622_v45 = vadd.s32 4294967176, %v4063_v57  ;;  %v2188_v13 = vperm.slane %v5370_v32, 0  ;;  %v2191_v36 = vperm.slane %v5370_v32, 3 }
 0x459   :  { %2733 = vst [vmem:[#allocation1 + $0x5] ss:$9 sm:$0xff] %v2161_v15  ;;  %v1664_v15 = vrot.slane %v1663_v21, 2  ;;  %v2193_v28 = vperm.slane %v5370_v32, 5  ;;  %vm3176_vm8 = vcmask 1040384  }
 0x45a   :  { %2734 = vst [vmem:[#allocation1 + $0x6] ss:$9 sm:$0xff] %v2162_v5  ;;  %v2173_v5 = vperm.slane %v5163_v55, 1  ;;  %v3077_v50 = vperm.slane %v5488_v39, %v5622_v45 }
 0x45b   :  { %2735 = vst [vmem:[#allocation1 + $0x7] ss:$9 sm:$0xff] %v2163_v43  ;;  %v2174_v43 = vperm.slane %v5163_v55, 2  ;;  %v1665_v63 = vadd.f32 %v1664_v15, %v1663_v21  ;;  %v2194_v21 = vperm.slane %v5370_v32, 6 }
 0x45c   :  { %1716 = vst.msk [vmem:[%s5853_s3 + $0x180] sm:$0xff] %vm100_vm0, %v1164_v18  ;;  %v5634_v52 = vsel %vm3078_vm7, %v3077_v50, %v5499_v9  ;;  %v2925_v39 = vpop.permute.xlu1 %2924  ;;  %v2181_v9 = vperm.slane %v5124_v23, 1  ;;  %v2190_v18 = vperm.slane %v5370_v32, 2 }
 0x45d   :  { %v1666_v3 = vrot.slane %v1665_v63, 1  ;;  %v3111_v27 = vperm.slane %v2925_v39, %v4063_v57  ;;  %v2203_v39 = vperm.slane %v5422_v62, 7 }
 0x462   :  { %v2736_v31 = vld [vmem:[#allocation1] sm:$0xff] }
 0x463   :  { %2987 = vperm.xlu1 %3501, %v2736_v31   ;;  %2737 = vst [vmem:[#allocation1] ss:$9 sm:$0xff] %v2164_v59  ;;  %v2179_v59 = vperm.slane %v5163_v55, 7  ;;  %v1667_v31 = vadd.f32 %v1666_v3, %v1665_v63  ;;  %v2180_v55 = vperm.slane %v5124_v23, 0  ;;  %v2200_v3 = vperm.slane %v5422_v62, 4 }
 0x464   :  { %2738 = vst [vmem:[#allocation1 + $0x1] ss:$9 sm:$0xff] %v2165_v0  ;;  %v1167_v0 = vpop.f32.mrf.mxu3 }
 0x465   :  { %2739 = vst [vmem:[#allocation1 + $0x2] ss:$9 sm:$0xff] %v2166_v54  ;;  %v3112_v54 = vperm.slane %v2928_v40, %v5204_v58  ;;  %v2201_v40 = vperm.slane %v5422_v62, 5 }
 0x466   :  { %2740 = vst [vmem:[#allocation1 + $0x3] ss:$9 sm:$0xff] %v2167_v35 }
 0x467   :  { %2741 = vst [vmem:[#allocation1 + $0x4] ss:$9 sm:$0xff] %v2168_v25  ;;  %v5641_v29 = vsel %vm3022_vm11, %v3112_v54, %v3111_v27  ;;  %v2183_v25 = vperm.slane %v5124_v23, 3  ;;  %v2207_v54 = vperm.slane %v5440_v49, 3  ;;  %v2208_v27 = vperm.slane %v5440_v49, 4 }
 0x468   :  { %2742 = vst [vmem:[#allocation1 + $0x5] ss:$9 sm:$0xff] %v2169_v60  ;;  %v2185_v60 = vperm.slane %v5124_v23, 5 }
 0x469   :  { %2743 = vst [vmem:[#allocation1 + $0x6] ss:$9 sm:$0xff] %v2170_v42  ;;  %v2186_v42 = vperm.slane %v5124_v23, 6  ;;  %v2192_v23 = vperm.slane %v5370_v32, 4 }
 0x46a   :  { %2744 = vst [vmem:[#allocation1 + $0x7] ss:$9 sm:$0xff] %v2171_v51 }
 0x46b   :  { %1717 = vst.msk [vmem:[%s5853_s3 + $0x188] sm:$0xff] %vm100_vm0, %v1167_v0  ;;  %v2204_v0 = vperm.slane %v5440_v49, 0 }
 0x46c   :  { %3187 = vst [vmem:[#allocation4] sm:$0x1] %v1667_v31  ;;  %v1170_v51 = vpop.f32.mrf.mxu3  ;;  %v2205_v31 = vperm.slane %v5440_v49, 1 }
 0x46d   :  { %1718 = vst.msk [vmem:[%s5853_s3 + $0x190] sm:$0xff] %vm100_vm0, %v1170_v51  ;;  %v2217_v51 = vperm.slane %v5173_v30, 5  ;;  %3211 = dma.vmem_to_hbm [thread:$0]  %s3207_s11, 16, %s3209_s14, [#allocation5]  }
 0x471   :  { %v2745_v48 = vld [vmem:[#allocation1] sm:$0xff] }
 0x472   :  { %2990 = vperm.xlu0 %3503, %v2745_v48   ;;  %2746 = vst [vmem:[#allocation1] ss:$9 sm:$0xff] %v2172_v38  ;;  %v2195_v38 = vperm.slane %v5370_v32, 7  ;;  %v2196_v48 = vperm.slane %v5422_v62, 0  ;;  %v2198_v32 = vperm.slane %v5422_v62, 2 }
 0x473   :  { %2747 = vst [vmem:[#allocation1 + $0x1] ss:$9 sm:$0xff] %v2173_v5  ;;  %v2922_v5 = vpop.permute.xlu2 %2921 }
 0x474   :  { %2748 = vst [vmem:[#allocation1 + $0x2] ss:$9 sm:$0xff] %v2174_v43  ;;  %v1173_v15 = vpop.f32.mrf.mxu3  ;;  %v2197_v43 = vperm.slane %v5422_v62, 1  ;;  %v3109_v63 = vperm.slane %v2922_v5, %v5622_v45  ;;  %v2227_v5 = vperm.slane %v5182_v2, 7 }
 0x475   :  { %2749 = vst [vmem:[#allocation1 + $0x3] ss:$9 sm:$0xff] %v2175_v11  ;;  %v2199_v11 = vperm.slane %v5422_v62, 3 }
 0x476   :  { %2750 = vst [vmem:[#allocation1 + $0x4] ss:$9 sm:$0xff] %v2176_v26  ;;  %v3110_v26 = vsel %vm3078_vm7, %v3109_v63, %v5619_v12 }
 0x477   :  { %2751 = vst [vmem:[#allocation1 + $0x5] ss:$9 sm:$0xff] %v2177_v24  ;;  %v3173_v24 = vrot.slane %v3110_v26, 7  ;;  %v2232_v26 = vperm.slane %v5148_v20, 4 }
 0x478   :  { %2752 = vst [vmem:[#allocation1 + $0x6] ss:$9 sm:$0xff] %v2178_v61  ;;  %v2202_v61 = vperm.slane %v5422_v62, 6 }
 0x479   :  { %2753 = vst [vmem:[#allocation1 + $0x7] ss:$9 sm:$0xff] %v2179_v59  ;;  %v5682_v59 = vsel %vm3176_vm8, %v5634_v52, %v3173_v24  ;;  %v2206_v52 = vperm.slane %v5440_v49, 2  ;;  %v2234_v24 = vperm.slane %v5148_v20, 6 }
 0x47a   :  { %1719 = vst.msk [vmem:[%s5853_s3 + $0x198] sm:$0xff] %vm100_vm0, %v1173_v15  ;;  %v2226_v15 = vperm.slane %v5182_v2, 6 }
 0x47c   :  { %v1176_v12 = vpop.f32.mrf.mxu3 }
 0x47d   :  { %1720 = vst.msk [vmem:[%s5853_s3 + $0x1a0] sm:$0xff] %vm100_vm0, %v1176_v12  ;;  %v2237_v12 = vperm.slane %v5191_v33, 1 }
 0x480   :  { %v2754_v35 = vld [vmem:[#allocation1] sm:$0xff] }
 0x481   :  { %2993 = vperm.xlu2 %3502, %v2754_v35   ;;  %2755 = vst [vmem:[#allocation1] ss:$9 sm:$0xff] %v2180_v55  ;;  %v2209_v55 = vperm.slane %v5440_v49, 5  ;;  %v2211_v35 = vperm.slane %v5440_v49, 7 }
 0x482   :  { %2756 = vst [vmem:[#allocation1 + $0x1] ss:$9 sm:$0xff] %v2181_v9  ;;  %v2210_v9 = vperm.slane %v5440_v49, 6  ;;  %v2215_v49 = vperm.slane %v5173_v30, 3 }
 0x483   :  { %2757 = vst [vmem:[#allocation1 + $0x2] ss:$9 sm:$0xff] %v2182_v37 }
 0x484   :  { %2758 = vst [vmem:[#allocation1 + $0x3] ss:$9 sm:$0xff] %v2183_v25  ;;  %v1179_v37 = vpop.f32.mrf.mxu3  ;;  %v2212_v25 = vperm.slane %v5173_v30, 0 }
 0x485   :  { %2759 = vst [vmem:[#allocation1 + $0x4] ss:$9 sm:$0xff] %v2184_v47  ;;  %v2213_v47 = vperm.slane %v5173_v30, 1 }
 0x486   :  { %2760 = vst [vmem:[#allocation1 + $0x5] ss:$9 sm:$0xff] %v2185_v60 }
 0x487   :  { %2761 = vst [vmem:[#allocation1 + $0x6] ss:$9 sm:$0xff] %v2186_v42  ;;  %v2214_v42 = vperm.slane %v5173_v30, 2 }
 0x488   :  { %2762 = vst [vmem:[#allocation1 + $0x7] ss:$9 sm:$0xff] %v2187_v6  ;;  %v2216_v6 = vperm.slane %v5173_v30, 4 }
 0x489   :  { %1721 = vst.msk [vmem:[%s5853_s3 + $0x1a8] sm:$0xff] %vm100_vm0, %v1179_v37 }
 0x48f   :  { %v2763_v8 = vld [vmem:[#allocation1] sm:$0xff] }
 0x490   :  { %2996 = vperm.xlu1 %3501, %v2763_v8   ;;  %2764 = vst [vmem:[#allocation1] ss:$9 sm:$0xff] %v2188_v13  ;;  %v2218_v13 = vperm.slane %v5173_v30, 6  ;;  %v2221_v8 = vperm.slane %v5182_v2, 1 }
 0x491   :  { %2765 = vst [vmem:[#allocation1 + $0x1] ss:$9 sm:$0xff] %v2189_v14  ;;  %v2219_v14 = vperm.slane %v5173_v30, 7  ;;  %v2223_v30 = vperm.slane %v5182_v2, 3 }
 0x492   :  { %2766 = vst [vmem:[#allocation1 + $0x2] ss:$9 sm:$0xff] %v2190_v18  ;;  %v1182_v18 = vpop.f32.mrf.mxu3 }
 0x493   :  { %2767 = vst [vmem:[#allocation1 + $0x3] ss:$9 sm:$0xff] %v2191_v36  ;;  %v2220_v36 = vperm.slane %v5182_v2, 0 }
 0x494   :  { %2768 = vst [vmem:[#allocation1 + $0x4] ss:$9 sm:$0xff] %v2192_v23 }
 0x495   :  { %2769 = vst [vmem:[#allocation1 + $0x5] ss:$9 sm:$0xff] %v2193_v28  ;;  %v2222_v28 = vperm.slane %v5182_v2, 2 }
 0x496   :  { %2770 = vst [vmem:[#allocation1 + $0x6] ss:$9 sm:$0xff] %v2194_v21  ;;  %v2224_v21 = vperm.slane %v5182_v2, 4 }
 0x497   :  { %2771 = vst [vmem:[#allocation1 + $0x7] ss:$9 sm:$0xff] %v2195_v38  ;;  %v2225_v38 = vperm.slane %v5182_v2, 5  ;;  %v2230_v2 = vperm.slane %v5148_v20, 2 }
 0x498   :  { %1722 = vst.msk [vmem:[%s5853_s3 + $0x1b0] sm:$0xff] %vm100_vm0, %v1182_v18 }
 0x49e   :  { %v2772_v50 = vld [vmem:[#allocation1] sm:$0xff] }
 0x49f   :  { %2999 = vperm.xlu0 %3503, %v2772_v50   ;;  %2773 = vst [vmem:[#allocation1] ss:$9 sm:$0xff] %v2196_v48  ;;  %v1185_v48 = vpop.f32.mrf.mxu3  ;;  %v2231_v50 = vperm.slane %v5148_v20, 3 }
 0x4a0   :  { %2774 = vst [vmem:[#allocation1 + $0x1] ss:$9 sm:$0xff] %v2197_v43  ;;  %v2228_v43 = vperm.slane %v5148_v20, 0 }
 0x4a1   :  { %2775 = vst [vmem:[#allocation1 + $0x2] ss:$9 sm:$0xff] %v2198_v32  ;;  %v2229_v32 = vperm.slane %v5148_v20, 1 }
 0x4a2   :  { %2776 = vst [vmem:[#allocation1 + $0x3] ss:$9 sm:$0xff] %v2199_v11 }
 0x4a3   :  { %2777 = vst [vmem:[#allocation1 + $0x4] ss:$9 sm:$0xff] %v2200_v3  ;;  %v2233_v3 = vperm.slane %v5148_v20, 5 }
 0x4a4   :  { %2778 = vst [vmem:[#allocation1 + $0x5] ss:$9 sm:$0xff] %v2201_v40  ;;  %v2235_v40 = vperm.slane %v5148_v20, 7  ;;  %v2239_v20 = vperm.slane %v5191_v33, 3 }
 0x4a5   :  { %2779 = vst [vmem:[#allocation1 + $0x6] ss:$9 sm:$0xff] %v2202_v61 }
 0x4a6   :  { %2780 = vst [vmem:[#allocation1 + $0x7] ss:$9 sm:$0xff] %v2203_v39  ;;  %v2236_v39 = vperm.slane %v5191_v33, 0 }
 0x4a7   :  { %1723 = vst.msk [vmem:[%s5853_s3 + $0x1b8] sm:$0xff] %vm100_vm0, %v1185_v48  ;;  %v1188_v63 = vpop.f32.mrf.mxu3 }
 0x4a8   :  { %1724 = vst.msk [vmem:[%s5853_s3 + $0x1c0] sm:$0xff] %vm100_vm0, %v1188_v63 }
 0x4ad   :  { %v2781_v62 = vld [vmem:[#allocation1] sm:$0xff] }
 0x4ae   :  { %3002 = vperm.xlu2 %3502, %v2781_v62   ;;  %2782 = vst [vmem:[#allocation1] ss:$9 sm:$0xff] %v2204_v0  ;;  %v2241_v62 = vperm.slane %v5191_v33, 5 }
 0x4af   :  { %2783 = vst [vmem:[#allocation1 + $0x1] ss:$9 sm:$0xff] %v2205_v31  ;;  %v1191_v61 = vpop.f32.mrf.mxu3 }
 0x4b0   :  { %2784 = vst [vmem:[#allocation1 + $0x2] ss:$9 sm:$0xff] %v2206_v52  ;;  %v2238_v52 = vperm.slane %v5191_v33, 2 }
 0x4b1   :  { %2785 = vst [vmem:[#allocation1 + $0x3] ss:$9 sm:$0xff] %v2207_v54  ;;  %v2240_v54 = vperm.slane %v5191_v33, 4 }
 0x4b2   :  { %2786 = vst [vmem:[#allocation1 + $0x4] ss:$9 sm:$0xff] %v2208_v27  ;;  %v2242_v27 = vperm.slane %v5191_v33, 6 }
 0x4b3   :  { %2787 = vst [vmem:[#allocation1 + $0x5] ss:$9 sm:$0xff] %v2209_v55  ;;  %v2243_v55 = vperm.slane %v5191_v33, 7 }
 0x4b4   :  { %2788 = vst [vmem:[#allocation1 + $0x6] ss:$9 sm:$0xff] %v2210_v9 }
 0x4b5   :  { %2789 = vst [vmem:[#allocation1 + $0x7] ss:$9 sm:$0xff] %v2211_v35 }
 0x4b6   :  { %1725 = vst.msk [vmem:[%s5853_s3 + $0x1c8] sm:$0xff] %vm100_vm0, %v1191_v61 }
 0x4b7   :  { %v1194_v31 = vpop.f32.mrf.mxu3 }
 0x4b8   :  { %1726 = vst.msk [vmem:[%s5853_s3 + $0x1d0] sm:$0xff] %vm100_vm0, %v1194_v31 }
 0x4bc   :  { %v2790_v60 = vld [vmem:[#allocation1] sm:$0xff] }
 0x4bd   :  { %3005 = vperm.xlu1 %3501, %v2790_v60   ;;  %2791 = vst [vmem:[#allocation1] ss:$9 sm:$0xff] %v2212_v25  ;;  %v2931_v60 = vpop.permute.xlu2 %2930 }
 0x4be   :  { %2792 = vst [vmem:[#allocation1 + $0x1] ss:$9 sm:$0xff] %v2213_v47  ;;  %v3114_v63 = vperm.slane %v2931_v60, %v5224_v46 }
 0x4bf   :  { %2793 = vst [vmem:[#allocation1 + $0x2] ss:$9 sm:$0xff] %v2214_v42  ;;  %v1197_v9 = vpop.f32.mrf.mxu3  ;;  %v2934_v42 = vpop.permute.xlu1 %2933 }
 0x4c0   :  { %2794 = vst [vmem:[#allocation1 + $0x3] ss:$9 sm:$0xff] %v2215_v49  ;;  %v2937_v49 = vpop.permute.xlu0 %2936 }
 0x4c1   :  { %2795 = vst [vmem:[#allocation1 + $0x4] ss:$9 sm:$0xff] %v2216_v6 }
 0x4c2   :  { %2796 = vst [vmem:[#allocation1 + $0x5] ss:$9 sm:$0xff] %v2217_v51 }
 0x4c3   :  { %2797 = vst [vmem:[#allocation1 + $0x6] ss:$9 sm:$0xff] %v2218_v13 }
 0x4c4   :  { %2798 = vst [vmem:[#allocation1 + $0x7] ss:$9 sm:$0xff] %v2219_v14 }
 0x4c5   :  { %1727 = vst.msk [vmem:[%s5853_s3 + $0x1d8] sm:$0xff] %vm100_vm0, %v1197_v9  ;;  %v2940_v6 = vpop.permute.xlu2 %2939 }
 0x4c6   :  { %v3120_v61 = vperm.slane %v2940_v6, %v5228_v7 }
 0x4c7   :  { %v1200_v35 = vpop.f32.mrf.mxu3  ;;  %v2943_v51 = vpop.permute.xlu1 %2942 }
 0x4c8   :  { %1728 = vst.msk [vmem:[%s5853_s3 + $0x1e0] sm:$0xff] %vm100_vm0, %v1200_v35  ;;  %v2946_v13 = vpop.permute.xlu0 %2945 }
 0x4cb   :  { %v2799_v23 = vld [vmem:[#allocation1] sm:$0xff] }
 0x4cc   :  { %3008 = vperm.xlu0 %3503, %v2799_v23   ;;  %2800 = vst [vmem:[#allocation1] ss:$9 sm:$0xff] %v2220_v36 }
 0x4cd   :  { %2801 = vst [vmem:[#allocation1 + $0x1] ss:$9 sm:$0xff] %v2221_v8  ;;  %v2949_v14 = vpop.permute.xlu2 %2948 }
 0x4ce   :  { %2802 = vst [vmem:[#allocation1 + $0x2] ss:$9 sm:$0xff] %v2222_v28 }
 0x4cf   :  { %2803 = vst [vmem:[#allocation1 + $0x3] ss:$9 sm:$0xff] %v2223_v30  ;;  %v1203_v37 = vpop.f32.mrf.mxu3  ;;  %v2952_v18 = vpop.permute.xlu1 %2951 }
 0x4d0   :  { %2804 = vst [vmem:[#allocation1 + $0x4] ss:$9 sm:$0xff] %v2224_v21  ;;  %v2955_v36 = vpop.permute.xlu0 %2954 }
 0x4d1   :  { %2805 = vst [vmem:[#allocation1 + $0x5] ss:$9 sm:$0xff] %v2225_v38  ;;  %v3130_v6 = vperm.slane %v2955_v36, %v5287_v4 }
 0x4d2   :  { %2806 = vst [vmem:[#allocation1 + $0x6] ss:$9 sm:$0xff] %v2226_v15 }
 0x4d3   :  { %2807 = vst [vmem:[#allocation1 + $0x7] ss:$9 sm:$0xff] %v2227_v5 }
 0x4d4   :  { %1729 = vst.msk [vmem:[%s5853_s3 + $0x1e8] sm:$0xff] %vm100_vm0, %v1203_v37 }
 0x4d5   :  { %v2958_v8 = vpop.permute.xlu2 %2957 }
 0x4d7   :  { %v1206_v25 = vpop.f32.mrf.mxu3  ;;  %v2961_v23 = vpop.permute.xlu1 %2960 }
 0x4d8   :  { %1730 = vst.msk [vmem:[%s5853_s3 + $0x1f0] sm:$0xff] %vm100_vm0, %v1206_v25  ;;  %v5776_v28 = vpop.permute.xlu0 %2963 }
 0x4da   :  { %v2808_v11 = vld [vmem:[#allocation1] sm:$0xff] }
 0x4db   :  { %3011 = vperm.xlu2 %3502, %v2808_v11   ;;  %2809 = vst [vmem:[#allocation1] ss:$9 sm:$0xff] %v2228_v43  ;;  %v3116_v43 = vperm.slane %v2934_v42, %v5219_v53  ;;  %v3115_v11 = vsel %vm3026_vm12, %v3114_v63, %v5641_v29 }
 0x4dc   :  { %2810 = vst [vmem:[#allocation1 + $0x1] ss:$9 sm:$0xff] %v2229_v32 }
 0x4dd   :  { %2811 = vst [vmem:[#allocation1 + $0x2] ss:$9 sm:$0xff] %v2230_v2  ;;  %v5780_v21 = vpop.permute.xlu2 %2966 }
 0x4de   :  { %2812 = vst [vmem:[#allocation1 + $0x3] ss:$9 sm:$0xff] %v2231_v50  ;;  %v3117_v50 = vsel %vm3030_vm13, %v3116_v43, %v3115_v11 }
 0x4df   :  { %2813 = vst [vmem:[#allocation1 + $0x4] ss:$9 sm:$0xff] %v2232_v26  ;;  %v1209_v47 = vpop.f32.mrf.mxu3  ;;  %v5778_v30 = vpop.permute.xlu1 %2969  ;;  %v3118_v26 = vperm.slane %v2937_v49, %v5232_v1 }
 0x4e0   :  { %2814 = vst [vmem:[#allocation1 + $0x5] ss:$9 sm:$0xff] %v2233_v3  ;;  %v2973_v38 = vpop.permute.xlu0 %2972 }
 0x4e1   :  { %2815 = vst [vmem:[#allocation1 + $0x6] ss:$9 sm:$0xff] %v2234_v24  ;;  %v3119_v24 = vsel %vm3034_vm14, %v3118_v26, %v3117_v50  ;;  %v3140_v50 = vperm.slane %v5778_v30, %v5622_v45  ;;  %v3138_v26 = vperm.slane %v5780_v21, %v5493_v17 }
 0x4e2   :  { %2816 = vst [vmem:[#allocation1 + $0x7] ss:$9 sm:$0xff] %v2235_v40  ;;  %v3122_v40 = vperm.slane %v2943_v51, %v5259_v19 }
 0x4e3   :  { %1731 = vst.msk [vmem:[%s5853_s3 + $0x1f8] sm:$0xff] %vm100_vm0, %v1209_v47  ;;  %vm5858_vm0 = vcmask 917312   ;;  %s3563_s3 = smov [#allocation2]  }
 0x4e4   :  { %s3195_s22 = sshll.u32 %s3563_s3, 4  ;;  %s3196_s22 = int_to_ptr.vmem [resolvable:$true] %s3195_s22 }
 0x4e5   :  { %v2976_v5 = vpop.permute.xlu2 %2975 }
 0x4e6   :  { %v3143_v29 = vperm.slane %v2976_v5, %v5204_v58 }
 0x4e7   :  { %v2979_v15 = vpop.permute.xlu1 %2978 }
 0x4e8   :  { %v2982_v48 = vpop.permute.xlu0 %2981 }
 0x4e9   :  { %v2817_v0 = vld [vmem:[#allocation1] sm:$0xff]  ;;  %v3147_v31 = vperm.slane %v2982_v48, %v5219_v53  ;;  %v3126_v53 = vperm.slane %v2949_v14, %v5290_v41 }
 0x4ea   :  { %3014 = vperm.xlu1 %3501, %v2817_v0   ;;  %2818 = vst [vmem:[#allocation1] ss:$9 sm:$0xff] %v2236_v39  ;;  %v3142_v39 = vperm.slane %v2973_v38, %v4063_v57  ;;  %v3121_v0 = vsel %vm3038_vm15, %v3120_v61, %v3119_v24  ;;  %v3132_v38 = vperm.slane %v2958_v8, %v5311_v16 }
 0x4eb   :  { %2819 = vst [vmem:[#allocation1 + $0x1] ss:$9 sm:$0xff] %v2237_v12  ;;  %v3145_v12 = vperm.slane %v2979_v15, %v5224_v46  ;;  %v3128_v46 = vperm.slane %v2952_v18, %v5282_v44  ;;  %v3134_v18 = vperm.slane %v2961_v23, %v5408_v22  ;;  %v3136_v8 = vperm.slane %v5776_v28, %v5411_v10 }
 0x4ec   :  { %2820 = vst [vmem:[#allocation1 + $0x2] ss:$9 sm:$0xff] %v2238_v52 }
 0x4ed   :  { %2821 = vst [vmem:[#allocation1 + $0x3] ss:$9 sm:$0xff] %v2239_v20  ;;  %v2985_v2 = vpop.permute.xlu2 %2984  ;;  %v3123_v20 = vsel %vm3042_vm1, %v3122_v40, %v3121_v0 }
 0x4ee   :  { %2822 = vst [vmem:[#allocation1 + $0x4] ss:$9 sm:$0xff] %v2240_v54  ;;  %v3149_v35 = vperm.slane %v2985_v2, %v5232_v1 }
 0x4ef   :  { %2823 = vst [vmem:[#allocation1 + $0x5] ss:$9 sm:$0xff] %v2241_v62  ;;  %v2988_v32 = vpop.permute.xlu1 %2987  ;;  %v3124_v62 = vperm.slane %v2946_v13, %v5255_v34 }
 0x4f0   :  { %2824 = vst [vmem:[#allocation1 + $0x6] ss:$9 sm:$0xff] %v2242_v27  ;;  %v2991_v3 = vpop.permute.xlu0 %2990  ;;  %v3144_v27 = vsel %vm3022_vm11, %v3143_v29, %v3142_v39  ;;  %v3151_v58 = vperm.slane %v2988_v32, %v5228_v7  ;;  %vm5859_vm11 = vmmov %vm5858_vm0 }
 0x4f1   :  { %2825 = vst [vmem:[#allocation1 + $0x7] ss:$9 sm:$0xff] %v2243_v55  ;;  %v3146_v55 = vsel %vm3026_vm12, %v3145_v12, %v3144_v27  ;;  %v3125_v57 = vsel %vm3046_vm2, %v3124_v62, %v3123_v20  ;;  %v3153_v37 = vperm.slane %v2991_v3, %v5259_v19  ;;  %vm3178_vm12 = vcmask 1042434  }
 0x4f2   :  { %v3148_v9 = vsel %vm3030_vm13, %v3147_v31, %v3146_v55  ;;  %v3127_v25 = vsel %vm3050_vm3, %v3126_v53, %v3125_v57  ;;  %vm3180_vm13 = vcmask 1041408  }
 0x4f3   :  { %v3150_v47 = vsel %vm3034_vm14, %v3149_v35, %v3148_v9  ;;  %v3129_v60 = vsel %vm3054_vm4, %v3128_v46, %v3127_v25  ;;  %vm3184_vm14 = vcmp.lt.s32.totalorder %v809_v56, 512 }
 0x4f4   :  { %v3152_v42 = vsel %vm3038_vm15, %v3151_v58, %v3150_v47  ;;  %v3131_v14 = vsel %vm3058_vm5, %v3130_v6, %v3129_v60 }
 0x4f5   :  { %v2994_v54 = vpop.permute.xlu2 %2993  ;;  %v3154_v7 = vsel %vm3042_vm1, %v3153_v37, %v3152_v42  ;;  %v3133_v48 = vsel %vm3062_vm6, %v3132_v38, %v3131_v14 }
 0x4f6   :  { %v3155_v1 = vperm.slane %v2994_v54, %v5255_v34  ;;  %v3135_v34 = vsel %vm3066_vm10, %v3134_v18, %v3133_v48 }
 0x4f7   :  { %v3137_v2 = vsel %vm5858_vm0, %v3136_v8, %v3135_v34 }
 0x4f8   :  { %v2826_v33 = vld [vmem:[#allocation1] sm:$0xff]  ;;  %v3156_v15 = vsel %vm3046_vm2, %v3155_v1, %v3154_v7  ;;  %v3139_v3 = vsel %vm3074_vm9, %v3138_v26, %v3137_v2 }
 0x4f9   :  { %3017 = vperm.xlu0 %3503, %v2826_v33   ;;  %v3141_v40 = vsel %vm3078_vm7, %v3140_v50, %v3139_v3 }
 0x502   :  { %v2997_v52 = vpop.permute.xlu1 %2996 }
 0x503   :  { %v3157_v13 = vperm.slane %v2997_v52, %v5290_v41 }
 0x505   :  { %v3158_v36 = vsel %vm3050_vm3, %v3157_v13, %v3156_v15 }
 0x508   :  { %v3003_v51 = vpop.permute.xlu2 %3002 }
 0x511   :  { %v3000_v33 = vpop.permute.xlu0 %2999 }
 0x512   :  { %v3159_v19 = vperm.slane %v3000_v33, %v5282_v44  ;;  %v3161_v44 = vperm.slane %v3003_v51, %v5287_v4 }
 0x514   :  { %v3160_v43 = vsel %vm3054_vm4, %v3159_v19, %v3158_v36 }
 0x515   :  { %v3162_v11 = vsel %vm3058_vm5, %v3161_v44, %v3160_v43 }
 0x52f   :  { %v3006_v49 = vpop.permute.xlu1 %3005 }
 0x530   :  { %v3163_v41 = vperm.slane %v3006_v49, %v5311_v16 }
 0x532   :  { %v3164_v16 = vsel %vm3062_vm6, %v3163_v41, %v3162_v11 }
 0x535   :  { %v3012_v32 = vpop.permute.xlu2 %3011 }
 0x536   :  { %v3167_v28 = vperm.slane %v3012_v32, %v5411_v10  ;;  %v3174_v10 = vrot.slane %v3141_v40, 6 }
 0x53e   :  { %v3009_v5 = vpop.permute.xlu0 %3008 }
 0x53f   :  { %v3165_v63 = vperm.slane %v3009_v5, %v5408_v22 }
 0x541   :  { %v3166_v4 = vsel %vm3066_vm10, %v3165_v63, %v3164_v16 }
 0x542   :  { %v3168_v61 = vsel %vm5859_vm11, %v3167_v28, %v3166_v4 }
 0x55c   :  { %v3015_v23 = vpop.permute.xlu1 %3014 }
 0x55d   :  { %v3169_v22 = vperm.slane %v3015_v23, %v5493_v17 }
 0x55f   :  { %v3170_v39 = vsel %vm3074_vm9, %v3169_v22, %v3168_v61 }
 0x56b   :  { %v3018_v24 = vpop.permute.xlu0 %3017 }
 0x56c   :  { %v3171_v30 = vperm.slane %v3018_v24, %v5622_v45 }
 0x56e   :  { %v3172_v12 = vsel %vm3078_vm7, %v3171_v30, %v3170_v39 }
 0x56f   :  { %v3175_v17 = vrot.slane %v3172_v12, 5 }
 0x571   :  { %v3179_v21 = vsel %vm3178_vm12, %v3174_v10, %v3175_v17 }
 0x572   :  { %v3181_v45 = vsel %vm3180_vm13, %v5682_v59, %v3179_v21 }
 0x573   :  { %3186 = vst.msk [vmem:[#allocation2] sm:$0xf] %vm3184_vm14, %v3181_v45 }
 0x574   :  { %3200 = dma.vmem_to_hbm [thread:$0]  %s3196_s22, 64, %s3198_s2, [#allocation3]  }
 0x575   :  { %3555 = dma.done.wait [#allocation3], 64  }
 0x576   :  { %3556 = vsyncadd [#allocation3], 4294967232 }
 0x577   :  { %3557 = dma.done.wait [#allocation5], 16  }
 0x578   :  { %3558 = vsyncadd [#allocation5], 4294967280 }
 0x579   :  { %3222 = vsyncpa [#allocation3], 1 }
 0x57a   :  { %3223 = vsyncpa [#allocation5], 1 }

</bundles_post_ra>
